<compile_context>
chip_gen: v5e
topology: v5e:2x2
jax: 0.10.0
libtpu: 0.0.40
codegen_flags: <defaults>
</compile_context>

<pallas_src>
import jax
import jax.numpy as jnp
import numpy as np
from jax.experimental import pallas as pl
from jax.experimental.pallas import tpu as pltpu

# --------------------------------------------------------------------------
# Net22 hyperparameters (from the PyTorch module)
# --------------------------------------------------------------------------
IMAGE_WH = 64          # scaled down from 224 for a small, runnable example
KEYPOINT_SIZE = 136
P_DROP = 0.4

CNN_1 = dict(in_c=1, out_c=32, k=4, s=2, pad=0, pool_k=3, pool_s=2)
CNN_2 = dict(in_c=32, out_c=64, k=3, s=1, pad=0, pool_k=2, pool_s=2)
FC1_OUT = 1024


def conv_size(input_size, kernel_size, stride, padding_size):
    return (input_size + 2 * padding_size - kernel_size) // stride + 1


def pool_size(input_size, kernel_size, stride):
    return (input_size - kernel_size) // stride + 1


def linear_size(depth, input_size):
    return depth * input_size ** 2


# --------------------------------------------------------------------------
# Pallas kernel 1: conv (as im2col matmul) + bias + ReLU + maxpool, fused
# --------------------------------------------------------------------------
def _conv_relu_pool_kernel(p_ref, w_ref, b_ref, o_ref):
    # p_ref: (KK, M, K)  -- KK = pool_k*pool_k im2col slabs, one per pool offset
    # w_ref: (K, C)      -- conv weight, torch (c, ky, kx) feature order
    # b_ref: (1, C)
    # o_ref: (M, C)      -- pooled output, M = batch * pool_H * pool_W
    kk = p_ref.shape[0]
    w = w_ref[...]
    b = b_ref[...]
    acc = jnp.maximum(
        jnp.dot(p_ref[0], w, preferred_element_type=jnp.float32) + b, 0.0)
    for i in range(1, kk):          # unrolled: kk is 9 (pool1) or 4 (pool2)
        y = jnp.maximum(
            jnp.dot(p_ref[i], w, preferred_element_type=jnp.float32) + b, 0.0)
        acc = jnp.maximum(acc, y)   # maxpool over the window, in VMEM
    o_ref[...] = acc.astype(o_ref.dtype)


def conv_relu_pool(patches, w, b):
    """patches: (KK, M, K) f32, w: (K, C) f32, b: (C,) f32 -> (M, C) f32."""
    KK, M, K = patches.shape
    Kw, C = w.shape
    assert K == Kw
    # Whole arrays fit comfortably in VMEM; single grid step (batch folded
    # into M) so there is no per-step launch overhead.
    return pl.pallas_call(
        _conv_relu_pool_kernel,
        out_shape=jax.ShapeDtypeStruct((M, C), jnp.float32),
    )(patches, w, b.reshape(1, C))


# --------------------------------------------------------------------------
# Pallas kernel 2: fc1 + ReLU + dropout + fc2, fused
# --------------------------------------------------------------------------
def _fc_fused_kernel(x_ref, w1_ref, b1_ref, m_ref, w2_ref, b2_ref, o_ref):
    # x_ref : (N, F)  f32      w1_ref: (F, H)  bf16     b1_ref: (1, H) f32
    # m_ref : (N, H)  f32  dropout scale mask (0 or 1/(1-p))
    # w2_ref: (H, O)  bf16     b2_ref: (1, O) f32       o_ref : (N, O) f32
    h = jnp.dot(x_ref[...].astype(w1_ref.dtype), w1_ref[...],
                preferred_element_type=jnp.float32)
    h = jnp.maximum(h + b1_ref[...], 0.0)      # ReLU
    h = h * m_ref[...]                          # dropout (train mode), fused
    y = jnp.dot(h.astype(w2_ref.dtype), w2_ref[...],
                preferred_element_type=jnp.float32)
    o_ref[...] = (y + b2_ref[...]).astype(o_ref.dtype)


def fc1_relu_dropout_fc2(x, w1, b1, mask_scale, w2, b2):
    """x: (N, F) f32; w1: (F, H) bf16; w2: (H, O) bf16 -> (N, O) f32."""
    N, F = x.shape
    _, H = w1.shape
    _, O = w2.shape
    return pl.pallas_call(
        _fc_fused_kernel,
        out_shape=jax.ShapeDtypeStruct((N, O), jnp.float32),
        compiler_params=pltpu.CompilerParams(
            # bf16 fc1 weight (~4.7 MiB) + small activations; 32 MiB leaves
            # headroom on v7x (64 MiB physical VMEM per TensorCore).
            vmem_limit_bytes=32 * 1024 * 1024,
        ),
    )(x, w1, b1.reshape(1, H), mask_scale, w2, b2.reshape(1, O))


# --------------------------------------------------------------------------
# Pure-JAX glue: pool-window-grouped im2col (indexing/reshape only)
# --------------------------------------------------------------------------
def pooled_im2col(x, k, s, pk, ps):
    """x: (N, H, W, C) NHWC.

    Returns (patches, P, Q) with patches of shape (pk*pk, N*P*Q, C*k*k):
    patches[w, (n,p,q), (c,ky,kx)] is the conv im2col row for the conv output
    position covered by pool-window offset w = (dy, dx) of pool cell (p, q).
    Feature order (c, ky, kx) matches torch's Conv2d weight flatten.
    """
    N, H, W, C = x.shape
    OH = (H - k) // s + 1
    OW = (W - k) // s + 1
    P = (OH - pk) // ps + 1
    Q = (OW - pk) // ps + 1
    step = s * ps
    wins = []
    for dy in range(pk):
        for dx in range(pk):
            cols = []
            for ky in range(k):
                for kx in range(k):
                    r0 = s * dy + ky
                    c0 = s * dx + kx
                    sl = x[:, r0:r0 + step * (P - 1) + 1:step,
                              c0:c0 + step * (Q - 1) + 1:step, :]  # (N,P,Q,C)
                    cols.append(sl)
            pc = jnp.stack(cols, axis=-1)                # (N, P, Q, C, k*k)
            wins.append(pc.reshape(N, P * Q, C * k * k))
    patches = jnp.stack(wins, axis=0)                    # (pk*pk, N, P*Q, K)
    return patches.reshape(pk * pk, N * P * Q, C * k * k), P, Q


# --------------------------------------------------------------------------
# Parameter construction (deterministic, synthetic)
# --------------------------------------------------------------------------
def init_params(key):
    ks = jax.random.split(key, 8)

    size_conv1 = conv_size(IMAGE_WH, CNN_1["k"], CNN_1["s"], CNN_1["pad"])
    size_pool1 = pool_size(size_conv1, CNN_1["pool_k"], CNN_1["pool_s"])
    size_conv2 = conv_size(size_pool1, CNN_2["k"], CNN_2["s"], CNN_2["pad"])
    size_pool2 = pool_size(size_conv2, CNN_2["pool_k"], CNN_2["pool_s"])
    lin1_in = linear_size(CNN_2["out_c"], size_pool2)

    def w_init(k, shape, fan_in):
        return (jax.random.normal(k, shape, jnp.float32)
                / np.sqrt(fan_in)).astype(jnp.float32)

    # torch-shaped weights
    w_conv1 = w_init(ks[0], (CNN_1["out_c"], CNN_1["in_c"], CNN_1["k"], CNN_1["k"]),
                     CNN_1["in_c"] * CNN_1["k"] ** 2)
    b_conv1 = w_init(ks[1], (CNN_1["out_c"],), CNN_1["in_c"] * CNN_1["k"] ** 2)
    w_conv2 = w_init(ks[2], (CNN_2["out_c"], CNN_2["in_c"], CNN_2["k"], CNN_2["k"]),
                     CNN_2["in_c"] * CNN_2["k"] ** 2)
    b_conv2 = w_init(ks[3], (CNN_2["out_c"],), CNN_2["in_c"] * CNN_2["k"] ** 2)
    w_fc1 = w_init(ks[4], (FC1_OUT, lin1_in), lin1_in)
    b_fc1 = w_init(ks[5], (FC1_OUT,), lin1_in)
    w_fc2 = w_init(ks[6], (KEYPOINT_SIZE, FC1_OUT), FC1_OUT)
    b_fc2 = w_init(ks[7], (FC1_OUT,), FC1_OUT)[:KEYPOINT_SIZE] * 0 + \
        w_init(ks[7], (KEYPOINT_SIZE,), FC1_OUT)

    return dict(
        # matmul-ready layouts; im2col feature order matches torch weight flatten
        w1m=w_conv1.reshape(CNN_1["out_c"], -1).T, b1=b_conv1,
        w2m=w_conv2.reshape(CNN_2["out_c"], -1).T, b2=b_conv2,
        # fc weights in bf16: halves the dominant HBM traffic (fc1 is 2304x1024)
        wfc1=w_fc1.T.astype(jnp.bfloat16), bfc1=b_fc1,
        wfc2=w_fc2.T.astype(jnp.bfloat16), bfc2=b_fc2,
        lin1_in=lin1_in,
    )


# --------------------------------------------------------------------------
# Full forward pass (Net22d.forward)
# --------------------------------------------------------------------------
def net22d_forward(x_nchw, params, dropout_key, training=True):
    N = x_nchw.shape[0]
    x = jnp.transpose(x_nchw, (0, 2, 3, 1))                  # NCHW -> NHWC

    # conv1 + ReLU + maxpool1 : one fused Pallas kernel, batch folded into M
    p1, P1, Q1 = pooled_im2col(x, CNN_1["k"], CNN_1["s"],
                               CNN_1["pool_k"], CNN_1["pool_s"])
    a1 = conv_relu_pool(p1, params["w1m"], params["b1"])
    a1 = a1.reshape(N, P1, Q1, CNN_1["out_c"])

    # conv2 + ReLU + maxpool2 : one fused Pallas kernel
    p2, P2, Q2 = pooled_im2col(a1, CNN_2["k"], CNN_2["s"],
                               CNN_2["pool_k"], CNN_2["pool_s"])
    a2 = conv_relu_pool(p2, params["w2m"], params["b2"])
    a2 = a2.reshape(N, P2, Q2, CNN_2["out_c"])

    # flatten in torch (C, H, W) order -> x.view(-1, size_linear_input1)
    flat = jnp.transpose(a2, (0, 3, 1, 2)).reshape(N, params["lin1_in"])

    # dropout mask (train mode): keep w.p. 1-p, scale survivors by 1/(1-p).
    # Built with jax.random (portable); the multiply is fused into the fc kernel.
    if training:
        keep = jax.random.bernoulli(dropout_key, 1.0 - P_DROP, (N, FC1_OUT))
        mask_scale = keep.astype(jnp.float32) * jnp.float32(1.0 / (1.0 - P_DROP))
    else:
        mask_scale = jnp.ones((N, FC1_OUT), jnp.float32)

    # fc1 + ReLU + dropout + fc2 : one fused Pallas kernel
    out = fc1_relu_dropout_fc2(flat, params["wfc1"], params["bfc1"],
                               mask_scale, params["wfc2"], params["bfc2"])
    return out


# --------------------------------------------------------------------------
if __name__ == "__main__":
    key = jax.random.PRNGKey(0)
    k_param, k_input, k_drop = jax.random.split(key, 3)

    params = init_params(k_param)

    batch = 2
    x = jax.random.normal(k_input, (batch, 1, IMAGE_WH, IMAGE_WH), jnp.float32)  # NCHW

    out = net22d_forward(x, params, k_drop, training=True)
    out = jax.block_until_ready(out)

    assert out.shape == (batch, KEYPOINT_SIZE), out.shape
    assert out.dtype == jnp.float32
    assert bool(jnp.all(jnp.isfinite(out)))
    print("KERNEL_OK")
</pallas_src>

<mosaic_0001>
module attributes {stable_mosaic.version = 11 : i64} {
  func.func @_conv_relu_pool_kernel(%arg0: memref<9x450x16xf32, #tpu.memory_space<vmem>>, %arg1: memref<16x32xf32, #tpu.memory_space<vmem>>, %arg2: memref<1x32xf32, #tpu.memory_space<vmem>>, %arg3: memref<450x32xf32, #tpu.memory_space<vmem>>) attributes {dimension_semantics = [], scalar_prefetch = 0 : i64, scratch_operands = 0 : i64, tpu.core_type = #tpu.core_type<tc>} {
    %c0 = arith.constant 0 : index
    %c0_0 = arith.constant 0 : index
    %0 = vector.load %arg1[%c0, %c0_0] : memref<16x32xf32, #tpu.memory_space<vmem>>, vector<16x32xf32>
    %c0_1 = arith.constant 0 : index
    %c0_2 = arith.constant 0 : index
    %1 = vector.load %arg2[%c0_1, %c0_2] : memref<1x32xf32, #tpu.memory_space<vmem>>, vector<1x32xf32>
    %c0_3 = arith.constant 0 : index
    %c0_4 = arith.constant 0 : index
    %c0_5 = arith.constant 0 : index
    %2 = vector.load %arg0[%c0_3, %c0_4, %c0_5] : memref<9x450x16xf32, #tpu.memory_space<vmem>>, vector<1x450x16xf32>
    %3 = vector.shape_cast %2 : vector<1x450x16xf32> to vector<450x16xf32>
    %cst = arith.constant dense<0.000000e+00> : vector<450x32xf32>
    %4 = tpu.matmul %3, %0, %cst {dimension_numbers = #tpu.dot_dimension_numbers<[1], [0], [0], [1], [0, 0, 1, 1], [], []>} : vector<450x16xf32>, vector<16x32xf32>, vector<450x32xf32> -> vector<450x32xf32>
    %5 = vector.broadcast %1 : vector<1x32xf32> to vector<450x32xf32>
    %6 = arith.addf %4, %5 : vector<450x32xf32>
    %cst_6 = arith.constant 0.000000e+00 : f32
    %7 = vector.broadcast %cst_6 : f32 to vector<450x32xf32>
    %8 = arith.maximumf %6, %7 : vector<450x32xf32>
    %c1 = arith.constant 1 : index
    %c0_7 = arith.constant 0 : index
    %c0_8 = arith.constant 0 : index
    %9 = vector.load %arg0[%c1, %c0_7, %c0_8] : memref<9x450x16xf32, #tpu.memory_space<vmem>>, vector<1x450x16xf32>
    %10 = vector.shape_cast %9 : vector<1x450x16xf32> to vector<450x16xf32>
    %cst_9 = arith.constant dense<0.000000e+00> : vector<450x32xf32>
    %11 = tpu.matmul %10, %0, %cst_9 {dimension_numbers = #tpu.dot_dimension_numbers<[1], [0], [0], [1], [0, 0, 1, 1], [], []>} : vector<450x16xf32>, vector<16x32xf32>, vector<450x32xf32> -> vector<450x32xf32>
    %12 = vector.broadcast %1 : vector<1x32xf32> to vector<450x32xf32>
    %13 = arith.addf %11, %12 : vector<450x32xf32>
    %cst_10 = arith.constant 0.000000e+00 : f32
    %14 = vector.broadcast %cst_10 : f32 to vector<450x32xf32>
    %15 = arith.maximumf %13, %14 : vector<450x32xf32>
    %16 = arith.maximumf %8, %15 : vector<450x32xf32>
    %c2 = arith.constant 2 : index
    %c0_11 = arith.constant 0 : index
    %c0_12 = arith.constant 0 : index
    %17 = vector.load %arg0[%c2, %c0_11, %c0_12] : memref<9x450x16xf32, #tpu.memory_space<vmem>>, vector<1x450x16xf32>
    %18 = vector.shape_cast %17 : vector<1x450x16xf32> to vector<450x16xf32>
    %cst_13 = arith.constant dense<0.000000e+00> : vector<450x32xf32>
    %19 = tpu.matmul %18, %0, %cst_13 {dimension_numbers = #tpu.dot_dimension_numbers<[1], [0], [0], [1], [0, 0, 1, 1], [], []>} : vector<450x16xf32>, vector<16x32xf32>, vector<450x32xf32> -> vector<450x32xf32>
    %20 = vector.broadcast %1 : vector<1x32xf32> to vector<450x32xf32>
    %21 = arith.addf %19, %20 : vector<450x32xf32>
    %cst_14 = arith.constant 0.000000e+00 : f32
    %22 = vector.broadcast %cst_14 : f32 to vector<450x32xf32>
    %23 = arith.maximumf %21, %22 : vector<450x32xf32>
    %24 = arith.maximumf %16, %23 : vector<450x32xf32>
    %c3 = arith.constant 3 : index
    %c0_15 = arith.constant 0 : index
    %c0_16 = arith.constant 0 : index
    %25 = vector.load %arg0[%c3, %c0_15, %c0_16] : memref<9x450x16xf32, #tpu.memory_space<vmem>>, vector<1x450x16xf32>
    %26 = vector.shape_cast %25 : vector<1x450x16xf32> to vector<450x16xf32>
    %cst_17 = arith.constant dense<0.000000e+00> : vector<450x32xf32>
    %27 = tpu.matmul %26, %0, %cst_17 {dimension_numbers = #tpu.dot_dimension_numbers<[1], [0], [0], [1], [0, 0, 1, 1], [], []>} : vector<450x16xf32>, vector<16x32xf32>, vector<450x32xf32> -> vector<450x32xf32>
    %28 = vector.broadcast %1 : vector<1x32xf32> to vector<450x32xf32>
    %29 = arith.addf %27, %28 : vector<450x32xf32>
    %cst_18 = arith.constant 0.000000e+00 : f32
    %30 = vector.broadcast %cst_18 : f32 to vector<450x32xf32>
    %31 = arith.maximumf %29, %30 : vector<450x32xf32>
    %32 = arith.maximumf %24, %31 : vector<450x32xf32>
    %c4 = arith.constant 4 : index
    %c0_19 = arith.constant 0 : index
    %c0_20 = arith.constant 0 : index
    %33 = vector.load %arg0[%c4, %c0_19, %c0_20] : memref<9x450x16xf32, #tpu.memory_space<vmem>>, vector<1x450x16xf32>
    %34 = vector.shape_cast %33 : vector<1x450x16xf32> to vector<450x16xf32>
    %cst_21 = arith.constant dense<0.000000e+00> : vector<450x32xf32>
    %35 = tpu.matmul %34, %0, %cst_21 {dimension_numbers = #tpu.dot_dimension_numbers<[1], [0], [0], [1], [0, 0, 1, 1], [], []>} : vector<450x16xf32>, vector<16x32xf32>, vector<450x32xf32> -> vector<450x32xf32>
    %36 = vector.broadcast %1 : vector<1x32xf32> to vector<450x32xf32>
    %37 = arith.addf %35, %36 : vector<450x32xf32>
    %cst_22 = arith.constant 0.000000e+00 : f32
    %38 = vector.broadcast %cst_22 : f32 to vector<450x32xf32>
    %39 = arith.maximumf %37, %38 : vector<450x32xf32>
    %40 = arith.maximumf %32, %39 : vector<450x32xf32>
    %c5 = arith.constant 5 : index
    %c0_23 = arith.constant 0 : index
    %c0_24 = arith.constant 0 : index
    %41 = vector.load %arg0[%c5, %c0_23, %c0_24] : memref<9x450x16xf32, #tpu.memory_space<vmem>>, vector<1x450x16xf32>
    %42 = vector.shape_cast %41 : vector<1x450x16xf32> to vector<450x16xf32>
    %cst_25 = arith.constant dense<0.000000e+00> : vector<450x32xf32>
    %43 = tpu.matmul %42, %0, %cst_25 {dimension_numbers = #tpu.dot_dimension_numbers<[1], [0], [0], [1], [0, 0, 1, 1], [], []>} : vector<450x16xf32>, vector<16x32xf32>, vector<450x32xf32> -> vector<450x32xf32>
    %44 = vector.broadcast %1 : vector<1x32xf32> to vector<450x32xf32>
    %45 = arith.addf %43, %44 : vector<450x32xf32>
    %cst_26 = arith.constant 0.000000e+00 : f32
    %46 = vector.broadcast %cst_26 : f32 to vector<450x32xf32>
    %47 = arith.maximumf %45, %46 : vector<450x32xf32>
    %48 = arith.maximumf %40, %47 : vector<450x32xf32>
    %c6 = arith.constant 6 : index
    %c0_27 = arith.constant 0 : index
    %c0_28 = arith.constant 0 : index
    %49 = vector.load %arg0[%c6, %c0_27, %c0_28] : memref<9x450x16xf32, #tpu.memory_space<vmem>>, vector<1x450x16xf32>
    %50 = vector.shape_cast %49 : vector<1x450x16xf32> to vector<450x16xf32>
    %cst_29 = arith.constant dense<0.000000e+00> : vector<450x32xf32>
    %51 = tpu.matmul %50, %0, %cst_29 {dimension_numbers = #tpu.dot_dimension_numbers<[1], [0], [0], [1], [0, 0, 1, 1], [], []>} : vector<450x16xf32>, vector<16x32xf32>, vector<450x32xf32> -> vector<450x32xf32>
    %52 = vector.broadcast %1 : vector<1x32xf32> to vector<450x32xf32>
    %53 = arith.addf %51, %52 : vector<450x32xf32>
    %cst_30 = arith.constant 0.000000e+00 : f32
    %54 = vector.broadcast %cst_30 : f32 to vector<450x32xf32>
    %55 = arith.maximumf %53, %54 : vector<450x32xf32>
    %56 = arith.maximumf %48, %55 : vector<450x32xf32>
    %c7 = arith.constant 7 : index
    %c0_31 = arith.constant 0 : index
    %c0_32 = arith.constant 0 : index
    %57 = vector.load %arg0[%c7, %c0_31, %c0_32] : memref<9x450x16xf32, #tpu.memory_space<vmem>>, vector<1x450x16xf32>
    %58 = vector.shape_cast %57 : vector<1x450x16xf32> to vector<450x16xf32>
    %cst_33 = arith.constant dense<0.000000e+00> : vector<450x32xf32>
    %59 = tpu.matmul %58, %0, %cst_33 {dimension_numbers = #tpu.dot_dimension_numbers<[1], [0], [0], [1], [0, 0, 1, 1], [], []>} : vector<450x16xf32>, vector<16x32xf32>, vector<450x32xf32> -> vector<450x32xf32>
    %60 = vector.broadcast %1 : vector<1x32xf32> to vector<450x32xf32>
    %61 = arith.addf %59, %60 : vector<450x32xf32>
    %cst_34 = arith.constant 0.000000e+00 : f32
    %62 = vector.broadcast %cst_34 : f32 to vector<450x32xf32>
    %63 = arith.maximumf %61, %62 : vector<450x32xf32>
    %64 = arith.maximumf %56, %63 : vector<450x32xf32>
    %c8 = arith.constant 8 : index
    %c0_35 = arith.constant 0 : index
    %c0_36 = arith.constant 0 : index
    %65 = vector.load %arg0[%c8, %c0_35, %c0_36] : memref<9x450x16xf32, #tpu.memory_space<vmem>>, vector<1x450x16xf32>
    %66 = vector.shape_cast %65 : vector<1x450x16xf32> to vector<450x16xf32>
    %cst_37 = arith.constant dense<0.000000e+00> : vector<450x32xf32>
    %67 = tpu.matmul %66, %0, %cst_37 {dimension_numbers = #tpu.dot_dimension_numbers<[1], [0], [0], [1], [0, 0, 1, 1], [], []>} : vector<450x16xf32>, vector<16x32xf32>, vector<450x32xf32> -> vector<450x32xf32>
    %68 = vector.broadcast %1 : vector<1x32xf32> to vector<450x32xf32>
    %69 = arith.addf %67, %68 : vector<450x32xf32>
    %cst_38 = arith.constant 0.000000e+00 : f32
    %70 = vector.broadcast %cst_38 : f32 to vector<450x32xf32>
    %71 = arith.maximumf %69, %70 : vector<450x32xf32>
    %72 = arith.maximumf %64, %71 : vector<450x32xf32>
    %c0_39 = arith.constant 0 : index
    %c0_40 = arith.constant 0 : index
    %73 = vector.load %arg3[%c0_39, %c0_40] : memref<450x32xf32, #tpu.memory_space<vmem>>, vector<450x32xf32>
    tpu.vector_store %arg3[%c0_39, %c0_40], %72 {strides = array<i32>} : memref<450x32xf32, #tpu.memory_space<vmem>>, vector<450x32xf32>,
    return
  }
}

</mosaic_0001>

<bundles_post_ra>
// kernel: tpu_custom_call.1
= control target key start
LH: loop header
LB: loop body
LE: loop exit
PB: predicated region body
PF: predicated region fallthrough
CT: control target
= control target key end

     0   :  { %vm77_vm0 = vcmask 130048   ;;  %vm4742_vm1 = vcmask 261120   ;;  %vm4799_vm2 = vcmask 254976   ;;  %s9261_s1 = inlined_call_operand.vmem [shape: f32[16,32], index: 1, kind: input, shape index: {}]   ;;  %s9262_s0 = inlined_call_operand.vmem [shape: f32[9,450,16], index: 0, kind: input, shape index: {}]   ;;  %s9263_s2 = inlined_call_operand.vmem [shape: f32[1,32], index: 2, kind: input, shape index: {}]   ;;  %s9264_s3 = inlined_call_operand.vmem [shape: f32[450,32], index: 3, kind: output, shape index: {}]  }
   0x1   :  { %v15_v0 = vld [vmem:[%s9261_s1 + $0x8] sm:$0xff]  ;;  %v14_v1 = vld [vmem:[%s9261_s1] sm:$0xff]  ;;  %v32_v2 = vld [vmem:[%s9262_s0 + $0x78] sm:$0xff] }
   0x2   :  { %5774 = vmatpush.msra.mxu1 %v15_v0  ;;  %5775 = vmatpush.msra.mxu2 %v15_v0  ;;  %v47_v3 = vld [vmem:[%s9262_s0 + $0xf0] sm:$0xff]  ;;  %v17_v4 = vld [vmem:[%s9262_s0] sm:$0xff]  ;;  %v62_v5 = vld [vmem:[%s9262_s0 + $0x168] sm:$0xff] }
   0x3   :  { %263 = vmatpush.msra.mxu0 %v15_v0  ;;  %5776 = vmatpush.msra.mxu3 %v15_v0  ;;  %v33_v6 = vld [vmem:[%s9262_s0 + $0x80] sm:$0xff]  ;;  %v48_v7 = vld [vmem:[%s9262_s0 + $0xf8] sm:$0xff]  ;;  %v18_v8 = vld [vmem:[%s9262_s0 + $0x8] sm:$0xff] }
   0x4   :  { %5777 = vmatpush.msra.mxu1 %v14_v1  ;;  %5778 = vmatpush.msra.mxu2 %v14_v1  ;;  %v63_v9 = vld [vmem:[%s9262_s0 + $0x170] sm:$0xff]  ;;  %v34_v10 = vld [vmem:[%s9262_s0 + $0x88] sm:$0xff]  ;;  %v49_v11 = vld [vmem:[%s9262_s0 + $0x100] sm:$0xff] }
   0x5   :  { %4820 = vmatmul.msk.f32.vlgmr.msra.gmra.mxu1 %vm77_vm0, %v32_v2  ;;  %4835 = vmatmul.msk.f32.vlgmr.msra.gmra.mxu2 %vm77_vm0, %v47_v3  ;;  %v19_v12 = vld [vmem:[%s9262_s0 + $0x10] sm:$0xff]  ;;  %v64_v13 = vld [vmem:[%s9262_s0 + $0x178] sm:$0xff]  ;;  %v50_v15 = vld [vmem:[%s9262_s0 + $0x108] sm:$0xff] }
   0x6   :  { %1268 = vmatpush.msrb.mxu2 %v15_v0  ;;  %737 = vmatpush.msrb.mxu1 %v15_v0  ;;  %v35_v14 = vld [vmem:[%s9262_s0 + $0x90] sm:$0xff]  ;;  %v20_v16 = vld [vmem:[%s9262_s0 + $0x18] sm:$0xff]  ;;  %v65_v17 = vld [vmem:[%s9262_s0 + $0x180] sm:$0xff] }
   0x7   :  { %264 = vmatpush.msra.mxu0 %v14_v1  ;;  %5779 = vmatpush.msra.mxu3 %v14_v1  ;;  %v36_v18 = vld [vmem:[%s9262_s0 + $0x98] sm:$0xff]  ;;  %v51_v19 = vld [vmem:[%s9262_s0 + $0x110] sm:$0xff]  ;;  %v21_v20 = vld [vmem:[%s9262_s0 + $0x20] sm:$0xff] }
   0x8   :  { %4805 = vmatmul.msk.f32.vlgmr.msra.gmra.mxu0 %vm77_vm0, %v17_v4  ;;  %4850 = vmatmul.msk.f32.vlgmr.msra.gmra.mxu3 %vm77_vm0, %v62_v5  ;;  %v66_v21 = vld [vmem:[%s9262_s0 + $0x188] sm:$0xff]  ;;  %v37_v22 = vld [vmem:[%s9262_s0 + $0xa0] sm:$0xff]  ;;  %v52_v23 = vld [vmem:[%s9262_s0 + $0x118] sm:$0xff] }
   0x9   :  { %2330 = vmatpush.msrb.mxu0 %v15_v0  ;;  %1799 = vmatpush.msrb.mxu3 %v15_v0  ;;  %v22_v24 = vld [vmem:[%s9262_s0 + $0x28] sm:$0xff]  ;;  %v67_v25 = vld [vmem:[%s9262_s0 + $0x190] sm:$0xff]  ;;  %v53_v27 = vld [vmem:[%s9262_s0 + $0x120] sm:$0xff] }
   0xa   :  { %1269 = vmatpush.msrb.mxu2 %v14_v1  ;;  %738 = vmatpush.msrb.mxu1 %v14_v1  ;;  %v38_v26 = vld [vmem:[%s9262_s0 + $0xa8] sm:$0xff]  ;;  %v23_v28 = vld [vmem:[%s9262_s0 + $0x30] sm:$0xff]  ;;  %v68_v29 = vld [vmem:[%s9262_s0 + $0x198] sm:$0xff] }
   0xb   :  { %2331 = vmatpush.msrb.mxu0 %v14_v1  ;;  %1800 = vmatpush.msrb.mxu3 %v14_v1  ;;  %v39_v30 = vld [vmem:[%s9262_s0 + $0xb0] sm:$0xff]  ;;  %v54_v31 = vld [vmem:[%s9262_s0 + $0x128] sm:$0xff]  ;;  %v24_v32 = vld [vmem:[%s9262_s0 + $0x38] sm:$0xff] }
   0xc   :  { %3392 = vmatpush.msra.mxu2 %v15_v0  ;;  %2861 = vmatpush.msra.mxu1 %v15_v0  ;;  %v69_v33 = vld [vmem:[%s9262_s0 + $0x1a0] sm:$0xff]  ;;  %v40_v34 = vld [vmem:[%s9262_s0 + $0xb8] sm:$0xff]  ;;  %v55_v35 = vld [vmem:[%s9262_s0 + $0x130] sm:$0xff] }
   0xd   :  { %3923 = vmatpush.msra.mxu3 %v15_v0  ;;  %4821 = vmatmul.msk.f32.gmra.mxu1 %vm77_vm0, %v33_v6  ;;  %v25_v36 = vld [vmem:[%s9262_s0 + $0x40] sm:$0xff]  ;;  %v70_v37 = vld [vmem:[%s9262_s0 + $0x1a8] sm:$0xff]  ;;  %v56_v39 = vld [vmem:[%s9262_s0 + $0x138] sm:$0xff] }
   0xe   :  { %4836 = vmatmul.msk.f32.gmra.mxu2 %vm77_vm0, %v48_v7  ;;  %4454 = vmatpush.msra.mxu0 %v15_v0  ;;  %v41_v38 = vld [vmem:[%s9262_s0 + $0xc0] sm:$0xff]  ;;  %v26_v40 = vld [vmem:[%s9262_s0 + $0x48] sm:$0xff]  ;;  %v71_v41 = vld [vmem:[%s9262_s0 + $0x1b0] sm:$0xff] }
   0xf   :  { %3393 = vmatpush.msra.mxu2 %v14_v1  ;;  %3924 = vmatpush.msra.mxu3 %v14_v1  ;;  %v42_v42 = vld [vmem:[%s9262_s0 + $0xc8] sm:$0xff]  ;;  %v57_v43 = vld [vmem:[%s9262_s0 + $0x140] sm:$0xff]  ;;  %v27_v44 = vld [vmem:[%s9262_s0 + $0x50] sm:$0xff] }
  0x10   :  { %4806 = vmatmul.msk.f32.gmra.mxu0 %vm77_vm0, %v18_v8  ;;  %4851 = vmatmul.msk.f32.gmra.mxu3 %vm77_vm0, %v63_v9  ;;  %v72_v45 = vld [vmem:[%s9262_s0 + $0x1b8] sm:$0xff]  ;;  %v43_v46 = vld [vmem:[%s9262_s0 + $0xd0] sm:$0xff]  ;;  %v58_v47 = vld [vmem:[%s9262_s0 + $0x148] sm:$0xff] }
  0x11   :  { %2862 = vmatpush.msra.mxu1 %v14_v1  ;;  %4455 = vmatpush.msra.mxu0 %v14_v1  ;;  %v28_v48 = vld [vmem:[%s9262_s0 + $0x58] sm:$0xff]  ;;  %v73_v49 = vld [vmem:[%s9262_s0 + $0x1c0] sm:$0x3]  ;;  %v59_v51 = vld [vmem:[%s9262_s0 + $0x150] sm:$0xff] }
  0x12   :  { %v44_v50 = vld [vmem:[%s9262_s0 + $0xd8] sm:$0xff]  ;;  %v29_v52 = vld [vmem:[%s9262_s0 + $0x60] sm:$0xff]  ;;  %v30_v56 = vld [vmem:[%s9262_s0 + $0x68] sm:$0xff] }
  0x13   :  { %v5090_v53 = vld [vmem:[%s9262_s0 + $0x558] sm:$0xff]  ;;  %v45_v54 = vld [vmem:[%s9262_s0 + $0xe0] sm:$0xff]  ;;  %v46_v58 = vld [vmem:[%s9262_s0 + $0xe8] sm:$0xff] }
  0x14   :  { %v60_v55 = vld [vmem:[%s9262_s0 + $0x158] sm:$0xff]  ;;  %v5091_v57 = vld [vmem:[%s9262_s0 + $0x560] sm:$0xff]  ;;  %v31_v60 = vld [vmem:[%s9262_s0 + $0x70] sm:$0xff] }
  0x15   :  { %4822 = vmatmul.msk.f32.gmra.mxu1 %vm77_vm0, %v34_v10  ;;  %v61_v59 = vld [vmem:[%s9262_s0 + $0x160] sm:$0xff]  ;;  %v5092_v61 = vld [vmem:[%s9262_s0 + $0x568] sm:$0xff]  ;;  %v4976_v63 = vld [vmem:[%s9262_s0 + $0x390] sm:$0xff] }
  0x16   :  { %4837 = vmatmul.msk.f32.gmra.mxu2 %vm77_vm0, %v49_v11  ;;  %v4862_v62 = vld [vmem:[%s9262_s0 + $0x1c8] sm:$0xff]  ;;  %v5204_v0 = vld [vmem:[%s9262_s0 + $0x720] sm:$0xff]  ;;  %v5093_v1 = vld [vmem:[%s9262_s0 + $0x570] sm:$0xff] }
  0x17   :  { %v4863_v3 = vld [vmem:[%s9262_s0 + $0x1d0] sm:$0xff]  ;;  %v4977_v4 = vld [vmem:[%s9262_s0 + $0x398] sm:$0xff]  ;;  %v5205_v6 = vld [vmem:[%s9262_s0 + $0x728] sm:$0xff] }
  0x18   :  { %4807 = vmatmul.msk.f32.gmra.mxu0 %vm77_vm0, %v19_v12  ;;  %4852 = vmatmul.msk.f32.gmra.mxu3 %vm77_vm0, %v64_v13  ;;  %v5094_v7 = vld [vmem:[%s9262_s0 + $0x578] sm:$0xff]  ;;  %v4978_v11 = vld [vmem:[%s9262_s0 + $0x3a0] sm:$0xff] }
  0x19   :  { %v4864_v10 = vld [vmem:[%s9262_s0 + $0x1d8] sm:$0xff] }
  0x1d   :  { %4823 = vmatmul.msk.f32.gmra.mxu1 %vm77_vm0, %v35_v14  ;;  %v5206_v14 = vld [vmem:[%s9262_s0 + $0x730] sm:$0xff] }
  0x1e   :  { %4838 = vmatmul.msk.f32.gmra.mxu2 %vm77_vm0, %v50_v15  ;;  %v5095_v15 = vld [vmem:[%s9262_s0 + $0x580] sm:$0xff] }
  0x20   :  { %4808 = vmatmul.msk.f32.gmra.mxu0 %vm77_vm0, %v20_v16  ;;  %4853 = vmatmul.msk.f32.gmra.mxu3 %vm77_vm0, %v65_v17 }
  0x25   :  { %4824 = vmatmul.msk.f32.gmra.mxu1 %vm77_vm0, %v36_v18  ;;  %v4865_v18 = vld [vmem:[%s9262_s0 + $0x1e0] sm:$0xff] }
  0x26   :  { %4839 = vmatmul.msk.f32.gmra.mxu2 %vm77_vm0, %v51_v19  ;;  %v4979_v19 = vld [vmem:[%s9262_s0 + $0x3a8] sm:$0xff] }
  0x28   :  { %4809 = vmatmul.msk.f32.gmra.mxu0 %vm77_vm0, %v21_v20  ;;  %4854 = vmatmul.msk.f32.gmra.mxu3 %vm77_vm0, %v66_v21 }
  0x2d   :  { %4825 = vmatmul.msk.f32.gmra.mxu1 %vm77_vm0, %v37_v22  ;;  %v5207_v22 = vld [vmem:[%s9262_s0 + $0x738] sm:$0xff] }
  0x2e   :  { %4840 = vmatmul.msk.f32.gmra.mxu2 %vm77_vm0, %v52_v23  ;;  %v5096_v23 = vld [vmem:[%s9262_s0 + $0x588] sm:$0xff] }
  0x30   :  { %4810 = vmatmul.msk.f32.gmra.mxu0 %vm77_vm0, %v22_v24  ;;  %4855 = vmatmul.msk.f32.gmra.mxu3 %vm77_vm0, %v67_v25 }
  0x35   :  { %4826 = vmatmul.msk.f32.gmra.mxu1 %vm77_vm0, %v38_v26  ;;  %v4866_v26 = vld [vmem:[%s9262_s0 + $0x1e8] sm:$0xff] }
  0x36   :  { %4841 = vmatmul.msk.f32.gmra.mxu2 %vm77_vm0, %v53_v27  ;;  %v4980_v27 = vld [vmem:[%s9262_s0 + $0x3b0] sm:$0xff] }
  0x38   :  { %4811 = vmatmul.msk.f32.gmra.mxu0 %vm77_vm0, %v23_v28  ;;  %4856 = vmatmul.msk.f32.gmra.mxu3 %vm77_vm0, %v68_v29 }
  0x3d   :  { %4827 = vmatmul.msk.f32.gmra.mxu1 %vm77_vm0, %v39_v30  ;;  %v5208_v30 = vld [vmem:[%s9262_s0 + $0x740] sm:$0xff] }
  0x3e   :  { %4842 = vmatmul.msk.f32.gmra.mxu2 %vm77_vm0, %v54_v31  ;;  %v5097_v31 = vld [vmem:[%s9262_s0 + $0x590] sm:$0xff] }
  0x40   :  { %4812 = vmatmul.msk.f32.gmra.mxu0 %vm77_vm0, %v24_v32  ;;  %4857 = vmatmul.msk.f32.gmra.mxu3 %vm77_vm0, %v69_v33 }
  0x45   :  { %4828 = vmatmul.msk.f32.gmra.mxu1 %vm77_vm0, %v40_v34  ;;  %v4867_v34 = vld [vmem:[%s9262_s0 + $0x1f0] sm:$0xff] }
  0x46   :  { %4843 = vmatmul.msk.f32.gmra.mxu2 %vm77_vm0, %v55_v35  ;;  %v4981_v35 = vld [vmem:[%s9262_s0 + $0x3b8] sm:$0xff] }
  0x48   :  { %4813 = vmatmul.msk.f32.gmra.mxu0 %vm77_vm0, %v25_v36  ;;  %4858 = vmatmul.msk.f32.gmra.mxu3 %vm77_vm0, %v70_v37 }
  0x4d   :  { %4829 = vmatmul.msk.f32.gmra.mxu1 %vm77_vm0, %v41_v38  ;;  %v5209_v38 = vld [vmem:[%s9262_s0 + $0x748] sm:$0xff] }
  0x4e   :  { %4844 = vmatmul.msk.f32.gmra.mxu2 %vm77_vm0, %v56_v39  ;;  %v5098_v39 = vld [vmem:[%s9262_s0 + $0x598] sm:$0xff] }
  0x50   :  { %4814 = vmatmul.msk.f32.gmra.mxu0 %vm77_vm0, %v26_v40  ;;  %4859 = vmatmul.msk.f32.gmra.mxu3 %vm77_vm0, %v71_v41 }
  0x55   :  { %4830 = vmatmul.msk.f32.gmra.mxu1 %vm77_vm0, %v42_v42  ;;  %v4868_v42 = vld [vmem:[%s9262_s0 + $0x1f8] sm:$0xff] }
  0x56   :  { %4845 = vmatmul.msk.f32.gmra.mxu2 %vm77_vm0, %v57_v43  ;;  %v4982_v43 = vld [vmem:[%s9262_s0 + $0x3c0] sm:$0xff] }
  0x58   :  { %4815 = vmatmul.msk.f32.gmra.mxu0 %vm77_vm0, %v27_v44  ;;  %4860 = vmatmul.msk.f32.gmra.mxu3 %vm77_vm0, %v72_v45 }
  0x5d   :  { %4831 = vmatmul.msk.f32.gmra.mxu1 %vm77_vm0, %v43_v46  ;;  %v5210_v46 = vld [vmem:[%s9262_s0 + $0x750] sm:$0xff] }
  0x5e   :  { %4846 = vmatmul.msk.f32.gmra.mxu2 %vm77_vm0, %v58_v47  ;;  %v5099_v47 = vld [vmem:[%s9262_s0 + $0x5a0] sm:$0xff] }
  0x60   :  { %4816 = vmatmul.msk.f32.gmra.mxu0 %vm77_vm0, %v28_v48  ;;  %4861 = vmatmul.msk.f32.gmra.mxu3 %vm77_vm0, %v73_v49 }
  0x65   :  { %4832 = vmatmul.msk.f32.gmra.mxu1 %vm77_vm0, %v44_v50  ;;  %v4869_v50 = vld [vmem:[%s9262_s0 + $0x200] sm:$0xff] }
  0x66   :  { %4847 = vmatmul.msk.f32.gmra.mxu2 %vm77_vm0, %v59_v51  ;;  %v4983_v51 = vld [vmem:[%s9262_s0 + $0x3c8] sm:$0xff] }
  0x68   :  { %4817 = vmatmul.msk.f32.gmra.mxu0 %vm77_vm0, %v29_v52  ;;  %5147 = vmatmul.msk.f32.vlgmr.msrb.gmra.mxu3 %vm77_vm0, %v5090_v53 }
  0x6d   :  { %4833 = vmatmul.msk.f32.gmra.mxu1 %vm77_vm0, %v45_v54  ;;  %v5211_v54 = vld [vmem:[%s9262_s0 + $0x758] sm:$0xff] }
  0x6e   :  { %4848 = vmatmul.msk.f32.gmra.mxu2 %vm77_vm0, %v60_v55  ;;  %v5100_v55 = vld [vmem:[%s9262_s0 + $0x5a8] sm:$0xff] }
  0x70   :  { %4818 = vmatmul.msk.f32.gmra.mxu0 %vm77_vm0, %v30_v56  ;;  %5148 = vmatmul.msk.f32.gmra.mxu3 %vm77_vm0, %v5091_v57 }
  0x75   :  { %4834 = vmatmul.msk.f32.gmra.mxu1 %vm77_vm0, %v46_v58  ;;  %v4870_v58 = vld [vmem:[%s9262_s0 + $0x208] sm:$0xff] }
  0x76   :  { %4849 = vmatmul.msk.f32.gmra.mxu2 %vm77_vm0, %v61_v59  ;;  %v4984_v59 = vld [vmem:[%s9262_s0 + $0x3d0] sm:$0xff] }
  0x78   :  { %4819 = vmatmul.msk.f32.gmra.mxu0 %vm77_vm0, %v31_v60  ;;  %5149 = vmatmul.msk.f32.gmra.mxu3 %vm77_vm0, %v5092_v61 }
  0x7d   :  { %4919 = vmatmul.msk.f32.vlgmr.msrb.gmra.mxu1 %vm77_vm0, %v4862_v62  ;;  %v5212_v62 = vld [vmem:[%s9262_s0 + $0x760] sm:$0xff] }
  0x7e   :  { %5033 = vmatmul.msk.f32.vlgmr.msrb.gmra.mxu2 %vm77_vm0, %v4976_v63  ;;  %v5101_v63 = vld [vmem:[%s9262_s0 + $0x5b0] sm:$0xff] }
  0x80   :  { %5261 = vmatmul.msk.f32.vlgmr.msrb.gmra.mxu0 %vm77_vm0, %v5204_v0  ;;  %5150 = vmatmul.msk.f32.gmra.mxu3 %vm77_vm0, %v5093_v1 }
  0x82   :  { %v6068_v2 = vpop.f32.mrf.mxu1 }
  0x85   :  { %4920 = vmatmul.msk.f32.gmra.mxu1 %vm77_vm0, %v4863_v3  ;;  %v6078_v5 = vpop.f32.mrf.mxu0  ;;  %v4871_v3 = vld [vmem:[%s9262_s0 + $0x210] sm:$0xff] }
  0x86   :  { %5034 = vmatmul.msk.f32.gmra.mxu2 %vm77_vm0, %v4977_v4  ;;  %v4985_v4 = vld [vmem:[%s9262_s0 + $0x3d8] sm:$0xff] }
  0x88   :  { %v6086_v8 = vpop.f32.mrf.mxu2  ;;  %5262 = vmatmul.msk.f32.gmra.mxu0 %vm77_vm0, %v5205_v6  ;;  %5151 = vmatmul.msk.f32.gmra.mxu3 %vm77_vm0, %v5094_v7 }
  0x8a   :  { %v6090_v9 = vpop.f32.mrf.mxu1 }
  0x8b   :  { %v6098_v12 = vpop.f32.mrf.mxu3 }
  0x8d   :  { %4921 = vmatmul.msk.f32.gmra.mxu1 %vm77_vm0, %v4864_v10  ;;  %v6102_v13 = vpop.f32.mrf.mxu0  ;;  %v5213_v10 = vld [vmem:[%s9262_s0 + $0x768] sm:$0xff] }
  0x8e   :  { %5035 = vmatmul.msk.f32.gmra.mxu2 %vm77_vm0, %v4978_v11  ;;  %v5102_v11 = vld [vmem:[%s9262_s0 + $0x5b8] sm:$0xff] }
  0x90   :  { %5263 = vmatmul.msk.f32.gmra.mxu0 %vm77_vm0, %v5206_v14  ;;  %5152 = vmatmul.msk.f32.gmra.mxu3 %vm77_vm0, %v5095_v15 }
  0x91   :  { %v6110_v16 = vpop.f32.mrf.mxu2 }
  0x92   :  { %v6114_v17 = vpop.f32.mrf.mxu1 }
  0x93   :  { %v6122_v20 = vpop.f32.mrf.mxu3 }
  0x94   :  { %9265 = vst [vmem:[#allocation2_spill] sm:$0xff] %v6122_v20  ;;  %v5221_v20 = vld [vmem:[%s9262_s0 + $0x7a8] sm:$0xff] }
  0x95   :  { %4922 = vmatmul.msk.f32.gmra.mxu1 %vm77_vm0, %v4865_v18  ;;  %v6126_v21 = vpop.f32.mrf.mxu0  ;;  %v4872_v18 = vld [vmem:[%s9262_s0 + $0x218] sm:$0xff] }
  0x96   :  { %5036 = vmatmul.msk.f32.gmra.mxu2 %vm77_vm0, %v4979_v19  ;;  %v4986_v19 = vld [vmem:[%s9262_s0 + $0x3e0] sm:$0xff] }
  0x98   :  { %5264 = vmatmul.msk.f32.gmra.mxu0 %vm77_vm0, %v5207_v22  ;;  %5153 = vmatmul.msk.f32.gmra.mxu3 %vm77_vm0, %v5096_v23 }
  0x99   :  { %v6134_v24 = vpop.f32.mrf.mxu2 }
  0x9a   :  { %v6138_v25 = vpop.f32.mrf.mxu1 }
  0x9b   :  { %v6146_v28 = vpop.f32.mrf.mxu3 }
  0x9c   :  { %9266 = vst [vmem:[#allocation3_spill] sm:$0xff] %v6146_v28 }
  0x9d   :  { %4923 = vmatmul.msk.f32.gmra.mxu1 %vm77_vm0, %v4866_v26  ;;  %v6150_v29 = vpop.f32.mrf.mxu0  ;;  %v5214_v26 = vld [vmem:[%s9262_s0 + $0x770] sm:$0xff] }
  0x9e   :  { %5037 = vmatmul.msk.f32.gmra.mxu2 %vm77_vm0, %v4980_v27  ;;  %v5103_v27 = vld [vmem:[%s9262_s0 + $0x5c0] sm:$0xff] }
  0xa0   :  { %5265 = vmatmul.msk.f32.gmra.mxu0 %vm77_vm0, %v5208_v30  ;;  %5154 = vmatmul.msk.f32.gmra.mxu3 %vm77_vm0, %v5097_v31 }
  0xa1   :  { %v6158_v32 = vpop.f32.mrf.mxu2 }
  0xa2   :  { %v6162_v33 = vpop.f32.mrf.mxu1 }
  0xa3   :  { %v6170_v36 = vpop.f32.mrf.mxu3 }
  0xa4   :  { %9267 = vst [vmem:[#allocation4_spill] sm:$0xff] %v6170_v36 }
  0xa5   :  { %4924 = vmatmul.msk.f32.gmra.mxu1 %vm77_vm0, %v4867_v34  ;;  %v6174_v37 = vpop.f32.mrf.mxu0  ;;  %v4873_v34 = vld [vmem:[%s9262_s0 + $0x220] sm:$0xff] }
  0xa6   :  { %5038 = vmatmul.msk.f32.gmra.mxu2 %vm77_vm0, %v4981_v35  ;;  %v4987_v35 = vld [vmem:[%s9262_s0 + $0x3e8] sm:$0xff] }
  0xa8   :  { %5266 = vmatmul.msk.f32.gmra.mxu0 %vm77_vm0, %v5209_v38  ;;  %5155 = vmatmul.msk.f32.gmra.mxu3 %vm77_vm0, %v5098_v39 }
  0xa9   :  { %v6182_v40 = vpop.f32.mrf.mxu2 }
  0xaa   :  { %v6186_v41 = vpop.f32.mrf.mxu1 }
  0xab   :  { %v6194_v44 = vpop.f32.mrf.mxu3 }
  0xac   :  { %9268 = vst [vmem:[#allocation5_spill] sm:$0xff] %v6194_v44  ;;  %v4993_v44 = vld [vmem:[%s9262_s0 + $0x418] sm:$0xff] }
  0xad   :  { %4925 = vmatmul.msk.f32.gmra.mxu1 %vm77_vm0, %v4868_v42  ;;  %v6198_v45 = vpop.f32.mrf.mxu0  ;;  %v5215_v42 = vld [vmem:[%s9262_s0 + $0x778] sm:$0xff] }
  0xae   :  { %5039 = vmatmul.msk.f32.gmra.mxu2 %vm77_vm0, %v4982_v43  ;;  %v5104_v43 = vld [vmem:[%s9262_s0 + $0x5c8] sm:$0xff] }
  0xb0   :  { %5267 = vmatmul.msk.f32.gmra.mxu0 %vm77_vm0, %v5210_v46  ;;  %5156 = vmatmul.msk.f32.gmra.mxu3 %vm77_vm0, %v5099_v47 }
  0xb1   :  { %v6206_v48 = vpop.f32.mrf.mxu2 }
  0xb2   :  { %v6210_v49 = vpop.f32.mrf.mxu1 }
  0xb3   :  { %v6218_v52 = vpop.f32.mrf.mxu3 }
  0xb4   :  { %9269 = vst [vmem:[#allocation6_spill] sm:$0xff] %v6218_v52 }
  0xb5   :  { %4926 = vmatmul.msk.f32.gmra.mxu1 %vm77_vm0, %v4869_v50  ;;  %v6222_v53 = vpop.f32.mrf.mxu0  ;;  %v4874_v50 = vld [vmem:[%s9262_s0 + $0x228] sm:$0xff] }
  0xb6   :  { %5040 = vmatmul.msk.f32.gmra.mxu2 %vm77_vm0, %v4983_v51  ;;  %v4988_v51 = vld [vmem:[%s9262_s0 + $0x3f0] sm:$0xff] }
  0xb8   :  { %5268 = vmatmul.msk.f32.gmra.mxu0 %vm77_vm0, %v5211_v54  ;;  %5157 = vmatmul.msk.f32.gmra.mxu3 %vm77_vm0, %v5100_v55 }
  0xb9   :  { %v6230_v56 = vpop.f32.mrf.mxu2 }
  0xba   :  { %v6234_v57 = vpop.f32.mrf.mxu1 }
  0xbb   :  { %v6242_v60 = vpop.f32.mrf.mxu3 }
  0xbc   :  { %9270 = vst [vmem:[#allocation7_spill] sm:$0xff] %v6242_v60 }
  0xbd   :  { %4927 = vmatmul.msk.f32.gmra.mxu1 %vm77_vm0, %v4870_v58  ;;  %v6246_v61 = vpop.f32.mrf.mxu0  ;;  %v5216_v58 = vld [vmem:[%s9262_s0 + $0x780] sm:$0xff] }
  0xbe   :  { %5041 = vmatmul.msk.f32.gmra.mxu2 %vm77_vm0, %v4984_v59  ;;  %v5105_v59 = vld [vmem:[%s9262_s0 + $0x5d0] sm:$0xff] }
  0xc0   :  { %5269 = vmatmul.msk.f32.gmra.mxu0 %vm77_vm0, %v5212_v62  ;;  %5158 = vmatmul.msk.f32.gmra.mxu3 %vm77_vm0, %v5101_v63 }
  0xc1   :  { %v6254_v0 = vpop.f32.mrf.mxu2 }
  0xc2   :  { %v6258_v1 = vpop.f32.mrf.mxu1 }
  0xc3   :  { %v6266_v6 = vpop.f32.mrf.mxu3 }
  0xc4   :  { %9271 = vst [vmem:[#allocation8_spill] sm:$0xff] %v6266_v6  ;;  %v5109_v6 = vld [vmem:[%s9262_s0 + $0x5f0] sm:$0xff] }
  0xc5   :  { %4928 = vmatmul.msk.f32.gmra.mxu1 %vm77_vm0, %v4871_v3  ;;  %v6270_v7 = vpop.f32.mrf.mxu0  ;;  %v4875_v3 = vld [vmem:[%s9262_s0 + $0x230] sm:$0xff] }
  0xc6   :  { %5042 = vmatmul.msk.f32.gmra.mxu2 %vm77_vm0, %v4985_v4  ;;  %v4989_v4 = vld [vmem:[%s9262_s0 + $0x3f8] sm:$0xff] }
  0xc8   :  { %5270 = vmatmul.msk.f32.gmra.mxu0 %vm77_vm0, %v5213_v10  ;;  %5159 = vmatmul.msk.f32.gmra.mxu3 %vm77_vm0, %v5102_v11 }
  0xc9   :  { %v6278_v14 = vpop.f32.mrf.mxu2 }
  0xca   :  { %v6282_v15 = vpop.f32.mrf.mxu1 }
  0xcb   :  { %v6290_v22 = vpop.f32.mrf.mxu3 }
  0xcc   :  { %9272 = vst [vmem:[#allocation9_spill] sm:$0xff] %v6290_v22  ;;  %v5220_v22 = vld [vmem:[%s9262_s0 + $0x7a0] sm:$0xff] }
  0xcd   :  { %4929 = vmatmul.msk.f32.gmra.mxu1 %vm77_vm0, %v4872_v18  ;;  %v6294_v23 = vpop.f32.mrf.mxu0  ;;  %v5217_v18 = vld [vmem:[%s9262_s0 + $0x788] sm:$0xff] }
  0xce   :  { %5043 = vmatmul.msk.f32.gmra.mxu2 %vm77_vm0, %v4986_v19  ;;  %v5106_v19 = vld [vmem:[%s9262_s0 + $0x5d8] sm:$0xff] }
  0xd0   :  { %5271 = vmatmul.msk.f32.gmra.mxu0 %vm77_vm0, %v5214_v26  ;;  %5160 = vmatmul.msk.f32.gmra.mxu3 %vm77_vm0, %v5103_v27 }
  0xd1   :  { %v6302_v30 = vpop.f32.mrf.mxu2 }
  0xd2   :  { %v6306_v31 = vpop.f32.mrf.mxu1 }
  0xd3   :  { %v6314_v38 = vpop.f32.mrf.mxu3 }
  0xd4   :  { %9273 = vst [vmem:[#allocation10_spill] sm:$0xff] %v6314_v38 }
  0xd5   :  { %4930 = vmatmul.msk.f32.gmra.mxu1 %vm77_vm0, %v4873_v34  ;;  %v6318_v39 = vpop.f32.mrf.mxu0  ;;  %v4876_v34 = vld [vmem:[%s9262_s0 + $0x238] sm:$0xff] }
  0xd6   :  { %5044 = vmatmul.msk.f32.gmra.mxu2 %vm77_vm0, %v4987_v35  ;;  %v4990_v35 = vld [vmem:[%s9262_s0 + $0x400] sm:$0xff] }
  0xd8   :  { %5272 = vmatmul.msk.f32.gmra.mxu0 %vm77_vm0, %v5215_v42  ;;  %5161 = vmatmul.msk.f32.gmra.mxu3 %vm77_vm0, %v5104_v43 }
  0xd9   :  { %v6326_v46 = vpop.f32.mrf.mxu2 }
  0xda   :  { %v6330_v47 = vpop.f32.mrf.mxu1 }
  0xdb   :  { %v6338_v54 = vpop.f32.mrf.mxu3 }
  0xdc   :  { %9274 = vst [vmem:[#allocation11_spill] sm:$0xff] %v6338_v54 }
  0xdd   :  { %4931 = vmatmul.msk.f32.gmra.mxu1 %vm77_vm0, %v4874_v50  ;;  %v6342_v55 = vpop.f32.mrf.mxu0  ;;  %v5218_v50 = vld [vmem:[%s9262_s0 + $0x790] sm:$0xff] }
  0xde   :  { %5045 = vmatmul.msk.f32.gmra.mxu2 %vm77_vm0, %v4988_v51  ;;  %v5107_v51 = vld [vmem:[%s9262_s0 + $0x5e0] sm:$0xff] }
  0xe0   :  { %5273 = vmatmul.msk.f32.gmra.mxu0 %vm77_vm0, %v5216_v58  ;;  %5162 = vmatmul.msk.f32.gmra.mxu3 %vm77_vm0, %v5105_v59 }
  0xe1   :  { %v6350_v62 = vpop.f32.mrf.mxu2 }
  0xe2   :  { %v6354_v63 = vpop.f32.mrf.mxu1 }
  0xe3   :  { %v6362_v10 = vpop.f32.mrf.mxu3 }
  0xe4   :  { %9275 = vst [vmem:[#allocation12_spill] sm:$0xff] %v6362_v10  ;;  %v4992_v10 = vld [vmem:[%s9262_s0 + $0x410] sm:$0xff] }
  0xe5   :  { %4932 = vmatmul.msk.f32.gmra.mxu1 %vm77_vm0, %v4875_v3  ;;  %v6366_v11 = vpop.f32.mrf.mxu0  ;;  %v4877_v3 = vld [vmem:[%s9262_s0 + $0x240] sm:$0xff] }
  0xe6   :  { %5046 = vmatmul.msk.f32.gmra.mxu2 %vm77_vm0, %v4989_v4  ;;  %v4991_v4 = vld [vmem:[%s9262_s0 + $0x408] sm:$0xff] }
  0xe8   :  { %5274 = vmatmul.msk.f32.gmra.mxu0 %vm77_vm0, %v5217_v18  ;;  %5163 = vmatmul.msk.f32.gmra.mxu3 %vm77_vm0, %v5106_v19 }
  0xe9   :  { %v6374_v26 = vpop.f32.mrf.mxu2 }
  0xea   :  { %v6378_v27 = vpop.f32.mrf.mxu1 }
  0xeb   :  { %v1802_v42 = vpop.f32.mrf.mxu3 }
  0xed   :  { %4933 = vmatmul.msk.f32.gmra.mxu1 %vm77_vm0, %v4876_v34  ;;  %v6388_v43 = vpop.f32.mrf.mxu0  ;;  %v5219_v34 = vld [vmem:[%s9262_s0 + $0x798] sm:$0xff] }
  0xee   :  { %5047 = vmatmul.msk.f32.gmra.mxu2 %vm77_vm0, %v4990_v35  ;;  %v5108_v35 = vld [vmem:[%s9262_s0 + $0x5e8] sm:$0xff] }
  0xf0   :  { %5275 = vmatmul.msk.f32.gmra.mxu0 %vm77_vm0, %v5218_v50  ;;  %5164 = vmatmul.msk.f32.gmra.mxu3 %vm77_vm0, %v5107_v51  ;;  %v6425_v51 = vld [vmem:[%s9263_s2] ss:$0 sm:$0xff] }
  0xf1   :  { %v6396_v58 = vpop.f32.mrf.mxu2 }
  0xf2   :  { %v6400_v59 = vpop.f32.mrf.mxu1 }
  0xf3   :  { %v1805_v18 = vpop.f32.mrf.mxu3 }
  0xf5   :  { %4934 = vmatmul.msk.f32.gmra.mxu1 %vm77_vm0, %v4877_v3  ;;  %v6410_v19 = vpop.f32.mrf.mxu0 }
  0xf6   :  { %5048 = vmatmul.msk.f32.gmra.mxu2 %vm77_vm0, %v4991_v4  ;;  %v4878_v4 = vld [vmem:[%s9262_s0 + $0x248] sm:$0xff] }
  0xf8   :  { %5276 = vmatmul.msk.f32.gmra.mxu0 %vm77_vm0, %v5219_v34  ;;  %5165 = vmatmul.msk.f32.gmra.mxu3 %vm77_vm0, %v5108_v35  ;;  %v267_v34 = vadd.f32 %v6425_v51, %v6078_v5 }
  0xf9   :  { %v6418_v50 = vpop.f32.mrf.mxu2 }
  0xfa   :  { %v740_v3 = vpop.f32.mrf.mxu1  ;;  %v437_v5 = vmax.f32 %v267_v34, 0.0 }
  0xfb   :  { %v741_v54 = vadd.f32 %v6425_v51, %v740_v3  ;;  %v1808_v38 = vpop.f32.mrf.mxu3  ;;  %v1803_v3 = vadd.f32 %v6425_v51, %v1802_v42 }
  0xfd   :  { %4935 = vmatmul.msk.f32.gmra.mxu1 %vm77_vm0, %v4878_v4  ;;  %v6438_v35 = vpop.f32.mrf.mxu0  ;;  %v911_v60 = vmax.f32 %v741_v54, 0.0  ;;  %v1973_v28 = vmax.f32 %v1803_v3, 0.0 }
  0xfe   :  { %5049 = vmatmul.msk.f32.gmra.mxu2 %vm77_vm0, %v4992_v10  ;;  %9276 = vst [vmem:[#allocation13_spill] sm:$0xff] %v6438_v35  ;;  %v4879_v35 = vld [vmem:[%s9262_s0 + $0x250] sm:$0xff] }
  0xff   :  { %v968_v54 = vmax.f32 %v437_v5, %v911_v60  ;;  %v5110_v60 = vld [vmem:[%s9262_s0 + $0x5f8] sm:$0xff] }
 0x100   :  { %5277 = vmatmul.msk.f32.gmra.mxu0 %vm77_vm0, %v5220_v22  ;;  %5166 = vmatmul.msk.f32.gmra.mxu3 %vm77_vm0, %v5109_v6  ;;  %v270_v6 = vadd.f32 %v6425_v51, %v6102_v13  ;;  %v1806_v13 = vadd.f32 %v6425_v51, %v1805_v18 }
 0x101   :  { %v1271_v52 = vpop.f32.mrf.mxu2 }
 0x102   :  { %v1272_v10 = vadd.f32 %v6425_v51, %v1271_v52  ;;  %v743_v4 = vpop.f32.mrf.mxu1 }
 0x103   :  { %v744_v42 = vadd.f32 %v6425_v51, %v743_v4  ;;  %v1811_v22 = vpop.f32.mrf.mxu3  ;;  %v4880_v4 = vld [vmem:[%s9262_s0 + $0x258] sm:$0xff] }
 0x104   :  { %v1442_v36 = vmax.f32 %v1272_v10, 0.0 }
 0x105   :  { %4936 = vmatmul.msk.f32.gmra.mxu1 %vm77_vm0, %v4879_v35  ;;  %v6461_v52 = vpop.f32.mrf.mxu0  ;;  %v912_v3 = vmax.f32 %v744_v42, 0.0 }
 0x106   :  { %v1499_v34 = vmax.f32 %v968_v54, %v1442_v36  ;;  %5050 = vmatmul.msk.f32.gmra.mxu2 %vm77_vm0, %v4993_v44  ;;  %9277 = vst [vmem:[#allocation14_spill] sm:$0xff] %v6461_v52  ;;  %v438_v44 = vmax.f32 %v270_v6, 0.0  ;;  %v273_v6 = vadd.f32 %v6425_v51, %v6126_v21  ;;  %v5222_v52 = vld [vmem:[%s9262_s0 + $0x7b0] sm:$0xff]  ;;  %v1809_v21 = vadd.f32 %v6425_v51, %v1808_v38 }
 0x108   :  { %v6469_v5 = vmax.f32 %v1499_v34, %v1973_v28  ;;  %5278 = vmatmul.msk.f32.gmra.mxu0 %vm77_vm0, %v5221_v20  ;;  %5167 = vmatmul.msk.f32.gmra.mxu3 %vm77_vm0, %v5110_v60  ;;  %v4994_v28 = vld [vmem:[%s9262_s0 + $0x420] sm:$0xff]  ;;  %v969_v54 = vmax.f32 %v438_v44, %v912_v3  ;;  %v1974_v34 = vmax.f32 %v1806_v13, 0.0 }
 0x109   :  { %v1274_v36 = vpop.f32.mrf.mxu2  ;;  %v5111_v3 = vld [vmem:[%s9262_s0 + $0x600] sm:$0xff] }
 0x10a   :  { %v1275_v35 = vadd.f32 %v6425_v51, %v1274_v36  ;;  %v746_v10 = vpop.f32.mrf.mxu1 }
 0x10b   :  { %v747_v18 = vadd.f32 %v6425_v51, %v746_v10  ;;  %v1814_v20 = vpop.f32.mrf.mxu3  ;;  %v439_v10 = vmax.f32 %v273_v6, 0.0  ;;  %v276_v6 = vadd.f32 %v6425_v51, %v6150_v29  ;;  %v1812_v29 = vadd.f32 %v6425_v51, %v1811_v22 }
 0x10c   :  { %v1443_v42 = vmax.f32 %v1275_v35, 0.0 }
 0x10d   :  { %4937 = vmatmul.msk.f32.gmra.mxu1 %vm77_vm0, %v4880_v4  ;;  %v6486_v36 = vpop.f32.mrf.mxu0  ;;  %v913_v13 = vmax.f32 %v747_v18, 0.0 }
 0x10e   :  { %v1500_v60 = vmax.f32 %v969_v54, %v1443_v42  ;;  %5051 = vmatmul.msk.f32.gmra.mxu2 %vm77_vm0, %v4994_v28  ;;  %v4881_v54 = vld [vmem:[%s9262_s0 + $0x260] sm:$0xff]  ;;  %v4995_v42 = vld [vmem:[%s9262_s0 + $0x428] sm:$0xff] }
 0x10f   :  { %v970_v18 = vmax.f32 %v439_v10, %v913_v13  ;;  %v5112_v13 = vld [vmem:[%s9262_s0 + $0x608] sm:$0xff] }
 0x110   :  { %v6494_v44 = vmax.f32 %v1500_v60, %v1974_v34  ;;  %5279 = vmatmul.msk.f32.gmra.mxu0 %vm77_vm0, %v5222_v52  ;;  %5168 = vmatmul.msk.f32.gmra.mxu3 %vm77_vm0, %v5111_v3  ;;  %v1975_v60 = vmax.f32 %v1809_v21, 0.0 }
 0x111   :  { %v1277_v35 = vpop.f32.mrf.mxu2 }
 0x112   :  { %9278 = vst [vmem:[#allocation15_spill] sm:$0xff] %v6494_v44  ;;  %v1278_v4 = vadd.f32 %v6425_v51, %v1277_v35  ;;  %v749_v28 = vpop.f32.mrf.mxu1  ;;  %v5223_v44 = vld [vmem:[%s9262_s0 + $0x7b8] sm:$0xff] }
 0x113   :  { %v750_v38 = vadd.f32 %v6425_v51, %v749_v28  ;;  %v1817_v52 = vpop.f32.mrf.mxu3  ;;  %v440_v28 = vmax.f32 %v276_v6, 0.0  ;;  %v279_v6 = vadd.f32 %v6425_v51, %v6174_v37  ;;  %v1815_v37 = vadd.f32 %v6425_v51, %v1814_v20 }
 0x114   :  { %v1444_v34 = vmax.f32 %v1278_v4, 0.0 }
 0x115   :  { %4938 = vmatmul.msk.f32.gmra.mxu1 %vm77_vm0, %v4881_v54  ;;  %v6511_v35 = vpop.f32.mrf.mxu0  ;;  %v914_v21 = vmax.f32 %v750_v38, 0.0 }
 0x116   :  { %v1501_v3 = vmax.f32 %v970_v18, %v1444_v34  ;;  %5052 = vmatmul.msk.f32.gmra.mxu2 %vm77_vm0, %v4995_v42  ;;  %v4882_v18 = vld [vmem:[%s9262_s0 + $0x268] sm:$0xff]  ;;  %v4996_v34 = vld [vmem:[%s9262_s0 + $0x430] sm:$0xff] }
 0x117   :  { %v971_v38 = vmax.f32 %v440_v28, %v914_v21  ;;  %v5113_v21 = vld [vmem:[%s9262_s0 + $0x610] sm:$0xff] }
 0x118   :  { %v6519_v10 = vmax.f32 %v1501_v3, %v1975_v60  ;;  %5280 = vmatmul.msk.f32.gmra.mxu0 %vm77_vm0, %v5223_v44  ;;  %5169 = vmatmul.msk.f32.gmra.mxu3 %vm77_vm0, %v5112_v13  ;;  %v1976_v3 = vmax.f32 %v1812_v29, 0.0 }
 0x119   :  { %v1280_v4 = vpop.f32.mrf.mxu2 }
 0x11a   :  { %9279 = vst [vmem:[#allocation16_spill] sm:$0xff] %v6519_v10  ;;  %v1281_v54 = vadd.f32 %v6425_v51, %v1280_v4  ;;  %v752_v42 = vpop.f32.mrf.mxu1  ;;  %v5224_v10 = vld [vmem:[%s9262_s0 + $0x7c0] sm:$0xff] }
 0x11b   :  { %v753_v22 = vadd.f32 %v6425_v51, %v752_v42  ;;  %v1820_v44 = vpop.f32.mrf.mxu3  ;;  %v441_v42 = vmax.f32 %v279_v6, 0.0  ;;  %v282_v6 = vadd.f32 %v6425_v51, %v6198_v45  ;;  %v1818_v45 = vadd.f32 %v6425_v51, %v1817_v52 }
 0x11c   :  { %v1445_v60 = vmax.f32 %v1281_v54, 0.0 }
 0x11d   :  { %4939 = vmatmul.msk.f32.gmra.mxu1 %vm77_vm0, %v4882_v18  ;;  %v6536_v4 = vpop.f32.mrf.mxu0  ;;  %v915_v29 = vmax.f32 %v753_v22, 0.0 }
 0x11e   :  { %v1502_v13 = vmax.f32 %v971_v38, %v1445_v60  ;;  %5053 = vmatmul.msk.f32.gmra.mxu2 %vm77_vm0, %v4996_v34  ;;  %v4883_v38 = vld [vmem:[%s9262_s0 + $0x270] sm:$0xff]  ;;  %v4997_v60 = vld [vmem:[%s9262_s0 + $0x438] sm:$0xff] }
 0x11f   :  { %v972_v22 = vmax.f32 %v441_v42, %v915_v29  ;;  %v5114_v29 = vld [vmem:[%s9262_s0 + $0x618] sm:$0xff] }
 0x120   :  { %v6544_v28 = vmax.f32 %v1502_v13, %v1976_v3  ;;  %5281 = vmatmul.msk.f32.gmra.mxu0 %vm77_vm0, %v5224_v10  ;;  %5170 = vmatmul.msk.f32.gmra.mxu3 %vm77_vm0, %v5113_v21  ;;  %v1977_v13 = vmax.f32 %v1815_v37, 0.0 }
 0x121   :  { %v1283_v54 = vpop.f32.mrf.mxu2 }
 0x122   :  { %9280 = vst [vmem:[#allocation17_spill] sm:$0xff] %v6544_v28  ;;  %v1284_v18 = vadd.f32 %v6425_v51, %v1283_v54  ;;  %v755_v34 = vpop.f32.mrf.mxu1  ;;  %v5225_v28 = vld [vmem:[%s9262_s0 + $0x7c8] sm:$0xff] }
 0x123   :  { %v756_v20 = vadd.f32 %v6425_v51, %v755_v34  ;;  %v1823_v10 = vpop.f32.mrf.mxu3  ;;  %v442_v34 = vmax.f32 %v282_v6, 0.0  ;;  %v285_v6 = vadd.f32 %v6425_v51, %v6222_v53  ;;  %v1821_v53 = vadd.f32 %v6425_v51, %v1820_v44 }
 0x124   :  { %v1446_v3 = vmax.f32 %v1284_v18, 0.0 }
 0x125   :  { %4940 = vmatmul.msk.f32.gmra.mxu1 %vm77_vm0, %v4883_v38  ;;  %v6561_v54 = vpop.f32.mrf.mxu0  ;;  %v916_v37 = vmax.f32 %v756_v20, 0.0 }
 0x126   :  { %v1503_v21 = vmax.f32 %v972_v22, %v1446_v3  ;;  %5054 = vmatmul.msk.f32.gmra.mxu2 %vm77_vm0, %v4997_v60  ;;  %v4884_v22 = vld [vmem:[%s9262_s0 + $0x278] sm:$0xff]  ;;  %v4998_v3 = vld [vmem:[%s9262_s0 + $0x440] sm:$0xff] }
 0x127   :  { %v973_v20 = vmax.f32 %v442_v34, %v916_v37  ;;  %v5115_v37 = vld [vmem:[%s9262_s0 + $0x620] sm:$0xff] }
 0x128   :  { %v6569_v42 = vmax.f32 %v1503_v21, %v1977_v13  ;;  %5282 = vmatmul.msk.f32.gmra.mxu0 %vm77_vm0, %v5225_v28  ;;  %5171 = vmatmul.msk.f32.gmra.mxu3 %vm77_vm0, %v5114_v29  ;;  %v1978_v21 = vmax.f32 %v1818_v45, 0.0 }
 0x129   :  { %v1286_v18 = vpop.f32.mrf.mxu2 }
 0x12a   :  { %9281 = vst [vmem:[#allocation18_spill] sm:$0xff] %v6569_v42  ;;  %v1287_v38 = vadd.f32 %v6425_v51, %v1286_v18  ;;  %v758_v60 = vpop.f32.mrf.mxu1  ;;  %v5226_v42 = vld [vmem:[%s9262_s0 + $0x7d0] sm:$0xff] }
 0x12b   :  { %v759_v52 = vadd.f32 %v6425_v51, %v758_v60  ;;  %v1826_v28 = vpop.f32.mrf.mxu3  ;;  %v443_v60 = vmax.f32 %v285_v6, 0.0  ;;  %v288_v6 = vadd.f32 %v6425_v51, %v6246_v61  ;;  %v1824_v61 = vadd.f32 %v6425_v51, %v1823_v10 }
 0x12c   :  { %v1447_v13 = vmax.f32 %v1287_v38, 0.0 }
 0x12d   :  { %4941 = vmatmul.msk.f32.gmra.mxu1 %vm77_vm0, %v4884_v22  ;;  %v6586_v18 = vpop.f32.mrf.mxu0  ;;  %v917_v45 = vmax.f32 %v759_v52, 0.0 }
 0x12e   :  { %v1504_v29 = vmax.f32 %v973_v20, %v1447_v13  ;;  %5055 = vmatmul.msk.f32.gmra.mxu2 %vm77_vm0, %v4998_v3  ;;  %v4885_v20 = vld [vmem:[%s9262_s0 + $0x280] sm:$0xff]  ;;  %v4999_v13 = vld [vmem:[%s9262_s0 + $0x448] sm:$0xff] }
 0x12f   :  { %v974_v52 = vmax.f32 %v443_v60, %v917_v45  ;;  %v5116_v45 = vld [vmem:[%s9262_s0 + $0x628] sm:$0xff] }
 0x130   :  { %v6594_v34 = vmax.f32 %v1504_v29, %v1978_v21  ;;  %5283 = vmatmul.msk.f32.gmra.mxu0 %vm77_vm0, %v5226_v42  ;;  %5172 = vmatmul.msk.f32.gmra.mxu3 %vm77_vm0, %v5115_v37  ;;  %v1979_v29 = vmax.f32 %v1821_v53, 0.0 }
 0x131   :  { %v1289_v38 = vpop.f32.mrf.mxu2 }
 0x132   :  { %9282 = vst [vmem:[#allocation19_spill] sm:$0xff] %v6594_v34  ;;  %v1290_v22 = vadd.f32 %v6425_v51, %v1289_v38  ;;  %v761_v3 = vpop.f32.mrf.mxu1  ;;  %v5227_v34 = vld [vmem:[%s9262_s0 + $0x7d8] sm:$0xff] }
 0x133   :  { %v762_v44 = vadd.f32 %v6425_v51, %v761_v3  ;;  %v1829_v42 = vpop.f32.mrf.mxu3  ;;  %v444_v3 = vmax.f32 %v288_v6, 0.0  ;;  %v291_v6 = vadd.f32 %v6425_v51, %v6270_v7  ;;  %v1827_v7 = vadd.f32 %v6425_v51, %v1826_v28 }
 0x134   :  { %v1448_v21 = vmax.f32 %v1290_v22, 0.0 }
 0x135   :  { %4942 = vmatmul.msk.f32.gmra.mxu1 %vm77_vm0, %v4885_v20  ;;  %v6611_v38 = vpop.f32.mrf.mxu0  ;;  %v918_v53 = vmax.f32 %v762_v44, 0.0 }
 0x136   :  { %v1505_v37 = vmax.f32 %v974_v52, %v1448_v21  ;;  %5056 = vmatmul.msk.f32.gmra.mxu2 %vm77_vm0, %v4999_v13  ;;  %v4886_v52 = vld [vmem:[%s9262_s0 + $0x288] sm:$0xff]  ;;  %v5000_v21 = vld [vmem:[%s9262_s0 + $0x450] sm:$0xff] }
 0x137   :  { %v975_v44 = vmax.f32 %v444_v3, %v918_v53  ;;  %v5117_v53 = vld [vmem:[%s9262_s0 + $0x630] sm:$0xff] }
 0x138   :  { %v6619_v60 = vmax.f32 %v1505_v37, %v1979_v29  ;;  %5284 = vmatmul.msk.f32.gmra.mxu0 %vm77_vm0, %v5227_v34  ;;  %5173 = vmatmul.msk.f32.gmra.mxu3 %vm77_vm0, %v5116_v45  ;;  %v1980_v37 = vmax.f32 %v1824_v61, 0.0 }
 0x139   :  { %v1292_v22 = vpop.f32.mrf.mxu2 }
 0x13a   :  { %9283 = vst [vmem:[#allocation20_spill] sm:$0xff] %v6619_v60  ;;  %v1293_v20 = vadd.f32 %v6425_v51, %v1292_v22  ;;  %v764_v13 = vpop.f32.mrf.mxu1  ;;  %v5228_v60 = vld [vmem:[%s9262_s0 + $0x7e0] sm:$0xff] }
 0x13b   :  { %v765_v10 = vadd.f32 %v6425_v51, %v764_v13  ;;  %v1832_v34 = vpop.f32.mrf.mxu3  ;;  %v445_v13 = vmax.f32 %v291_v6, 0.0  ;;  %v294_v6 = vadd.f32 %v6425_v51, %v6294_v23  ;;  %v1830_v23 = vadd.f32 %v6425_v51, %v1829_v42 }
 0x13c   :  { %v1449_v29 = vmax.f32 %v1293_v20, 0.0 }
 0x13d   :  { %4943 = vmatmul.msk.f32.gmra.mxu1 %vm77_vm0, %v4886_v52  ;;  %v6636_v22 = vpop.f32.mrf.mxu0  ;;  %v919_v61 = vmax.f32 %v765_v10, 0.0 }
 0x13e   :  { %v1506_v45 = vmax.f32 %v975_v44, %v1449_v29  ;;  %5057 = vmatmul.msk.f32.gmra.mxu2 %vm77_vm0, %v5000_v21  ;;  %v4887_v44 = vld [vmem:[%s9262_s0 + $0x290] sm:$0xff]  ;;  %v5001_v29 = vld [vmem:[%s9262_s0 + $0x458] sm:$0xff] }
 0x13f   :  { %v976_v10 = vmax.f32 %v445_v13, %v919_v61  ;;  %v5118_v61 = vld [vmem:[%s9262_s0 + $0x638] sm:$0xff] }
 0x140   :  { %v6644_v3 = vmax.f32 %v1506_v45, %v1980_v37  ;;  %5285 = vmatmul.msk.f32.gmra.mxu0 %vm77_vm0, %v5228_v60  ;;  %5174 = vmatmul.msk.f32.gmra.mxu3 %vm77_vm0, %v5117_v53  ;;  %v1981_v45 = vmax.f32 %v1827_v7, 0.0 }
 0x141   :  { %v1295_v20 = vpop.f32.mrf.mxu2 }
 0x142   :  { %9284 = vst [vmem:[#allocation21_spill] sm:$0xff] %v6644_v3  ;;  %v1296_v52 = vadd.f32 %v6425_v51, %v1295_v20  ;;  %v767_v21 = vpop.f32.mrf.mxu1  ;;  %v5229_v3 = vld [vmem:[%s9262_s0 + $0x7e8] sm:$0xff] }
 0x143   :  { %v768_v28 = vadd.f32 %v6425_v51, %v767_v21  ;;  %v1835_v60 = vpop.f32.mrf.mxu3  ;;  %v446_v21 = vmax.f32 %v294_v6, 0.0  ;;  %v297_v6 = vadd.f32 %v6425_v51, %v6318_v39  ;;  %v1833_v39 = vadd.f32 %v6425_v51, %v1832_v34 }
 0x144   :  { %v1450_v37 = vmax.f32 %v1296_v52, 0.0 }
 0x145   :  { %4944 = vmatmul.msk.f32.gmra.mxu1 %vm77_vm0, %v4887_v44  ;;  %v6661_v20 = vpop.f32.mrf.mxu0  ;;  %v920_v7 = vmax.f32 %v768_v28, 0.0 }
 0x146   :  { %v1507_v53 = vmax.f32 %v976_v10, %v1450_v37  ;;  %5058 = vmatmul.msk.f32.gmra.mxu2 %vm77_vm0, %v5001_v29  ;;  %v4888_v10 = vld [vmem:[%s9262_s0 + $0x298] sm:$0xff]  ;;  %v5002_v37 = vld [vmem:[%s9262_s0 + $0x460] sm:$0xff] }
 0x147   :  { %v977_v28 = vmax.f32 %v446_v21, %v920_v7  ;;  %v5119_v7 = vld [vmem:[%s9262_s0 + $0x640] sm:$0xff] }
 0x148   :  { %v6669_v13 = vmax.f32 %v1507_v53, %v1981_v45  ;;  %5286 = vmatmul.msk.f32.gmra.mxu0 %vm77_vm0, %v5229_v3  ;;  %5175 = vmatmul.msk.f32.gmra.mxu3 %vm77_vm0, %v5118_v61  ;;  %v1982_v53 = vmax.f32 %v1830_v23, 0.0 }
 0x149   :  { %v1298_v52 = vpop.f32.mrf.mxu2 }
 0x14a   :  { %9285 = vst [vmem:[#allocation22_spill] sm:$0xff] %v6669_v13  ;;  %v1299_v44 = vadd.f32 %v6425_v51, %v1298_v52  ;;  %v770_v29 = vpop.f32.mrf.mxu1  ;;  %v5230_v13 = vld [vmem:[%s9262_s0 + $0x7f0] sm:$0xff] }
 0x14b   :  { %v771_v42 = vadd.f32 %v6425_v51, %v770_v29  ;;  %v1838_v3 = vpop.f32.mrf.mxu3  ;;  %v447_v29 = vmax.f32 %v297_v6, 0.0  ;;  %v300_v6 = vadd.f32 %v6425_v51, %v6342_v55  ;;  %v1836_v55 = vadd.f32 %v6425_v51, %v1835_v60 }
 0x14c   :  { %v1451_v45 = vmax.f32 %v1299_v44, 0.0 }
 0x14d   :  { %4945 = vmatmul.msk.f32.gmra.mxu1 %vm77_vm0, %v4888_v10  ;;  %v6686_v52 = vpop.f32.mrf.mxu0  ;;  %v921_v23 = vmax.f32 %v771_v42, 0.0 }
 0x14e   :  { %v1508_v61 = vmax.f32 %v977_v28, %v1451_v45  ;;  %5059 = vmatmul.msk.f32.gmra.mxu2 %vm77_vm0, %v5002_v37  ;;  %v4889_v28 = vld [vmem:[%s9262_s0 + $0x2a0] sm:$0xff]  ;;  %v5003_v45 = vld [vmem:[%s9262_s0 + $0x468] sm:$0xff] }
 0x14f   :  { %v978_v42 = vmax.f32 %v447_v29, %v921_v23  ;;  %v5120_v23 = vld [vmem:[%s9262_s0 + $0x648] sm:$0xff] }
 0x150   :  { %v6694_v21 = vmax.f32 %v1508_v61, %v1982_v53  ;;  %5287 = vmatmul.msk.f32.gmra.mxu0 %vm77_vm0, %v5230_v13  ;;  %5176 = vmatmul.msk.f32.gmra.mxu3 %vm77_vm0, %v5119_v7  ;;  %v1983_v61 = vmax.f32 %v1833_v39, 0.0 }
 0x151   :  { %v1301_v44 = vpop.f32.mrf.mxu2 }
 0x152   :  { %9286 = vst [vmem:[#allocation23_spill] sm:$0xff] %v6694_v21  ;;  %v1302_v10 = vadd.f32 %v6425_v51, %v1301_v44  ;;  %v773_v37 = vpop.f32.mrf.mxu1  ;;  %v5231_v21 = vld [vmem:[%s9262_s0 + $0x7f8] sm:$0xff] }
 0x153   :  { %v774_v34 = vadd.f32 %v6425_v51, %v773_v37  ;;  %v1841_v13 = vpop.f32.mrf.mxu3  ;;  %v448_v37 = vmax.f32 %v300_v6, 0.0  ;;  %v303_v6 = vadd.f32 %v6425_v51, %v6366_v11  ;;  %v1839_v11 = vadd.f32 %v6425_v51, %v1838_v3 }
 0x154   :  { %v1452_v53 = vmax.f32 %v1302_v10, 0.0 }
 0x155   :  { %4946 = vmatmul.msk.f32.gmra.mxu1 %vm77_vm0, %v4889_v28  ;;  %v6711_v44 = vpop.f32.mrf.mxu0  ;;  %v922_v39 = vmax.f32 %v774_v34, 0.0 }
 0x156   :  { %v1509_v7 = vmax.f32 %v978_v42, %v1452_v53  ;;  %5060 = vmatmul.msk.f32.gmra.mxu2 %vm77_vm0, %v5003_v45  ;;  %v4890_v42 = vld [vmem:[%s9262_s0 + $0x2a8] sm:$0xff]  ;;  %v5004_v53 = vld [vmem:[%s9262_s0 + $0x470] sm:$0xff] }
 0x157   :  { %v979_v34 = vmax.f32 %v448_v37, %v922_v39  ;;  %v5121_v39 = vld [vmem:[%s9262_s0 + $0x650] sm:$0xff] }
 0x158   :  { %v6719_v29 = vmax.f32 %v1509_v7, %v1983_v61  ;;  %5288 = vmatmul.msk.f32.gmra.mxu0 %vm77_vm0, %v5231_v21  ;;  %5177 = vmatmul.msk.f32.gmra.mxu3 %vm77_vm0, %v5120_v23  ;;  %v1984_v7 = vmax.f32 %v1836_v55, 0.0 }
 0x159   :  { %v1304_v10 = vpop.f32.mrf.mxu2 }
 0x15a   :  { %9287 = vst [vmem:[#allocation24_spill] sm:$0xff] %v6719_v29  ;;  %v1305_v28 = vadd.f32 %v6425_v51, %v1304_v10  ;;  %v776_v45 = vpop.f32.mrf.mxu1  ;;  %v5232_v29 = vld [vmem:[%s9262_s0 + $0x800] sm:$0xff] }
 0x15b   :  { %v777_v60 = vadd.f32 %v6425_v51, %v776_v45  ;;  %v1844_v21 = vpop.f32.mrf.mxu3  ;;  %v449_v45 = vmax.f32 %v303_v6, 0.0  ;;  %v306_v6 = vadd.f32 %v6425_v51, %v6388_v43  ;;  %v1842_v43 = vadd.f32 %v6425_v51, %v1841_v13 }
 0x15c   :  { %v1453_v61 = vmax.f32 %v1305_v28, 0.0 }
 0x15d   :  { %4947 = vmatmul.msk.f32.gmra.mxu1 %vm77_vm0, %v4890_v42  ;;  %v6736_v10 = vpop.f32.mrf.mxu0  ;;  %v923_v55 = vmax.f32 %v777_v60, 0.0 }
 0x15e   :  { %v1510_v23 = vmax.f32 %v979_v34, %v1453_v61  ;;  %5061 = vmatmul.msk.f32.gmra.mxu2 %vm77_vm0, %v5004_v53  ;;  %v4891_v34 = vld [vmem:[%s9262_s0 + $0x2b0] sm:$0xff]  ;;  %v5005_v61 = vld [vmem:[%s9262_s0 + $0x478] sm:$0xff] }
 0x15f   :  { %v980_v60 = vmax.f32 %v449_v45, %v923_v55  ;;  %v5122_v55 = vld [vmem:[%s9262_s0 + $0x658] sm:$0xff] }
 0x160   :  { %v6744_v37 = vmax.f32 %v1510_v23, %v1984_v7  ;;  %5289 = vmatmul.msk.f32.gmra.mxu0 %vm77_vm0, %v5232_v29  ;;  %5178 = vmatmul.msk.f32.gmra.mxu3 %vm77_vm0, %v5121_v39  ;;  %v1985_v23 = vmax.f32 %v1839_v11, 0.0 }
 0x161   :  { %v1307_v28 = vpop.f32.mrf.mxu2 }
 0x162   :  { %9288 = vst [vmem:[#allocation25_spill] sm:$0xff] %v6744_v37  ;;  %v1308_v42 = vadd.f32 %v6425_v51, %v1307_v28  ;;  %v779_v53 = vpop.f32.mrf.mxu1  ;;  %v5233_v37 = vld [vmem:[%s9262_s0 + $0x808] sm:$0xff] }
 0x163   :  { %v780_v3 = vadd.f32 %v6425_v51, %v779_v53  ;;  %v1847_v29 = vpop.f32.mrf.mxu3  ;;  %v450_v53 = vmax.f32 %v306_v6, 0.0  ;;  %v309_v6 = vadd.f32 %v6425_v51, %v6410_v19  ;;  %v1845_v19 = vadd.f32 %v6425_v51, %v1844_v21 }
 0x164   :  { %v1454_v7 = vmax.f32 %v1308_v42, 0.0 }
 0x165   :  { %4948 = vmatmul.msk.f32.gmra.mxu1 %vm77_vm0, %v4891_v34  ;;  %v6761_v28 = vpop.f32.mrf.mxu0  ;;  %v924_v11 = vmax.f32 %v780_v3, 0.0 }
 0x166   :  { %v1511_v39 = vmax.f32 %v980_v60, %v1454_v7  ;;  %5062 = vmatmul.msk.f32.gmra.mxu2 %vm77_vm0, %v5005_v61  ;;  %v4892_v60 = vld [vmem:[%s9262_s0 + $0x2b8] sm:$0xff]  ;;  %v5006_v7 = vld [vmem:[%s9262_s0 + $0x480] sm:$0xff] }
 0x167   :  { %v981_v3 = vmax.f32 %v450_v53, %v924_v11  ;;  %v5123_v11 = vld [vmem:[%s9262_s0 + $0x660] sm:$0xff] }
 0x168   :  { %v6769_v45 = vmax.f32 %v1511_v39, %v1985_v23  ;;  %5290 = vmatmul.msk.f32.gmra.mxu0 %vm77_vm0, %v5233_v37  ;;  %5179 = vmatmul.msk.f32.gmra.mxu3 %vm77_vm0, %v5122_v55  ;;  %v1986_v39 = vmax.f32 %v1842_v43, 0.0 }
 0x169   :  { %v1310_v42 = vpop.f32.mrf.mxu2 }
 0x16a   :  { %9289 = vst [vmem:[#allocation26_spill] sm:$0xff] %v6769_v45  ;;  %v1311_v34 = vadd.f32 %v6425_v51, %v1310_v42  ;;  %v782_v61 = vpop.f32.mrf.mxu1  ;;  %v5234_v45 = vld [vmem:[%s9262_s0 + $0x810] sm:$0xff] }
 0x16b   :  { %v783_v13 = vadd.f32 %v6425_v51, %v782_v61  ;;  %v1850_v37 = vpop.f32.mrf.mxu3  ;;  %v451_v61 = vmax.f32 %v309_v6, 0.0  ;;  %v312_v6 = vadd.f32 %v6425_v51, %v6068_v2  ;;  %v1848_v2 = vadd.f32 %v6425_v51, %v1847_v29 }
 0x16c   :  { %v1455_v23 = vmax.f32 %v1311_v34, 0.0 }
 0x16d   :  { %4949 = vmatmul.msk.f32.gmra.mxu1 %vm77_vm0, %v4892_v60  ;;  %v6786_v42 = vpop.f32.mrf.mxu0  ;;  %v925_v43 = vmax.f32 %v783_v13, 0.0 }
 0x16e   :  { %v1512_v55 = vmax.f32 %v981_v3, %v1455_v23  ;;  %5063 = vmatmul.msk.f32.gmra.mxu2 %vm77_vm0, %v5006_v7  ;;  %v4893_v3 = vld [vmem:[%s9262_s0 + $0x2c0] sm:$0xff]  ;;  %v5007_v23 = vld [vmem:[%s9262_s0 + $0x488] sm:$0xff] }
 0x16f   :  { %v982_v13 = vmax.f32 %v451_v61, %v925_v43  ;;  %v5124_v43 = vld [vmem:[%s9262_s0 + $0x668] sm:$0xff] }
 0x170   :  { %v6794_v53 = vmax.f32 %v1512_v55, %v1986_v39  ;;  %5291 = vmatmul.msk.f32.gmra.mxu0 %vm77_vm0, %v5234_v45  ;;  %5180 = vmatmul.msk.f32.gmra.mxu3 %vm77_vm0, %v5123_v11  ;;  %v1987_v55 = vmax.f32 %v1845_v19, 0.0 }
 0x171   :  { %v1313_v34 = vpop.f32.mrf.mxu2 }
 0x172   :  { %9290 = vst [vmem:[#allocation27_spill] sm:$0xff] %v6794_v53  ;;  %v1314_v60 = vadd.f32 %v6425_v51, %v1313_v34  ;;  %v785_v7 = vpop.f32.mrf.mxu1  ;;  %v5235_v53 = vld [vmem:[%s9262_s0 + $0x818] sm:$0xff] }
 0x173   :  { %v786_v21 = vadd.f32 %v6425_v51, %v785_v7  ;;  %v1853_v45 = vpop.f32.mrf.mxu3  ;;  %v452_v7 = vmax.f32 %v312_v6, 0.0  ;;  %v315_v6 = vadd.f32 %v6425_v51, %v6090_v9  ;;  %v1851_v9 = vadd.f32 %v6425_v51, %v1850_v37 }
 0x174   :  { %v1456_v39 = vmax.f32 %v1314_v60, 0.0 }
 0x175   :  { %4950 = vmatmul.msk.f32.gmra.mxu1 %vm77_vm0, %v4893_v3  ;;  %v6811_v34 = vpop.f32.mrf.mxu0  ;;  %v926_v19 = vmax.f32 %v786_v21, 0.0 }
 0x176   :  { %v1513_v11 = vmax.f32 %v982_v13, %v1456_v39  ;;  %5064 = vmatmul.msk.f32.gmra.mxu2 %vm77_vm0, %v5007_v23  ;;  %v4894_v13 = vld [vmem:[%s9262_s0 + $0x2c8] sm:$0xff]  ;;  %v5008_v39 = vld [vmem:[%s9262_s0 + $0x490] sm:$0xff] }
 0x177   :  { %v983_v21 = vmax.f32 %v452_v7, %v926_v19  ;;  %v5125_v19 = vld [vmem:[%s9262_s0 + $0x670] sm:$0xff] }
 0x178   :  { %v6819_v61 = vmax.f32 %v1513_v11, %v1987_v55  ;;  %5292 = vmatmul.msk.f32.gmra.mxu0 %vm77_vm0, %v5235_v53  ;;  %5181 = vmatmul.msk.f32.gmra.mxu3 %vm77_vm0, %v5124_v43  ;;  %v1988_v11 = vmax.f32 %v1848_v2, 0.0 }
 0x179   :  { %v1316_v60 = vpop.f32.mrf.mxu2 }
 0x17a   :  { %9291 = vst [vmem:[#allocation28_spill] sm:$0xff] %v6819_v61  ;;  %v1317_v3 = vadd.f32 %v6425_v51, %v1316_v60  ;;  %v788_v23 = vpop.f32.mrf.mxu1  ;;  %v5236_v61 = vld [vmem:[%s9262_s0 + $0x820] sm:$0xff] }
 0x17b   :  { %v789_v29 = vadd.f32 %v6425_v51, %v788_v23  ;;  %v1856_v53 = vpop.f32.mrf.mxu3  ;;  %v453_v23 = vmax.f32 %v315_v6, 0.0  ;;  %v318_v6 = vadd.f32 %v6425_v51, %v6114_v17  ;;  %v1854_v17 = vadd.f32 %v6425_v51, %v1853_v45 }
 0x17c   :  { %v1457_v55 = vmax.f32 %v1317_v3, 0.0 }
 0x17d   :  { %4951 = vmatmul.msk.f32.gmra.mxu1 %vm77_vm0, %v4894_v13  ;;  %v6836_v60 = vpop.f32.mrf.mxu0  ;;  %v927_v2 = vmax.f32 %v789_v29, 0.0 }
 0x17e   :  { %v1514_v43 = vmax.f32 %v983_v21, %v1457_v55  ;;  %5065 = vmatmul.msk.f32.gmra.mxu2 %vm77_vm0, %v5008_v39  ;;  %v4895_v21 = vld [vmem:[%s9262_s0 + $0x2d0] sm:$0xff]  ;;  %v5009_v55 = vld [vmem:[%s9262_s0 + $0x498] sm:$0xff] }
 0x17f   :  { %v984_v29 = vmax.f32 %v453_v23, %v927_v2  ;;  %v5126_v2 = vld [vmem:[%s9262_s0 + $0x678] sm:$0xff] }
 0x180   :  { %v6844_v7 = vmax.f32 %v1514_v43, %v1988_v11  ;;  %5293 = vmatmul.msk.f32.gmra.mxu0 %vm77_vm0, %v5236_v61  ;;  %5182 = vmatmul.msk.f32.gmra.mxu3 %vm77_vm0, %v5125_v19  ;;  %v1989_v43 = vmax.f32 %v1851_v9, 0.0 }
 0x181   :  { %v1319_v3 = vpop.f32.mrf.mxu2 }
 0x182   :  { %9292 = vst [vmem:[#allocation29_spill] sm:$0xff] %v6844_v7  ;;  %v1320_v13 = vadd.f32 %v6425_v51, %v1319_v3  ;;  %v791_v39 = vpop.f32.mrf.mxu1  ;;  %v5237_v7 = vld [vmem:[%s9262_s0 + $0x828] sm:$0xff] }
 0x183   :  { %v792_v37 = vadd.f32 %v6425_v51, %v791_v39  ;;  %v1859_v61 = vpop.f32.mrf.mxu3  ;;  %v454_v39 = vmax.f32 %v318_v6, 0.0  ;;  %v321_v6 = vadd.f32 %v6425_v51, %v6138_v25  ;;  %v1857_v25 = vadd.f32 %v6425_v51, %v1856_v53 }
 0x184   :  { %v1458_v11 = vmax.f32 %v1320_v13, 0.0 }
 0x185   :  { %4952 = vmatmul.msk.f32.gmra.mxu1 %vm77_vm0, %v4895_v21  ;;  %v6861_v3 = vpop.f32.mrf.mxu0  ;;  %v928_v9 = vmax.f32 %v792_v37, 0.0 }
 0x186   :  { %v1515_v19 = vmax.f32 %v984_v29, %v1458_v11  ;;  %5066 = vmatmul.msk.f32.gmra.mxu2 %vm77_vm0, %v5009_v55  ;;  %v4896_v29 = vld [vmem:[%s9262_s0 + $0x2d8] sm:$0xff]  ;;  %v5010_v11 = vld [vmem:[%s9262_s0 + $0x4a0] sm:$0xff] }
 0x187   :  { %v985_v37 = vmax.f32 %v454_v39, %v928_v9  ;;  %v5127_v9 = vld [vmem:[%s9262_s0 + $0x680] sm:$0xff] }
 0x188   :  { %v6869_v23 = vmax.f32 %v1515_v19, %v1989_v43  ;;  %5294 = vmatmul.msk.f32.gmra.mxu0 %vm77_vm0, %v5237_v7  ;;  %5183 = vmatmul.msk.f32.gmra.mxu3 %vm77_vm0, %v5126_v2  ;;  %v1990_v19 = vmax.f32 %v1854_v17, 0.0 }
 0x189   :  { %v1322_v13 = vpop.f32.mrf.mxu2 }
 0x18a   :  { %9293 = vst [vmem:[#allocation30_spill] sm:$0xff] %v6869_v23  ;;  %v1323_v21 = vadd.f32 %v6425_v51, %v1322_v13  ;;  %v794_v55 = vpop.f32.mrf.mxu1  ;;  %v5238_v23 = vld [vmem:[%s9262_s0 + $0x830] sm:$0xff] }
 0x18b   :  { %v795_v45 = vadd.f32 %v6425_v51, %v794_v55  ;;  %v1862_v7 = vpop.f32.mrf.mxu3  ;;  %v455_v55 = vmax.f32 %v321_v6, 0.0  ;;  %v324_v6 = vadd.f32 %v6425_v51, %v6162_v33  ;;  %v1860_v33 = vadd.f32 %v6425_v51, %v1859_v61 }
 0x18c   :  { %v1459_v43 = vmax.f32 %v1323_v21, 0.0 }
 0x18d   :  { %4953 = vmatmul.msk.f32.gmra.mxu1 %vm77_vm0, %v4896_v29  ;;  %v6886_v13 = vpop.f32.mrf.mxu0  ;;  %v929_v17 = vmax.f32 %v795_v45, 0.0 }
 0x18e   :  { %v1516_v2 = vmax.f32 %v985_v37, %v1459_v43  ;;  %5067 = vmatmul.msk.f32.gmra.mxu2 %vm77_vm0, %v5010_v11  ;;  %v4897_v37 = vld [vmem:[%s9262_s0 + $0x2e0] sm:$0xff]  ;;  %v5011_v43 = vld [vmem:[%s9262_s0 + $0x4a8] sm:$0xff] }
 0x18f   :  { %v986_v45 = vmax.f32 %v455_v55, %v929_v17  ;;  %v5128_v17 = vld [vmem:[%s9262_s0 + $0x688] sm:$0xff] }
 0x190   :  { %v6894_v39 = vmax.f32 %v1516_v2, %v1990_v19  ;;  %5295 = vmatmul.msk.f32.gmra.mxu0 %vm77_vm0, %v5238_v23  ;;  %5184 = vmatmul.msk.f32.gmra.mxu3 %vm77_vm0, %v5127_v9  ;;  %v1991_v2 = vmax.f32 %v1857_v25, 0.0 }
 0x191   :  { %v1325_v21 = vpop.f32.mrf.mxu2 }
 0x192   :  { %9294 = vst [vmem:[#allocation31_spill] sm:$0xff] %v6894_v39  ;;  %v1326_v29 = vadd.f32 %v6425_v51, %v1325_v21  ;;  %v797_v11 = vpop.f32.mrf.mxu1  ;;  %v5239_v39 = vld [vmem:[%s9262_s0 + $0x838] sm:$0xff] }
 0x193   :  { %v798_v53 = vadd.f32 %v6425_v51, %v797_v11  ;;  %v1865_v23 = vpop.f32.mrf.mxu3  ;;  %v456_v11 = vmax.f32 %v324_v6, 0.0  ;;  %v327_v6 = vadd.f32 %v6425_v51, %v6186_v41  ;;  %v1863_v41 = vadd.f32 %v6425_v51, %v1862_v7 }
 0x194   :  { %v1460_v19 = vmax.f32 %v1326_v29, 0.0 }
 0x195   :  { %4954 = vmatmul.msk.f32.gmra.mxu1 %vm77_vm0, %v4897_v37  ;;  %v6911_v21 = vpop.f32.mrf.mxu0  ;;  %v930_v25 = vmax.f32 %v798_v53, 0.0 }
 0x196   :  { %v1517_v9 = vmax.f32 %v986_v45, %v1460_v19  ;;  %5068 = vmatmul.msk.f32.gmra.mxu2 %vm77_vm0, %v5011_v43  ;;  %v4898_v45 = vld [vmem:[%s9262_s0 + $0x2e8] sm:$0xff]  ;;  %v5012_v19 = vld [vmem:[%s9262_s0 + $0x4b0] sm:$0xff] }
 0x197   :  { %v987_v53 = vmax.f32 %v456_v11, %v930_v25  ;;  %v5129_v25 = vld [vmem:[%s9262_s0 + $0x690] sm:$0xff] }
 0x198   :  { %v6919_v55 = vmax.f32 %v1517_v9, %v1991_v2  ;;  %5296 = vmatmul.msk.f32.gmra.mxu0 %vm77_vm0, %v5239_v39  ;;  %5185 = vmatmul.msk.f32.gmra.mxu3 %vm77_vm0, %v5128_v17  ;;  %v1992_v9 = vmax.f32 %v1860_v33, 0.0 }
 0x199   :  { %v1328_v29 = vpop.f32.mrf.mxu2 }
 0x19a   :  { %9295 = vst [vmem:[#allocation32_spill] sm:$0xff] %v6919_v55  ;;  %v1329_v37 = vadd.f32 %v6425_v51, %v1328_v29  ;;  %v800_v43 = vpop.f32.mrf.mxu1  ;;  %v5240_v55 = vld [vmem:[%s9262_s0 + $0x840] sm:$0xff] }
 0x19b   :  { %v801_v61 = vadd.f32 %v6425_v51, %v800_v43  ;;  %v1868_v39 = vpop.f32.mrf.mxu3  ;;  %v457_v43 = vmax.f32 %v327_v6, 0.0  ;;  %v330_v6 = vadd.f32 %v6425_v51, %v6210_v49  ;;  %v1866_v49 = vadd.f32 %v6425_v51, %v1865_v23 }
 0x19c   :  { %v1461_v2 = vmax.f32 %v1329_v37, 0.0 }
 0x19d   :  { %4955 = vmatmul.msk.f32.gmra.mxu1 %vm77_vm0, %v4898_v45  ;;  %v6936_v29 = vpop.f32.mrf.mxu0  ;;  %v931_v33 = vmax.f32 %v801_v61, 0.0 }
 0x19e   :  { %v1518_v17 = vmax.f32 %v987_v53, %v1461_v2  ;;  %5069 = vmatmul.msk.f32.gmra.mxu2 %vm77_vm0, %v5012_v19  ;;  %v4899_v53 = vld [vmem:[%s9262_s0 + $0x2f0] sm:$0xff]  ;;  %v5013_v2 = vld [vmem:[%s9262_s0 + $0x4b8] sm:$0xff] }
 0x19f   :  { %v988_v61 = vmax.f32 %v457_v43, %v931_v33  ;;  %v5130_v33 = vld [vmem:[%s9262_s0 + $0x698] sm:$0xff] }
 0x1a0   :  { %v6944_v11 = vmax.f32 %v1518_v17, %v1992_v9  ;;  %5297 = vmatmul.msk.f32.gmra.mxu0 %vm77_vm0, %v5240_v55  ;;  %5186 = vmatmul.msk.f32.gmra.mxu3 %vm77_vm0, %v5129_v25  ;;  %v1993_v17 = vmax.f32 %v1863_v41, 0.0 }
 0x1a1   :  { %v1331_v37 = vpop.f32.mrf.mxu2 }
 0x1a2   :  { %9296 = vst [vmem:[#allocation33_spill] sm:$0xff] %v6944_v11  ;;  %v1332_v45 = vadd.f32 %v6425_v51, %v1331_v37  ;;  %v803_v19 = vpop.f32.mrf.mxu1  ;;  %v5241_v11 = vld [vmem:[%s9262_s0 + $0x848] sm:$0xff] }
 0x1a3   :  { %v804_v7 = vadd.f32 %v6425_v51, %v803_v19  ;;  %v1871_v55 = vpop.f32.mrf.mxu3  ;;  %v458_v19 = vmax.f32 %v330_v6, 0.0  ;;  %v333_v6 = vadd.f32 %v6425_v51, %v6234_v57  ;;  %v6999_v57 = vld [vmem:[%s9263_s2] ss:$0 sm:$0xff] }
 0x1a4   :  { %v1462_v9 = vmax.f32 %v1332_v45, 0.0 }
 0x1a5   :  { %4956 = vmatmul.msk.f32.gmra.mxu1 %vm77_vm0, %v4899_v53  ;;  %v6961_v37 = vpop.f32.mrf.mxu0  ;;  %v932_v41 = vmax.f32 %v804_v7, 0.0 }
 0x1a6   :  { %v1519_v25 = vmax.f32 %v988_v61, %v1462_v9  ;;  %5070 = vmatmul.msk.f32.gmra.mxu2 %vm77_vm0, %v5013_v2  ;;  %v4900_v61 = vld [vmem:[%s9262_s0 + $0x2f8] sm:$0xff]  ;;  %v5014_v9 = vld [vmem:[%s9262_s0 + $0x4c0] sm:$0xff] }
 0x1a7   :  { %v989_v7 = vmax.f32 %v458_v19, %v932_v41  ;;  %v5131_v41 = vld [vmem:[%s9262_s0 + $0x6a0] sm:$0xff] }
 0x1a8   :  { %v6969_v43 = vmax.f32 %v1519_v25, %v1993_v17  ;;  %5298 = vmatmul.msk.f32.gmra.mxu0 %vm77_vm0, %v5241_v11  ;;  %5187 = vmatmul.msk.f32.gmra.mxu3 %vm77_vm0, %v5130_v33  ;;  %v1994_v25 = vmax.f32 %v1866_v49, 0.0 }
 0x1a9   :  { %v1334_v45 = vpop.f32.mrf.mxu2 }
 0x1aa   :  { %9297 = vst [vmem:[#allocation34_spill] sm:$0xff] %v6969_v43  ;;  %v1335_v53 = vadd.f32 %v6425_v51, %v1334_v45  ;;  %v806_v2 = vpop.f32.mrf.mxu1  ;;  %v5242_v43 = vld [vmem:[%s9262_s0 + $0x850] sm:$0xff] }
 0x1ab   :  { %v807_v23 = vadd.f32 %v6425_v51, %v806_v2  ;;  %v1874_v11 = vpop.f32.mrf.mxu3  ;;  %v1869_v51 = vadd.f32 %v6999_v57, %v1868_v39  ;;  %v459_v2 = vmax.f32 %v333_v6, 0.0  ;;  %v336_v6 = vadd.f32 %v6999_v57, %v6258_v1 }
 0x1ac   :  { %v1463_v17 = vmax.f32 %v1335_v53, 0.0  ;;  %v1872_v1 = vadd.f32 %v6999_v57, %v1871_v55 }
 0x1ad   :  { %4957 = vmatmul.msk.f32.gmra.mxu1 %vm77_vm0, %v4900_v61  ;;  %v6986_v45 = vpop.f32.mrf.mxu0  ;;  %v933_v49 = vmax.f32 %v807_v23, 0.0 }
 0x1ae   :  { %v1520_v33 = vmax.f32 %v989_v7, %v1463_v17  ;;  %5071 = vmatmul.msk.f32.gmra.mxu2 %vm77_vm0, %v5014_v9  ;;  %v4901_v7 = vld [vmem:[%s9262_s0 + $0x300] sm:$0xff]  ;;  %v5015_v17 = vld [vmem:[%s9262_s0 + $0x4c8] sm:$0xff] }
 0x1af   :  { %v990_v23 = vmax.f32 %v459_v2, %v933_v49  ;;  %v5132_v49 = vld [vmem:[%s9262_s0 + $0x6a8] sm:$0xff] }
 0x1b0   :  { %v6994_v19 = vmax.f32 %v1520_v33, %v1994_v25  ;;  %5299 = vmatmul.msk.f32.gmra.mxu0 %vm77_vm0, %v5242_v43  ;;  %5188 = vmatmul.msk.f32.gmra.mxu3 %vm77_vm0, %v5131_v41  ;;  %v1995_v33 = vmax.f32 %v1869_v51, 0.0 }
 0x1b1   :  { %v1337_v53 = vpop.f32.mrf.mxu2 }
 0x1b2   :  { %9298 = vst [vmem:[#allocation35_spill] sm:$0xff] %v6994_v19  ;;  %v1338_v61 = vadd.f32 %v6999_v57, %v1337_v53  ;;  %v809_v9 = vpop.f32.mrf.mxu1  ;;  %v5243_v19 = vld [vmem:[%s9262_s0 + $0x858] sm:$0xff] }
 0x1b3   :  { %v810_v39 = vadd.f32 %v6999_v57, %v809_v9  ;;  %v1877_v43 = vpop.f32.mrf.mxu3  ;;  %v460_v9 = vmax.f32 %v336_v6, 0.0  ;;  %v339_v6 = vadd.f32 %v6999_v57, %v6282_v15  ;;  %v1875_v15 = vadd.f32 %v6999_v57, %v1874_v11 }
 0x1b4   :  { %v1464_v25 = vmax.f32 %v1338_v61, 0.0 }
 0x1b5   :  { %4958 = vmatmul.msk.f32.gmra.mxu1 %vm77_vm0, %v4901_v7  ;;  %v7016_v53 = vpop.f32.mrf.mxu0  ;;  %v934_v51 = vmax.f32 %v810_v39, 0.0 }
 0x1b6   :  { %v1521_v41 = vmax.f32 %v990_v23, %v1464_v25  ;;  %5072 = vmatmul.msk.f32.gmra.mxu2 %vm77_vm0, %v5015_v17  ;;  %v4902_v23 = vld [vmem:[%s9262_s0 + $0x308] sm:$0xff]  ;;  %v5016_v25 = vld [vmem:[%s9262_s0 + $0x4d0] sm:$0xff] }
 0x1b7   :  { %v991_v39 = vmax.f32 %v460_v9, %v934_v51  ;;  %v5133_v51 = vld [vmem:[%s9262_s0 + $0x6b0] sm:$0xff] }
 0x1b8   :  { %v7024_v2 = vmax.f32 %v1521_v41, %v1995_v33  ;;  %5300 = vmatmul.msk.f32.gmra.mxu0 %vm77_vm0, %v5243_v19  ;;  %5189 = vmatmul.msk.f32.gmra.mxu3 %vm77_vm0, %v5132_v49  ;;  %v1996_v41 = vmax.f32 %v1872_v1, 0.0 }
 0x1b9   :  { %v1340_v61 = vpop.f32.mrf.mxu2 }
 0x1ba   :  { %9299 = vst [vmem:[#allocation36_spill] sm:$0xff] %v7024_v2  ;;  %v1341_v7 = vadd.f32 %v6999_v57, %v1340_v61  ;;  %v812_v17 = vpop.f32.mrf.mxu1  ;;  %v5244_v2 = vld [vmem:[%s9262_s0 + $0x860] sm:$0xff] }
 0x1bb   :  { %v813_v55 = vadd.f32 %v6999_v57, %v812_v17  ;;  %v1880_v19 = vpop.f32.mrf.mxu3  ;;  %v461_v17 = vmax.f32 %v339_v6, 0.0  ;;  %v342_v6 = vadd.f32 %v6999_v57, %v6306_v31  ;;  %v1878_v31 = vadd.f32 %v6999_v57, %v1877_v43 }
 0x1bc   :  { %v1465_v33 = vmax.f32 %v1341_v7, 0.0 }
 0x1bd   :  { %4959 = vmatmul.msk.f32.gmra.mxu1 %vm77_vm0, %v4902_v23  ;;  %v7041_v61 = vpop.f32.mrf.mxu0  ;;  %v935_v1 = vmax.f32 %v813_v55, 0.0 }
 0x1be   :  { %v1522_v49 = vmax.f32 %v991_v39, %v1465_v33  ;;  %5073 = vmatmul.msk.f32.gmra.mxu2 %vm77_vm0, %v5016_v25  ;;  %v4903_v39 = vld [vmem:[%s9262_s0 + $0x310] sm:$0xff]  ;;  %v5017_v33 = vld [vmem:[%s9262_s0 + $0x4d8] sm:$0xff] }
 0x1bf   :  { %v992_v55 = vmax.f32 %v461_v17, %v935_v1  ;;  %v5134_v1 = vld [vmem:[%s9262_s0 + $0x6b8] sm:$0xff] }
 0x1c0   :  { %v7049_v9 = vmax.f32 %v1522_v49, %v1996_v41  ;;  %5301 = vmatmul.msk.f32.gmra.mxu0 %vm77_vm0, %v5244_v2  ;;  %5190 = vmatmul.msk.f32.gmra.mxu3 %vm77_vm0, %v5133_v51  ;;  %v1997_v49 = vmax.f32 %v1875_v15, 0.0 }
 0x1c1   :  { %v1343_v7 = vpop.f32.mrf.mxu2 }
 0x1c2   :  { %9300 = vst [vmem:[#allocation37_spill] sm:$0xff] %v7049_v9  ;;  %v1344_v23 = vadd.f32 %v6999_v57, %v1343_v7  ;;  %v815_v25 = vpop.f32.mrf.mxu1  ;;  %v5245_v9 = vld [vmem:[%s9262_s0 + $0x868] sm:$0xff] }
 0x1c3   :  { %v816_v11 = vadd.f32 %v6999_v57, %v815_v25  ;;  %v1883_v2 = vpop.f32.mrf.mxu3  ;;  %v462_v25 = vmax.f32 %v342_v6, 0.0  ;;  %v345_v6 = vadd.f32 %v6999_v57, %v6330_v47  ;;  %v1881_v47 = vadd.f32 %v6999_v57, %v1880_v19 }
 0x1c4   :  { %v1466_v41 = vmax.f32 %v1344_v23, 0.0 }
 0x1c5   :  { %4960 = vmatmul.msk.f32.gmra.mxu1 %vm77_vm0, %v4903_v39  ;;  %v7066_v7 = vpop.f32.mrf.mxu0  ;;  %v936_v15 = vmax.f32 %v816_v11, 0.0 }
 0x1c6   :  { %v1523_v51 = vmax.f32 %v992_v55, %v1466_v41  ;;  %5074 = vmatmul.msk.f32.gmra.mxu2 %vm77_vm0, %v5017_v33  ;;  %v4904_v55 = vld [vmem:[%s9262_s0 + $0x318] sm:$0xff]  ;;  %v5018_v41 = vld [vmem:[%s9262_s0 + $0x4e0] sm:$0xff] }
 0x1c7   :  { %v993_v11 = vmax.f32 %v462_v25, %v936_v15  ;;  %v5135_v15 = vld [vmem:[%s9262_s0 + $0x6c0] sm:$0xff] }
 0x1c8   :  { %v7074_v17 = vmax.f32 %v1523_v51, %v1997_v49  ;;  %5302 = vmatmul.msk.f32.gmra.mxu0 %vm77_vm0, %v5245_v9  ;;  %5191 = vmatmul.msk.f32.gmra.mxu3 %vm77_vm0, %v5134_v1  ;;  %v1998_v51 = vmax.f32 %v1878_v31, 0.0 }
 0x1c9   :  { %v1346_v23 = vpop.f32.mrf.mxu2 }
 0x1ca   :  { %9301 = vst [vmem:[#allocation38_spill] sm:$0xff] %v7074_v17  ;;  %v1347_v39 = vadd.f32 %v6999_v57, %v1346_v23  ;;  %v818_v33 = vpop.f32.mrf.mxu1  ;;  %v5246_v17 = vld [vmem:[%s9262_s0 + $0x870] sm:$0xff] }
 0x1cb   :  { %v819_v43 = vadd.f32 %v6999_v57, %v818_v33  ;;  %v1886_v9 = vpop.f32.mrf.mxu3  ;;  %v463_v33 = vmax.f32 %v345_v6, 0.0  ;;  %v348_v6 = vadd.f32 %v6999_v57, %v6354_v63  ;;  %v1884_v63 = vadd.f32 %v6999_v57, %v1883_v2 }
 0x1cc   :  { %v1467_v49 = vmax.f32 %v1347_v39, 0.0 }
 0x1cd   :  { %4961 = vmatmul.msk.f32.gmra.mxu1 %vm77_vm0, %v4904_v55  ;;  %v7091_v23 = vpop.f32.mrf.mxu0  ;;  %v937_v31 = vmax.f32 %v819_v43, 0.0 }
 0x1ce   :  { %v1524_v1 = vmax.f32 %v993_v11, %v1467_v49  ;;  %5075 = vmatmul.msk.f32.gmra.mxu2 %vm77_vm0, %v5018_v41  ;;  %v4905_v11 = vld [vmem:[%s9262_s0 + $0x320] sm:$0xff]  ;;  %v5019_v49 = vld [vmem:[%s9262_s0 + $0x4e8] sm:$0xff] }
 0x1cf   :  { %v994_v43 = vmax.f32 %v463_v33, %v937_v31  ;;  %v5136_v31 = vld [vmem:[%s9262_s0 + $0x6c8] sm:$0xff] }
 0x1d0   :  { %v7099_v25 = vmax.f32 %v1524_v1, %v1998_v51  ;;  %5303 = vmatmul.msk.f32.gmra.mxu0 %vm77_vm0, %v5246_v17  ;;  %5192 = vmatmul.msk.f32.gmra.mxu3 %vm77_vm0, %v5135_v15  ;;  %v1999_v1 = vmax.f32 %v1881_v47, 0.0 }
 0x1d1   :  { %v1349_v39 = vpop.f32.mrf.mxu2 }
 0x1d2   :  { %9302 = vst [vmem:[#allocation39_spill] sm:$0xff] %v7099_v25  ;;  %v1350_v55 = vadd.f32 %v6999_v57, %v1349_v39  ;;  %v821_v41 = vpop.f32.mrf.mxu1  ;;  %v5247_v25 = vld [vmem:[%s9262_s0 + $0x878] sm:$0xff] }
 0x1d3   :  { %v822_v19 = vadd.f32 %v6999_v57, %v821_v41  ;;  %v1889_v17 = vpop.f32.mrf.mxu3  ;;  %v464_v41 = vmax.f32 %v348_v6, 0.0  ;;  %v351_v6 = vadd.f32 %v6999_v57, %v6378_v27  ;;  %v1887_v27 = vadd.f32 %v6999_v57, %v1886_v9 }
 0x1d4   :  { %v1468_v51 = vmax.f32 %v1350_v55, 0.0 }
 0x1d5   :  { %4962 = vmatmul.msk.f32.gmra.mxu1 %vm77_vm0, %v4905_v11  ;;  %v7116_v39 = vpop.f32.mrf.mxu0  ;;  %v938_v47 = vmax.f32 %v822_v19, 0.0 }
 0x1d6   :  { %v1525_v15 = vmax.f32 %v994_v43, %v1468_v51  ;;  %5076 = vmatmul.msk.f32.gmra.mxu2 %vm77_vm0, %v5019_v49  ;;  %v4906_v43 = vld [vmem:[%s9262_s0 + $0x328] sm:$0xff]  ;;  %v5020_v51 = vld [vmem:[%s9262_s0 + $0x4f0] sm:$0xff] }
 0x1d7   :  { %v995_v19 = vmax.f32 %v464_v41, %v938_v47  ;;  %v5137_v47 = vld [vmem:[%s9262_s0 + $0x6d0] sm:$0xff] }
 0x1d8   :  { %v7124_v33 = vmax.f32 %v1525_v15, %v1999_v1  ;;  %5304 = vmatmul.msk.f32.gmra.mxu0 %vm77_vm0, %v5247_v25  ;;  %5193 = vmatmul.msk.f32.gmra.mxu3 %vm77_vm0, %v5136_v31  ;;  %v2000_v15 = vmax.f32 %v1884_v63, 0.0 }
 0x1d9   :  { %v1352_v55 = vpop.f32.mrf.mxu2 }
 0x1da   :  { %9303 = vst [vmem:[#allocation40_spill] sm:$0xff] %v7124_v33  ;;  %v1353_v11 = vadd.f32 %v6999_v57, %v1352_v55  ;;  %v824_v49 = vpop.f32.mrf.mxu1  ;;  %v5248_v33 = vld [vmem:[%s9262_s0 + $0x880] sm:$0xff] }
 0x1db   :  { %v825_v2 = vadd.f32 %v6999_v57, %v824_v49  ;;  %v1892_v25 = vpop.f32.mrf.mxu3  ;;  %v465_v49 = vmax.f32 %v351_v6, 0.0  ;;  %v354_v6 = vadd.f32 %v6999_v57, %v6400_v59  ;;  %v1890_v59 = vadd.f32 %v6999_v57, %v1889_v17 }
 0x1dc   :  { %v1469_v1 = vmax.f32 %v1353_v11, 0.0 }
 0x1dd   :  { %4963 = vmatmul.msk.f32.gmra.mxu1 %vm77_vm0, %v4906_v43  ;;  %v7141_v55 = vpop.f32.mrf.mxu0  ;;  %v939_v63 = vmax.f32 %v825_v2, 0.0 }
 0x1de   :  { %v1526_v31 = vmax.f32 %v995_v19, %v1469_v1  ;;  %5077 = vmatmul.msk.f32.gmra.mxu2 %vm77_vm0, %v5020_v51  ;;  %v4907_v19 = vld [vmem:[%s9262_s0 + $0x330] sm:$0xff]  ;;  %v5021_v1 = vld [vmem:[%s9262_s0 + $0x4f8] sm:$0xff] }
 0x1df   :  { %v996_v2 = vmax.f32 %v465_v49, %v939_v63  ;;  %v5138_v63 = vld [vmem:[%s9262_s0 + $0x6d8] sm:$0xff] }
 0x1e0   :  { %v7149_v41 = vmax.f32 %v1526_v31, %v2000_v15  ;;  %5305 = vmatmul.msk.f32.gmra.mxu0 %vm77_vm0, %v5248_v33  ;;  %5194 = vmatmul.msk.f32.gmra.mxu3 %vm77_vm0, %v5137_v47  ;;  %v2001_v31 = vmax.f32 %v1887_v27, 0.0 }
 0x1e1   :  { %v1355_v11 = vpop.f32.mrf.mxu2 }
 0x1e2   :  { %9304 = vst [vmem:[#allocation41_spill] sm:$0xff] %v7149_v41  ;;  %v1356_v43 = vadd.f32 %v6999_v57, %v1355_v11  ;;  %v827_v51 = vpop.f32.mrf.mxu1  ;;  %v5249_v41 = vld [vmem:[%s9262_s0 + $0x888] sm:$0xff] }
 0x1e3   :  { %v828_v9 = vadd.f32 %v6999_v57, %v827_v51  ;;  %v1895_v33 = vpop.f32.mrf.mxu3  ;;  %v466_v51 = vmax.f32 %v354_v6, 0.0  ;;  %v357_v6 = vadd.f32 %v6999_v57, %v6086_v8  ;;  %v1893_v8 = vadd.f32 %v6999_v57, %v1892_v25 }
 0x1e4   :  { %v1470_v15 = vmax.f32 %v1356_v43, 0.0 }
 0x1e5   :  { %4964 = vmatmul.msk.f32.gmra.mxu1 %vm77_vm0, %v4907_v19  ;;  %v7166_v11 = vpop.f32.mrf.mxu0  ;;  %v940_v27 = vmax.f32 %v828_v9, 0.0 }
 0x1e6   :  { %v1527_v47 = vmax.f32 %v996_v2, %v1470_v15  ;;  %5078 = vmatmul.msk.f32.gmra.mxu2 %vm77_vm0, %v5021_v1  ;;  %v4908_v2 = vld [vmem:[%s9262_s0 + $0x338] sm:$0xff]  ;;  %v5022_v15 = vld [vmem:[%s9262_s0 + $0x500] sm:$0xff] }
 0x1e7   :  { %v997_v9 = vmax.f32 %v466_v51, %v940_v27  ;;  %v5139_v27 = vld [vmem:[%s9262_s0 + $0x6e0] sm:$0xff] }
 0x1e8   :  { %v7174_v49 = vmax.f32 %v1527_v47, %v2001_v31  ;;  %5306 = vmatmul.msk.f32.gmra.mxu0 %vm77_vm0, %v5249_v41  ;;  %5195 = vmatmul.msk.f32.gmra.mxu3 %vm77_vm0, %v5138_v63  ;;  %v2002_v47 = vmax.f32 %v1890_v59, 0.0 }
 0x1e9   :  { %v1358_v43 = vpop.f32.mrf.mxu2 }
 0x1ea   :  { %9305 = vst [vmem:[#allocation42_spill] sm:$0xff] %v7174_v49  ;;  %v1359_v19 = vadd.f32 %v6999_v57, %v1358_v43  ;;  %v830_v1 = vpop.f32.mrf.mxu1  ;;  %v5250_v49 = vld [vmem:[%s9262_s0 + $0x890] sm:$0xff] }
 0x1eb   :  { %v831_v17 = vadd.f32 %v6999_v57, %v830_v1  ;;  %v1898_v41 = vpop.f32.mrf.mxu3  ;;  %v467_v1 = vmax.f32 %v357_v6, 0.0  ;;  %v360_v6 = vadd.f32 %v6999_v57, %v6110_v16  ;;  %v1896_v16 = vadd.f32 %v6999_v57, %v1895_v33 }
 0x1ec   :  { %v1471_v31 = vmax.f32 %v1359_v19, 0.0 }
 0x1ed   :  { %4965 = vmatmul.msk.f32.gmra.mxu1 %vm77_vm0, %v4908_v2  ;;  %v7191_v43 = vpop.f32.mrf.mxu0  ;;  %v941_v59 = vmax.f32 %v831_v17, 0.0 }
 0x1ee   :  { %v1528_v63 = vmax.f32 %v997_v9, %v1471_v31  ;;  %5079 = vmatmul.msk.f32.gmra.mxu2 %vm77_vm0, %v5022_v15  ;;  %v4909_v9 = vld [vmem:[%s9262_s0 + $0x340] sm:$0xff]  ;;  %v5023_v31 = vld [vmem:[%s9262_s0 + $0x508] sm:$0xff] }
 0x1ef   :  { %v998_v17 = vmax.f32 %v467_v1, %v941_v59  ;;  %v5140_v59 = vld [vmem:[%s9262_s0 + $0x6e8] sm:$0xff] }
 0x1f0   :  { %v7199_v51 = vmax.f32 %v1528_v63, %v2002_v47  ;;  %5307 = vmatmul.msk.f32.gmra.mxu0 %vm77_vm0, %v5250_v49  ;;  %5196 = vmatmul.msk.f32.gmra.mxu3 %vm77_vm0, %v5139_v27  ;;  %v2003_v63 = vmax.f32 %v1893_v8, 0.0 }
 0x1f1   :  { %v1361_v19 = vpop.f32.mrf.mxu2 }
 0x1f2   :  { %9306 = vst [vmem:[#allocation43_spill] sm:$0xff] %v7199_v51  ;;  %v1362_v2 = vadd.f32 %v6999_v57, %v1361_v19  ;;  %v833_v15 = vpop.f32.mrf.mxu1  ;;  %v5251_v51 = vld [vmem:[%s9262_s0 + $0x898] sm:$0xff] }
 0x1f3   :  { %v834_v25 = vadd.f32 %v6999_v57, %v833_v15  ;;  %v1901_v49 = vpop.f32.mrf.mxu3  ;;  %v468_v15 = vmax.f32 %v360_v6, 0.0  ;;  %v363_v6 = vadd.f32 %v6999_v57, %v6134_v24  ;;  %v1899_v24 = vadd.f32 %v6999_v57, %v1898_v41 }
 0x1f4   :  { %v1472_v47 = vmax.f32 %v1362_v2, 0.0 }
 0x1f5   :  { %4966 = vmatmul.msk.f32.gmra.mxu1 %vm77_vm0, %v4909_v9  ;;  %v7216_v19 = vpop.f32.mrf.mxu0  ;;  %v942_v8 = vmax.f32 %v834_v25, 0.0 }
 0x1f6   :  { %v1529_v27 = vmax.f32 %v998_v17, %v1472_v47  ;;  %5080 = vmatmul.msk.f32.gmra.mxu2 %vm77_vm0, %v5023_v31  ;;  %v4910_v17 = vld [vmem:[%s9262_s0 + $0x348] sm:$0xff]  ;;  %v5024_v47 = vld [vmem:[%s9262_s0 + $0x510] sm:$0xff] }
 0x1f7   :  { %v999_v25 = vmax.f32 %v468_v15, %v942_v8  ;;  %v5141_v8 = vld [vmem:[%s9262_s0 + $0x6f0] sm:$0xff] }
 0x1f8   :  { %v7224_v1 = vmax.f32 %v1529_v27, %v2003_v63  ;;  %5308 = vmatmul.msk.f32.gmra.mxu0 %vm77_vm0, %v5251_v51  ;;  %5197 = vmatmul.msk.f32.gmra.mxu3 %vm77_vm0, %v5140_v59  ;;  %v2004_v27 = vmax.f32 %v1896_v16, 0.0 }
 0x1f9   :  { %v1364_v2 = vpop.f32.mrf.mxu2 }
 0x1fa   :  { %9307 = vst [vmem:[#allocation44_spill] sm:$0xff] %v7224_v1  ;;  %v1365_v9 = vadd.f32 %v6999_v57, %v1364_v2  ;;  %v836_v31 = vpop.f32.mrf.mxu1  ;;  %v5252_v1 = vld [vmem:[%s9262_s0 + $0x8a0] sm:$0xff] }
 0x1fb   :  { %v837_v33 = vadd.f32 %v6999_v57, %v836_v31  ;;  %v1904_v51 = vpop.f32.mrf.mxu3  ;;  %v469_v31 = vmax.f32 %v363_v6, 0.0  ;;  %v366_v6 = vadd.f32 %v6999_v57, %v6158_v32  ;;  %v1902_v32 = vadd.f32 %v6999_v57, %v1901_v49 }
 0x1fc   :  { %v1473_v63 = vmax.f32 %v1365_v9, 0.0 }
 0x1fd   :  { %4967 = vmatmul.msk.f32.gmra.mxu1 %vm77_vm0, %v4910_v17  ;;  %v7241_v2 = vpop.f32.mrf.mxu0  ;;  %v943_v16 = vmax.f32 %v837_v33, 0.0 }
 0x1fe   :  { %v1530_v59 = vmax.f32 %v999_v25, %v1473_v63  ;;  %5081 = vmatmul.msk.f32.gmra.mxu2 %vm77_vm0, %v5024_v47  ;;  %v4911_v25 = vld [vmem:[%s9262_s0 + $0x350] sm:$0xff]  ;;  %v5025_v63 = vld [vmem:[%s9262_s0 + $0x518] sm:$0xff] }
 0x1ff   :  { %v1000_v33 = vmax.f32 %v469_v31, %v943_v16  ;;  %v5142_v16 = vld [vmem:[%s9262_s0 + $0x6f8] sm:$0xff] }
 0x200   :  { %v7249_v15 = vmax.f32 %v1530_v59, %v2004_v27  ;;  %5309 = vmatmul.msk.f32.gmra.mxu0 %vm77_vm0, %v5252_v1  ;;  %5198 = vmatmul.msk.f32.gmra.mxu3 %vm77_vm0, %v5141_v8  ;;  %v2005_v59 = vmax.f32 %v1899_v24, 0.0 }
 0x201   :  { %v1367_v9 = vpop.f32.mrf.mxu2 }
 0x202   :  { %9308 = vst [vmem:[#allocation45_spill] sm:$0xff] %v7249_v15  ;;  %v1368_v17 = vadd.f32 %v6999_v57, %v1367_v9  ;;  %v839_v47 = vpop.f32.mrf.mxu1  ;;  %v5253_v15 = vld [vmem:[%s9262_s0 + $0x8a8] sm:$0xff] }
 0x203   :  { %v840_v41 = vadd.f32 %v6999_v57, %v839_v47  ;;  %v1907_v1 = vpop.f32.mrf.mxu3  ;;  %v470_v47 = vmax.f32 %v366_v6, 0.0  ;;  %v369_v6 = vadd.f32 %v6999_v57, %v6182_v40  ;;  %v1905_v40 = vadd.f32 %v6999_v57, %v1904_v51 }
 0x204   :  { %v1474_v27 = vmax.f32 %v1368_v17, 0.0 }
 0x205   :  { %4968 = vmatmul.msk.f32.gmra.mxu1 %vm77_vm0, %v4911_v25  ;;  %v7266_v9 = vpop.f32.mrf.mxu0  ;;  %v944_v24 = vmax.f32 %v840_v41, 0.0 }
 0x206   :  { %v1531_v8 = vmax.f32 %v1000_v33, %v1474_v27  ;;  %5082 = vmatmul.msk.f32.gmra.mxu2 %vm77_vm0, %v5025_v63  ;;  %v4912_v33 = vld [vmem:[%s9262_s0 + $0x358] sm:$0xff]  ;;  %v5026_v27 = vld [vmem:[%s9262_s0 + $0x520] sm:$0xff] }
 0x207   :  { %v1001_v41 = vmax.f32 %v470_v47, %v944_v24  ;;  %v5143_v24 = vld [vmem:[%s9262_s0 + $0x700] sm:$0xff] }
 0x208   :  { %v7274_v31 = vmax.f32 %v1531_v8, %v2005_v59  ;;  %5310 = vmatmul.msk.f32.gmra.mxu0 %vm77_vm0, %v5253_v15  ;;  %5199 = vmatmul.msk.f32.gmra.mxu3 %vm77_vm0, %v5142_v16  ;;  %v2006_v8 = vmax.f32 %v1902_v32, 0.0 }
 0x209   :  { %v1370_v17 = vpop.f32.mrf.mxu2 }
 0x20a   :  { %9309 = vst [vmem:[#allocation46_spill] sm:$0xff] %v7274_v31  ;;  %v1371_v25 = vadd.f32 %v6999_v57, %v1370_v17  ;;  %v842_v63 = vpop.f32.mrf.mxu1  ;;  %v5254_v31 = vld [vmem:[%s9262_s0 + $0x8b0] sm:$0xff] }
 0x20b   :  { %v843_v49 = vadd.f32 %v6999_v57, %v842_v63  ;;  %v1910_v15 = vpop.f32.mrf.mxu3  ;;  %v471_v63 = vmax.f32 %v369_v6, 0.0  ;;  %v372_v6 = vadd.f32 %v6999_v57, %v6206_v48  ;;  %v1908_v48 = vadd.f32 %v6999_v57, %v1907_v1 }
 0x20c   :  { %v1475_v59 = vmax.f32 %v1371_v25, 0.0 }
 0x20d   :  { %4969 = vmatmul.msk.f32.gmra.mxu1 %vm77_vm0, %v4912_v33  ;;  %v7291_v17 = vpop.f32.mrf.mxu0  ;;  %v945_v32 = vmax.f32 %v843_v49, 0.0 }
 0x20e   :  { %v1532_v16 = vmax.f32 %v1001_v41, %v1475_v59  ;;  %5083 = vmatmul.msk.f32.gmra.mxu2 %vm77_vm0, %v5026_v27  ;;  %v4913_v41 = vld [vmem:[%s9262_s0 + $0x360] sm:$0xff]  ;;  %v5027_v59 = vld [vmem:[%s9262_s0 + $0x528] sm:$0xff] }
 0x20f   :  { %v1002_v49 = vmax.f32 %v471_v63, %v945_v32  ;;  %v5144_v32 = vld [vmem:[%s9262_s0 + $0x708] sm:$0xff] }
 0x210   :  { %v7299_v47 = vmax.f32 %v1532_v16, %v2006_v8  ;;  %5311 = vmatmul.msk.f32.gmra.mxu0 %vm77_vm0, %v5254_v31  ;;  %5200 = vmatmul.msk.f32.gmra.mxu3 %vm77_vm0, %v5143_v24  ;;  %v2007_v16 = vmax.f32 %v1905_v40, 0.0 }
 0x211   :  { %v1373_v25 = vpop.f32.mrf.mxu2 }
 0x212   :  { %9310 = vst [vmem:[#allocation47_spill] sm:$0xff] %v7299_v47  ;;  %v1374_v33 = vadd.f32 %v6999_v57, %v1373_v25  ;;  %v845_v27 = vpop.f32.mrf.mxu1  ;;  %v5255_v47 = vld [vmem:[%s9262_s0 + $0x8b8] sm:$0xff] }
 0x213   :  { %v846_v51 = vadd.f32 %v6999_v57, %v845_v27  ;;  %v1913_v31 = vpop.f32.mrf.mxu3  ;;  %v472_v27 = vmax.f32 %v372_v6, 0.0  ;;  %v375_v6 = vadd.f32 %v6999_v57, %v6230_v56  ;;  %v1911_v56 = vadd.f32 %v6999_v57, %v1910_v15 }
 0x214   :  { %v1476_v8 = vmax.f32 %v1374_v33, 0.0 }
 0x215   :  { %4970 = vmatmul.msk.f32.gmra.mxu1 %vm77_vm0, %v4913_v41  ;;  %v7316_v25 = vpop.f32.mrf.mxu0  ;;  %v946_v40 = vmax.f32 %v846_v51, 0.0 }
 0x216   :  { %v1533_v24 = vmax.f32 %v1002_v49, %v1476_v8  ;;  %5084 = vmatmul.msk.f32.gmra.mxu2 %vm77_vm0, %v5027_v59  ;;  %v4914_v49 = vld [vmem:[%s9262_s0 + $0x368] sm:$0xff]  ;;  %v5028_v8 = vld [vmem:[%s9262_s0 + $0x530] sm:$0xff] }
 0x217   :  { %v1003_v51 = vmax.f32 %v472_v27, %v946_v40  ;;  %v5145_v40 = vld [vmem:[%s9262_s0 + $0x710] sm:$0xff] }
 0x218   :  { %v7324_v63 = vmax.f32 %v1533_v24, %v2007_v16  ;;  %5312 = vmatmul.msk.f32.gmra.mxu0 %vm77_vm0, %v5255_v47  ;;  %5201 = vmatmul.msk.f32.gmra.mxu3 %vm77_vm0, %v5144_v32  ;;  %v2008_v24 = vmax.f32 %v1908_v48, 0.0 }
 0x219   :  { %v1376_v33 = vpop.f32.mrf.mxu2 }
 0x21a   :  { %9311 = vst [vmem:[#allocation48_spill] sm:$0xff] %v7324_v63  ;;  %v1377_v41 = vadd.f32 %v6999_v57, %v1376_v33  ;;  %v848_v59 = vpop.f32.mrf.mxu1  ;;  %v5256_v63 = vld [vmem:[%s9262_s0 + $0x8c0] sm:$0xff] }
 0x21b   :  { %v849_v1 = vadd.f32 %v6999_v57, %v848_v59  ;;  %v1916_v47 = vpop.f32.mrf.mxu3  ;;  %v473_v59 = vmax.f32 %v375_v6, 0.0  ;;  %v378_v6 = vadd.f32 %v6999_v57, %v6254_v0  ;;  %v1914_v0 = vadd.f32 %v6999_v57, %v1913_v31 }
 0x21c   :  { %v1477_v16 = vmax.f32 %v1377_v41, 0.0 }
 0x21d   :  { %4971 = vmatmul.msk.f32.gmra.mxu1 %vm77_vm0, %v4914_v49  ;;  %v7341_v33 = vpop.f32.mrf.mxu0  ;;  %v947_v48 = vmax.f32 %v849_v1, 0.0 }
 0x21e   :  { %v1534_v32 = vmax.f32 %v1003_v51, %v1477_v16  ;;  %5085 = vmatmul.msk.f32.gmra.mxu2 %vm77_vm0, %v5028_v8  ;;  %v4915_v51 = vld [vmem:[%s9262_s0 + $0x370] sm:$0xff]  ;;  %v5029_v16 = vld [vmem:[%s9262_s0 + $0x538] sm:$0xff] }
 0x21f   :  { %v1004_v1 = vmax.f32 %v473_v59, %v947_v48  ;;  %v5146_v48 = vld [vmem:[%s9262_s0 + $0x718] sm:$0x3] }
 0x220   :  { %v7349_v27 = vmax.f32 %v1534_v32, %v2008_v24  ;;  %5313 = vmatmul.msk.f32.gmra.mxu0 %vm77_vm0, %v5256_v63  ;;  %5202 = vmatmul.msk.f32.gmra.mxu3 %vm77_vm0, %v5145_v40  ;;  %v2009_v32 = vmax.f32 %v1911_v56, 0.0 }
 0x221   :  { %v1379_v41 = vpop.f32.mrf.mxu2 }
 0x222   :  { %9312 = vst [vmem:[#allocation49_spill] sm:$0xff] %v7349_v27  ;;  %v1380_v49 = vadd.f32 %v6999_v57, %v1379_v41  ;;  %v851_v8 = vpop.f32.mrf.mxu1  ;;  %v5257_v27 = vld [vmem:[%s9262_s0 + $0x8c8] sm:$0xff] }
 0x223   :  { %v852_v15 = vadd.f32 %v6999_v57, %v851_v8  ;;  %v1919_v63 = vpop.f32.mrf.mxu3  ;;  %v474_v8 = vmax.f32 %v378_v6, 0.0  ;;  %v381_v6 = vadd.f32 %v6999_v57, %v6278_v14  ;;  %v1917_v14 = vadd.f32 %v6999_v57, %v1916_v47 }
 0x224   :  { %v1478_v24 = vmax.f32 %v1380_v49, 0.0 }
 0x225   :  { %4972 = vmatmul.msk.f32.gmra.mxu1 %vm77_vm0, %v4915_v51  ;;  %v7366_v41 = vpop.f32.mrf.mxu0  ;;  %v948_v56 = vmax.f32 %v852_v15, 0.0 }
 0x226   :  { %v1535_v40 = vmax.f32 %v1004_v1, %v1478_v24  ;;  %5086 = vmatmul.msk.f32.gmra.mxu2 %vm77_vm0, %v5029_v16  ;;  %v4916_v1 = vld [vmem:[%s9262_s0 + $0x378] sm:$0xff]  ;;  %v5030_v24 = vld [vmem:[%s9262_s0 + $0x540] sm:$0xff] }
 0x227   :  { %v1005_v15 = vmax.f32 %v474_v8, %v948_v56  ;;  %v5546_v56 = vld [vmem:[%s9262_s0 + $0xc78] sm:$0xff] }
 0x228   :  { %v7374_v59 = vmax.f32 %v1535_v40, %v2009_v32  ;;  %5314 = vmatmul.msk.f32.gmra.mxu0 %vm77_vm0, %v5257_v27  ;;  %5203 = vmatmul.msk.f32.gmra.mxu3 %vm77_vm0, %v5146_v48  ;;  %v2010_v40 = vmax.f32 %v1914_v0, 0.0 }
 0x229   :  { %v1382_v49 = vpop.f32.mrf.mxu2 }
 0x22a   :  { %9313 = vst [vmem:[#allocation50_spill] sm:$0xff] %v7374_v59  ;;  %v1383_v51 = vadd.f32 %v6999_v57, %v1382_v49  ;;  %v854_v16 = vpop.f32.mrf.mxu1  ;;  %v5258_v59 = vld [vmem:[%s9262_s0 + $0x8d0] sm:$0xff] }
 0x22b   :  { %v855_v31 = vadd.f32 %v6999_v57, %v854_v16  ;;  %v1922_v27 = vpop.f32.mrf.mxu3  ;;  %v475_v16 = vmax.f32 %v381_v6, 0.0  ;;  %v384_v6 = vadd.f32 %v6999_v57, %v6302_v30  ;;  %v1920_v30 = vadd.f32 %v6999_v57, %v1919_v63 }
 0x22c   :  { %v1479_v32 = vmax.f32 %v1383_v51, 0.0 }
 0x22d   :  { %4973 = vmatmul.msk.f32.gmra.mxu1 %vm77_vm0, %v4916_v1  ;;  %v7391_v49 = vpop.f32.mrf.mxu0  ;;  %v949_v0 = vmax.f32 %v855_v31, 0.0 }
 0x22e   :  { %v1536_v48 = vmax.f32 %v1005_v15, %v1479_v32  ;;  %5087 = vmatmul.msk.f32.gmra.mxu2 %vm77_vm0, %v5030_v24  ;;  %v4917_v15 = vld [vmem:[%s9262_s0 + $0x380] sm:$0xff]  ;;  %v5031_v32 = vld [vmem:[%s9262_s0 + $0x548] sm:$0xff] }
 0x22f   :  { %v1006_v31 = vmax.f32 %v475_v16, %v949_v0  ;;  %v5547_v0 = vld [vmem:[%s9262_s0 + $0xc80] sm:$0xff] }
 0x230   :  { %v7399_v8 = vmax.f32 %v1536_v48, %v2010_v40  ;;  %5315 = vmatmul.msk.f32.gmra.mxu0 %vm77_vm0, %v5258_v59  ;;  %5603 = vmatmul.msk.f32.vlgmr.msra.gmra.mxu3 %vm77_vm0, %v5546_v56  ;;  %v2011_v48 = vmax.f32 %v1917_v14, 0.0 }
 0x231   :  { %v1385_v51 = vpop.f32.mrf.mxu2 }
 0x232   :  { %9314 = vst [vmem:[#allocation51_spill] sm:$0xff] %v7399_v8  ;;  %v1386_v1 = vadd.f32 %v6999_v57, %v1385_v51  ;;  %v857_v24 = vpop.f32.mrf.mxu1  ;;  %v5259_v8 = vld [vmem:[%s9262_s0 + $0x8d8] sm:$0xff] }
 0x233   :  { %v858_v47 = vadd.f32 %v6999_v57, %v857_v24  ;;  %v1925_v59 = vpop.f32.mrf.mxu3  ;;  %v476_v24 = vmax.f32 %v384_v6, 0.0  ;;  %v387_v6 = vadd.f32 %v6999_v57, %v6326_v46  ;;  %v1923_v46 = vadd.f32 %v6999_v57, %v1922_v27 }
 0x234   :  { %v1480_v40 = vmax.f32 %v1386_v1, 0.0 }
 0x235   :  { %4974 = vmatmul.msk.f32.gmra.mxu1 %vm77_vm0, %v4917_v15  ;;  %v7416_v51 = vpop.f32.mrf.mxu0  ;;  %v950_v14 = vmax.f32 %v858_v47, 0.0 }
 0x236   :  { %v1537_v56 = vmax.f32 %v1006_v31, %v1480_v40  ;;  %5088 = vmatmul.msk.f32.gmra.mxu2 %vm77_vm0, %v5031_v32  ;;  %v4918_v31 = vld [vmem:[%s9262_s0 + $0x388] sm:$0x3]  ;;  %v5032_v40 = vld [vmem:[%s9262_s0 + $0x550] sm:$0x3] }
 0x237   :  { %v1007_v47 = vmax.f32 %v476_v24, %v950_v14  ;;  %v5548_v14 = vld [vmem:[%s9262_s0 + $0xc88] sm:$0xff] }
 0x238   :  { %v7424_v16 = vmax.f32 %v1537_v56, %v2011_v48  ;;  %5316 = vmatmul.msk.f32.gmra.mxu0 %vm77_vm0, %v5259_v8  ;;  %5604 = vmatmul.msk.f32.gmra.mxu3 %vm77_vm0, %v5547_v0  ;;  %v2012_v56 = vmax.f32 %v1920_v30, 0.0 }
 0x239   :  { %v1388_v1 = vpop.f32.mrf.mxu2 }
 0x23a   :  { %9315 = vst [vmem:[#allocation52_spill] sm:$0xff] %v7424_v16  ;;  %v1389_v15 = vadd.f32 %v6999_v57, %v1388_v1  ;;  %v860_v32 = vpop.f32.mrf.mxu1  ;;  %v5260_v16 = vld [vmem:[%s9262_s0 + $0x8e0] sm:$0x3] }
 0x23b   :  { %v861_v63 = vadd.f32 %v6999_v57, %v860_v32  ;;  %v1928_v8 = vpop.f32.mrf.mxu3  ;;  %v477_v32 = vmax.f32 %v387_v6, 0.0  ;;  %v390_v6 = vadd.f32 %v6999_v57, %v6350_v62  ;;  %v1926_v62 = vadd.f32 %v6999_v57, %v1925_v59 }
 0x23c   :  { %v1481_v48 = vmax.f32 %v1389_v15, 0.0 }
 0x23d   :  { %4975 = vmatmul.msk.f32.gmra.mxu1 %vm77_vm0, %v4918_v31  ;;  %v7441_v1 = vpop.f32.mrf.mxu0  ;;  %v951_v30 = vmax.f32 %v861_v63, 0.0 }
 0x23e   :  { %v1538_v0 = vmax.f32 %v1007_v47, %v1481_v48  ;;  %5089 = vmatmul.msk.f32.gmra.mxu2 %vm77_vm0, %v5032_v40  ;;  %v5318_v47 = vld [vmem:[%s9262_s0 + $0x8e8] sm:$0xff]  ;;  %v5432_v48 = vld [vmem:[%s9262_s0 + $0xab0] sm:$0xff] }
 0x23f   :  { %v1008_v63 = vmax.f32 %v477_v32, %v951_v30  ;;  %v5549_v30 = vld [vmem:[%s9262_s0 + $0xc90] sm:$0xff] }
 0x240   :  { %v7449_v24 = vmax.f32 %v1538_v0, %v2012_v56  ;;  %5317 = vmatmul.msk.f32.gmra.mxu0 %vm77_vm0, %v5260_v16  ;;  %5605 = vmatmul.msk.f32.gmra.mxu3 %vm77_vm0, %v5548_v14  ;;  %v2013_v0 = vmax.f32 %v1923_v46, 0.0 }
 0x241   :  { %v1391_v15 = vpop.f32.mrf.mxu2 }
 0x242   :  { %9316 = vst [vmem:[#allocation53_spill] sm:$0xff] %v7449_v24  ;;  %v1392_v31 = vadd.f32 %v6999_v57, %v1391_v15  ;;  %v863_v40 = vpop.f32.mrf.mxu1  ;;  %v5660_v24 = vld [vmem:[%s9262_s0 + $0xe40] sm:$0xff] }
 0x243   :  { %v864_v27 = vadd.f32 %v6999_v57, %v863_v40  ;;  %v1931_v16 = vpop.f32.mrf.mxu3  ;;  %v478_v40 = vmax.f32 %v390_v6, 0.0  ;;  %v393_v6 = vadd.f32 %v6999_v57, %v6374_v26  ;;  %v1929_v26 = vadd.f32 %v6999_v57, %v1928_v8 }
 0x244   :  { %v1482_v56 = vmax.f32 %v1392_v31, 0.0 }
 0x245   :  { %5375 = vmatmul.msk.f32.vlgmr.msra.gmra.mxu1 %vm77_vm0, %v5318_v47  ;;  %v7466_v15 = vpop.f32.mrf.mxu0  ;;  %v952_v46 = vmax.f32 %v864_v27, 0.0 }
 0x246   :  { %v1539_v14 = vmax.f32 %v1008_v63, %v1482_v56  ;;  %5489 = vmatmul.msk.f32.vlgmr.msra.gmra.mxu2 %vm77_vm0, %v5432_v48  ;;  %v5319_v63 = vld [vmem:[%s9262_s0 + $0x8f0] sm:$0xff]  ;;  %v5433_v56 = vld [vmem:[%s9262_s0 + $0xab8] sm:$0xff] }
 0x247   :  { %v1009_v27 = vmax.f32 %v478_v40, %v952_v46  ;;  %v5550_v46 = vld [vmem:[%s9262_s0 + $0xc98] sm:$0xff] }
 0x248   :  { %v7474_v32 = vmax.f32 %v1539_v14, %v2013_v0  ;;  %5717 = vmatmul.msk.f32.vlgmr.msra.gmra.mxu0 %vm77_vm0, %v5660_v24  ;;  %5606 = vmatmul.msk.f32.gmra.mxu3 %vm77_vm0, %v5549_v30  ;;  %v2014_v14 = vmax.f32 %v1926_v62, 0.0 }
 0x249   :  { %v1394_v31 = vpop.f32.mrf.mxu2 }
 0x24a   :  { %9317 = vst [vmem:[#allocation54_spill] sm:$0xff] %v7474_v32  ;;  %v1395_v47 = vadd.f32 %v6999_v57, %v1394_v31  ;;  %v866_v48 = vpop.f32.mrf.mxu1  ;;  %v5661_v32 = vld [vmem:[%s9262_s0 + $0xe48] sm:$0xff] }
 0x24b   :  { %v867_v59 = vadd.f32 %v6999_v57, %v866_v48  ;;  %v1934_v24 = vpop.f32.mrf.mxu3  ;;  %v479_v48 = vmax.f32 %v393_v6, 0.0  ;;  %v396_v6 = vadd.f32 %v6999_v57, %v6396_v58  ;;  %v1932_v58 = vadd.f32 %v6999_v57, %v1931_v16 }
 0x24c   :  { %v1483_v0 = vmax.f32 %v1395_v47, 0.0 }
 0x24d   :  { %5376 = vmatmul.msk.f32.gmra.mxu1 %vm77_vm0, %v5319_v63  ;;  %v7491_v31 = vpop.f32.mrf.mxu0  ;;  %v953_v62 = vmax.f32 %v867_v59, 0.0 }
 0x24e   :  { %v1540_v30 = vmax.f32 %v1009_v27, %v1483_v0  ;;  %5490 = vmatmul.msk.f32.gmra.mxu2 %vm77_vm0, %v5433_v56  ;;  %v5320_v27 = vld [vmem:[%s9262_s0 + $0x8f8] sm:$0xff]  ;;  %v5434_v0 = vld [vmem:[%s9262_s0 + $0xac0] sm:$0xff] }
 0x24f   :  { %v1010_v59 = vmax.f32 %v479_v48, %v953_v62  ;;  %v5551_v62 = vld [vmem:[%s9262_s0 + $0xca0] sm:$0xff] }
 0x250   :  { %v7499_v40 = vmax.f32 %v1540_v30, %v2014_v14  ;;  %5718 = vmatmul.msk.f32.gmra.mxu0 %vm77_vm0, %v5661_v32  ;;  %5607 = vmatmul.msk.f32.gmra.mxu3 %vm77_vm0, %v5550_v46  ;;  %v2015_v30 = vmax.f32 %v1929_v26, 0.0 }
 0x251   :  { %v1397_v47 = vpop.f32.mrf.mxu2 }
 0x252   :  { %9318 = vst [vmem:[#allocation55_spill] sm:$0xff] %v7499_v40  ;;  %v1398_v63 = vadd.f32 %v6999_v57, %v1397_v47  ;;  %v869_v56 = vpop.f32.mrf.mxu1  ;;  %v5662_v40 = vld [vmem:[%s9262_s0 + $0xe50] sm:$0xff] }
 0x253   :  { %v870_v8 = vadd.f32 %v6999_v57, %v869_v56  ;;  %v1937_v32 = vpop.f32.mrf.mxu3  ;;  %v480_v56 = vmax.f32 %v396_v6, 0.0  ;;  %v399_v6 = vadd.f32 %v6999_v57, %v6418_v50  ;;  %v1935_v50 = vadd.f32 %v6999_v57, %v1934_v24  ;;  %v7564_v24 = vld [vmem:[%s9263_s2] ss:$0 sm:$0xff] }
 0x254   :  { %v1484_v14 = vmax.f32 %v1398_v63, 0.0 }
 0x255   :  { %5377 = vmatmul.msk.f32.gmra.mxu1 %vm77_vm0, %v5320_v27  ;;  %v7516_v47 = vpop.f32.mrf.mxu0  ;;  %v954_v26 = vmax.f32 %v870_v8, 0.0 }
 0x256   :  { %v1541_v46 = vmax.f32 %v1010_v59, %v1484_v14  ;;  %5491 = vmatmul.msk.f32.gmra.mxu2 %vm77_vm0, %v5434_v0  ;;  %v5321_v59 = vld [vmem:[%s9262_s0 + $0x900] sm:$0xff]  ;;  %v5435_v14 = vld [vmem:[%s9262_s0 + $0xac8] sm:$0xff] }
 0x257   :  { %v1011_v8 = vmax.f32 %v480_v56, %v954_v26  ;;  %v5552_v26 = vld [vmem:[%s9262_s0 + $0xca8] sm:$0xff] }
 0x258   :  { %v7524_v48 = vmax.f32 %v1541_v46, %v2015_v30  ;;  %5719 = vmatmul.msk.f32.gmra.mxu0 %vm77_vm0, %v5662_v40  ;;  %5608 = vmatmul.msk.f32.gmra.mxu3 %vm77_vm0, %v5551_v62  ;;  %v2016_v46 = vmax.f32 %v1932_v58, 0.0 }
 0x259   :  { %v1400_v63 = vpop.f32.mrf.mxu2 }
 0x25a   :  { %9319 = vst [vmem:[#allocation56_spill] sm:$0xff] %v7524_v48  ;;  %v1401_v27 = vadd.f32 %v6999_v57, %v1400_v63  ;;  %v872_v0 = vpop.f32.mrf.mxu1  ;;  %v5663_v48 = vld [vmem:[%s9262_s0 + $0xe58] sm:$0xff] }
 0x25b   :  { %v873_v16 = vadd.f32 %v6999_v57, %v872_v0  ;;  %v1940_v40 = vpop.f32.mrf.mxu3  ;;  %v481_v0 = vmax.f32 %v399_v6, 0.0  ;;  %v2017_v6 = vmax.f32 %v1935_v50, 0.0 }
 0x25c   :  { %v1485_v30 = vmax.f32 %v1401_v27, 0.0 }
 0x25d   :  { %5378 = vmatmul.msk.f32.gmra.mxu1 %vm77_vm0, %v5321_v59  ;;  %v7541_v63 = vpop.f32.mrf.mxu0  ;;  %v955_v58 = vmax.f32 %v873_v16, 0.0 }
 0x25e   :  { %v1542_v62 = vmax.f32 %v1011_v8, %v1485_v30  ;;  %5492 = vmatmul.msk.f32.gmra.mxu2 %vm77_vm0, %v5435_v14  ;;  %9320 = vst [vmem:[#allocation57_spill] sm:$0xff] %v7541_v63  ;;  %v5322_v8 = vld [vmem:[%s9262_s0 + $0x908] sm:$0xff]  ;;  %v5436_v30 = vld [vmem:[%s9262_s0 + $0xad0] sm:$0xff] }
 0x25f   :  { %v1012_v16 = vmax.f32 %v481_v0, %v955_v58  ;;  %v5664_v58 = vld [vmem:[%s9262_s0 + $0xe60] sm:$0xff]  ;;  %v5553_v0 = vld [vmem:[%s9262_s0 + $0xcb0] sm:$0xff] }
 0x260   :  { %v7549_v56 = vmax.f32 %v1542_v62, %v2016_v46  ;;  %5720 = vmatmul.msk.f32.gmra.mxu0 %vm77_vm0, %v5663_v48  ;;  %5609 = vmatmul.msk.f32.gmra.mxu3 %vm77_vm0, %v5552_v26  ;;  %v402_v62 = vadd.f32 %v7564_v24, %v6098_v12  ;;  %v1938_v12 = vadd.f32 %v7564_v24, %v1937_v32 }
 0x261   :  { %v1403_v27 = vpop.f32.mrf.mxu2 }
 0x262   :  { %9321 = vst [vmem:[#allocation58_spill] sm:$0xff] %v7549_v56  ;;  %v1404_v59 = vadd.f32 %v6999_v57, %v1403_v27  ;;  %v875_v14 = vpop.f32.mrf.mxu1  ;;  %v5665_v56 = vld [vmem:[%s9262_s0 + $0xe68] sm:$0xff] }
 0x263   :  { %v876_v48 = vadd.f32 %v7564_v24, %v875_v14  ;;  %v1943_v57 = vpop.f32.mrf.mxu3 }
 0x264   :  { %v1486_v46 = vmax.f32 %v1404_v59, 0.0 }
 0x265   :  { %5379 = vmatmul.msk.f32.gmra.mxu1 %vm77_vm0, %v5322_v8  ;;  %v7571_v27 = vpop.f32.mrf.mxu0  ;;  %v956_v50 = vmax.f32 %v876_v48, 0.0  ;;  %v482_v8 = vmax.f32 %v402_v62, 0.0  ;;  %v5437_v48 = vld [vmem:[%s9262_s0 + $0xad8] sm:$0xff] }
 0x266   :  { %v1543_v26 = vmax.f32 %v1012_v16, %v1486_v46  ;;  %5493 = vmatmul.msk.f32.gmra.mxu2 %vm77_vm0, %v5436_v30  ;;  %9322 = vst [vmem:[#allocation59_spill] sm:$0xff] %v7571_v27  ;;  %v5323_v46 = vld [vmem:[%s9262_s0 + $0x910] sm:$0xff]  ;;  %v9324_v27 = vld [vmem:[#allocation2_spill] sm:$0xff] }
 0x267   :  { %v405_v62 = vadd.f32 %v7564_v24, %v9324_v27  ;;  %v1941_v27 = vadd.f32 %v7564_v24, %v1940_v40 }
 0x268   :  { %v7579_v59 = vmax.f32 %v1543_v26, %v2017_v6  ;;  %5721 = vmatmul.msk.f32.gmra.mxu0 %vm77_vm0, %v5664_v58  ;;  %5610 = vmatmul.msk.f32.gmra.mxu3 %vm77_vm0, %v5553_v0  ;;  %v1013_v6 = vmax.f32 %v482_v8, %v956_v50  ;;  %v5554_v50 = vld [vmem:[%s9262_s0 + $0xcb8] sm:$0xff] }
 0x269   :  { %v1406_v14 = vpop.f32.mrf.mxu2 }
 0x26a   :  { %9323 = vst [vmem:[#allocation60_spill] sm:$0xff] %v7579_v59  ;;  %v1407_v30 = vadd.f32 %v7564_v24, %v1406_v14  ;;  %v878_v16 = vpop.f32.mrf.mxu1  ;;  %v2018_v59 = vmax.f32 %v1938_v12, 0.0 }
 0x26b   :  { %v879_v32 = vadd.f32 %v7564_v24, %v878_v16  ;;  %v1946_v58 = vpop.f32.mrf.mxu3  ;;  %v483_v16 = vmax.f32 %v405_v62, 0.0 }
 0x26c   :  { %v1487_v26 = vmax.f32 %v1407_v30, 0.0 }
 0x26d   :  { %5380 = vmatmul.msk.f32.gmra.mxu1 %vm77_vm0, %v5323_v46  ;;  %v7596_v14 = vpop.f32.mrf.mxu0  ;;  %v957_v12 = vmax.f32 %v879_v32, 0.0 }
 0x26e   :  { %v1544_v0 = vmax.f32 %v1013_v6, %v1487_v26  ;;  %5494 = vmatmul.msk.f32.gmra.mxu2 %vm77_vm0, %v5437_v48  ;;  %9325 = vst [vmem:[#allocation2_spill] sm:$0xff] %v7596_v14  ;;  %v5324_v6 = vld [vmem:[%s9262_s0 + $0x918] sm:$0xff]  ;;  %v5666_v14 = vld [vmem:[%s9262_s0 + $0xe70] sm:$0xff] }
 0x26f   :  { %v1014_v26 = vmax.f32 %v483_v16, %v957_v12  ;;  %v5555_v12 = vld [vmem:[%s9262_s0 + $0xcc0] sm:$0xff] }
 0x270   :  { %v7604_v8 = vmax.f32 %v1544_v0, %v2018_v59  ;;  %5722 = vmatmul.msk.f32.gmra.mxu0 %vm77_vm0, %v5665_v56  ;;  %5611 = vmatmul.msk.f32.gmra.mxu3 %vm77_vm0, %v5554_v50  ;;  %v5438_v59 = vld [vmem:[%s9262_s0 + $0xae0] sm:$0xff]  ;;  %v2019_v0 = vmax.f32 %v1941_v27, 0.0 }
 0x271   :  { %v1409_v30 = vpop.f32.mrf.mxu2 }
 0x272   :  { %9326 = vst [vmem:[#allocation61_spill] sm:$0xff] %v7604_v8  ;;  %v1410_v46 = vadd.f32 %v7564_v24, %v1409_v30  ;;  %v881_v48 = vpop.f32.mrf.mxu1  ;;  %v9327_v8 = vld [vmem:[#allocation3_spill] sm:$0xff] }
 0x273   :  { %v882_v40 = vadd.f32 %v7564_v24, %v881_v48  ;;  %v1949_v56 = vpop.f32.mrf.mxu3  ;;  %v408_v62 = vadd.f32 %v7564_v24, %v9327_v8  ;;  %v1944_v8 = vadd.f32 %v7564_v24, %v1943_v57 }
 0x274   :  { %v1488_v32 = vmax.f32 %v1410_v46, 0.0 }
 0x275   :  { %5381 = vmatmul.msk.f32.gmra.mxu1 %vm77_vm0, %v5324_v6  ;;  %v7621_v30 = vpop.f32.mrf.mxu0  ;;  %v958_v27 = vmax.f32 %v882_v40, 0.0  ;;  %v484_v48 = vmax.f32 %v408_v62, 0.0 }
 0x276   :  { %v1545_v50 = vmax.f32 %v1014_v26, %v1488_v32  ;;  %5495 = vmatmul.msk.f32.gmra.mxu2 %vm77_vm0, %v5438_v59  ;;  %9328 = vst [vmem:[#allocation3_spill] sm:$0xff] %v7621_v30  ;;  %v5325_v26 = vld [vmem:[%s9262_s0 + $0x920] sm:$0xff]  ;;  %v5439_v32 = vld [vmem:[%s9262_s0 + $0xae8] sm:$0xff]  ;;  %v5667_v30 = vld [vmem:[%s9262_s0 + $0xe78] sm:$0xff] }
 0x277   :  { %v1015_v40 = vmax.f32 %v484_v48, %v958_v27  ;;  %v5556_v27 = vld [vmem:[%s9262_s0 + $0xcc8] sm:$0xff] }
 0x278   :  { %v7629_v16 = vmax.f32 %v1545_v50, %v2019_v0  ;;  %5723 = vmatmul.msk.f32.gmra.mxu0 %vm77_vm0, %v5666_v14  ;;  %5612 = vmatmul.msk.f32.gmra.mxu3 %vm77_vm0, %v5555_v12  ;;  %v2020_v50 = vmax.f32 %v1944_v8, 0.0 }
 0x279   :  { %v1412_v46 = vpop.f32.mrf.mxu2 }
 0x27a   :  { %9329 = vst [vmem:[#allocation62_spill] sm:$0xff] %v7629_v16  ;;  %v1413_v6 = vadd.f32 %v7564_v24, %v1412_v46  ;;  %v884_v59 = vpop.f32.mrf.mxu1  ;;  %v9330_v16 = vld [vmem:[#allocation4_spill] sm:$0xff] }
 0x27b   :  { %v885_v57 = vadd.f32 %v7564_v24, %v884_v59  ;;  %v1952_v14 = vpop.f32.mrf.mxu3  ;;  %v411_v62 = vadd.f32 %v7564_v24, %v9330_v16  ;;  %v1947_v16 = vadd.f32 %v7564_v24, %v1946_v58 }
 0x27c   :  { %v1489_v0 = vmax.f32 %v1413_v6, 0.0 }
 0x27d   :  { %5382 = vmatmul.msk.f32.gmra.mxu1 %vm77_vm0, %v5325_v26  ;;  %v7646_v46 = vpop.f32.mrf.mxu0  ;;  %v959_v8 = vmax.f32 %v885_v57, 0.0  ;;  %v485_v59 = vmax.f32 %v411_v62, 0.0 }
 0x27e   :  { %v1546_v12 = vmax.f32 %v1015_v40, %v1489_v0  ;;  %5496 = vmatmul.msk.f32.gmra.mxu2 %vm77_vm0, %v5439_v32  ;;  %9331 = vst [vmem:[#allocation4_spill] sm:$0xff] %v7646_v46  ;;  %v5326_v40 = vld [vmem:[%s9262_s0 + $0x928] sm:$0xff]  ;;  %v5440_v0 = vld [vmem:[%s9262_s0 + $0xaf0] sm:$0xff]  ;;  %v5668_v46 = vld [vmem:[%s9262_s0 + $0xe80] sm:$0xff] }
 0x27f   :  { %v1016_v57 = vmax.f32 %v485_v59, %v959_v8  ;;  %v5557_v8 = vld [vmem:[%s9262_s0 + $0xcd0] sm:$0xff] }
 0x280   :  { %v7654_v48 = vmax.f32 %v1546_v12, %v2020_v50  ;;  %5724 = vmatmul.msk.f32.gmra.mxu0 %vm77_vm0, %v5667_v30  ;;  %5613 = vmatmul.msk.f32.gmra.mxu3 %vm77_vm0, %v5556_v27  ;;  %v2021_v12 = vmax.f32 %v1947_v16, 0.0 }
 0x281   :  { %v1415_v6 = vpop.f32.mrf.mxu2 }
 0x282   :  { %9332 = vst [vmem:[#allocation63_spill] sm:$0xff] %v7654_v48  ;;  %v1416_v26 = vadd.f32 %v7564_v24, %v1415_v6  ;;  %v887_v32 = vpop.f32.mrf.mxu1  ;;  %v9333_v48 = vld [vmem:[#allocation5_spill] sm:$0xff] }
 0x283   :  { %v888_v58 = vadd.f32 %v7564_v24, %v887_v32  ;;  %v1955_v30 = vpop.f32.mrf.mxu3  ;;  %v414_v62 = vadd.f32 %v7564_v24, %v9333_v48  ;;  %v1950_v48 = vadd.f32 %v7564_v24, %v1949_v56 }
 0x284   :  { %v1490_v50 = vmax.f32 %v1416_v26, 0.0 }
 0x285   :  { %5383 = vmatmul.msk.f32.gmra.mxu1 %vm77_vm0, %v5326_v40  ;;  %v7671_v6 = vpop.f32.mrf.mxu0  ;;  %v960_v16 = vmax.f32 %v888_v58, 0.0  ;;  %v486_v32 = vmax.f32 %v414_v62, 0.0 }
 0x286   :  { %v1547_v27 = vmax.f32 %v1016_v57, %v1490_v50  ;;  %5497 = vmatmul.msk.f32.gmra.mxu2 %vm77_vm0, %v5440_v0  ;;  %9334 = vst [vmem:[#allocation5_spill] sm:$0xff] %v7671_v6  ;;  %v5327_v57 = vld [vmem:[%s9262_s0 + $0x930] sm:$0xff]  ;;  %v5441_v50 = vld [vmem:[%s9262_s0 + $0xaf8] sm:$0xff]  ;;  %v5669_v6 = vld [vmem:[%s9262_s0 + $0xe88] sm:$0xff] }
 0x287   :  { %v1017_v58 = vmax.f32 %v486_v32, %v960_v16  ;;  %v5558_v16 = vld [vmem:[%s9262_s0 + $0xcd8] sm:$0xff] }
 0x288   :  { %v7679_v59 = vmax.f32 %v1547_v27, %v2021_v12  ;;  %5725 = vmatmul.msk.f32.gmra.mxu0 %vm77_vm0, %v5668_v46  ;;  %5614 = vmatmul.msk.f32.gmra.mxu3 %vm77_vm0, %v5557_v8  ;;  %v2022_v27 = vmax.f32 %v1950_v48, 0.0 }
 0x289   :  { %v1418_v26 = vpop.f32.mrf.mxu2 }
 0x28a   :  { %9335 = vst [vmem:[#allocation64_spill] sm:$0xff] %v7679_v59  ;;  %v1419_v40 = vadd.f32 %v7564_v24, %v1418_v26  ;;  %v890_v0 = vpop.f32.mrf.mxu1  ;;  %v9336_v59 = vld [vmem:[#allocation6_spill] sm:$0xff] }
 0x28b   :  { %v891_v56 = vadd.f32 %v7564_v24, %v890_v0  ;;  %v1958_v46 = vpop.f32.mrf.mxu3  ;;  %v417_v62 = vadd.f32 %v7564_v24, %v9336_v59  ;;  %v1953_v59 = vadd.f32 %v7564_v24, %v1952_v14 }
 0x28c   :  { %v1491_v12 = vmax.f32 %v1419_v40, 0.0 }
 0x28d   :  { %5384 = vmatmul.msk.f32.gmra.mxu1 %vm77_vm0, %v5327_v57  ;;  %v7696_v26 = vpop.f32.mrf.mxu0  ;;  %v961_v48 = vmax.f32 %v891_v56, 0.0  ;;  %v487_v0 = vmax.f32 %v417_v62, 0.0 }
 0x28e   :  { %v1548_v8 = vmax.f32 %v1017_v58, %v1491_v12  ;;  %5498 = vmatmul.msk.f32.gmra.mxu2 %vm77_vm0, %v5441_v50  ;;  %9337 = vst [vmem:[#allocation6_spill] sm:$0xff] %v7696_v26  ;;  %v5328_v58 = vld [vmem:[%s9262_s0 + $0x938] sm:$0xff]  ;;  %v5442_v12 = vld [vmem:[%s9262_s0 + $0xb00] sm:$0xff]  ;;  %v5670_v26 = vld [vmem:[%s9262_s0 + $0xe90] sm:$0xff] }
 0x28f   :  { %v1018_v56 = vmax.f32 %v487_v0, %v961_v48  ;;  %v5559_v48 = vld [vmem:[%s9262_s0 + $0xce0] sm:$0xff] }
 0x290   :  { %v7704_v32 = vmax.f32 %v1548_v8, %v2022_v27  ;;  %5726 = vmatmul.msk.f32.gmra.mxu0 %vm77_vm0, %v5669_v6  ;;  %5615 = vmatmul.msk.f32.gmra.mxu3 %vm77_vm0, %v5558_v16  ;;  %v2023_v8 = vmax.f32 %v1953_v59, 0.0 }
 0x291   :  { %v1421_v40 = vpop.f32.mrf.mxu2 }
 0x292   :  { %9338 = vst [vmem:[#allocation65_spill] sm:$0xff] %v7704_v32  ;;  %v1422_v57 = vadd.f32 %v7564_v24, %v1421_v40  ;;  %v893_v50 = vpop.f32.mrf.mxu1  ;;  %v9339_v32 = vld [vmem:[#allocation7_spill] sm:$0xff] }
 0x293   :  { %v894_v14 = vadd.f32 %v7564_v24, %v893_v50  ;;  %v1961_v6 = vpop.f32.mrf.mxu3  ;;  %v420_v62 = vadd.f32 %v7564_v24, %v9339_v32  ;;  %v1956_v32 = vadd.f32 %v7564_v24, %v1955_v30 }
 0x294   :  { %v1492_v27 = vmax.f32 %v1422_v57, 0.0 }
 0x295   :  { %5385 = vmatmul.msk.f32.gmra.mxu1 %vm77_vm0, %v5328_v58  ;;  %v7721_v40 = vpop.f32.mrf.mxu0  ;;  %v962_v59 = vmax.f32 %v894_v14, 0.0  ;;  %v488_v50 = vmax.f32 %v420_v62, 0.0 }
 0x296   :  { %v1549_v16 = vmax.f32 %v1018_v56, %v1492_v27  ;;  %5499 = vmatmul.msk.f32.gmra.mxu2 %vm77_vm0, %v5442_v12  ;;  %9340 = vst [vmem:[#allocation7_spill] sm:$0xff] %v7721_v40  ;;  %v5329_v56 = vld [vmem:[%s9262_s0 + $0x940] sm:$0xff]  ;;  %v5443_v27 = vld [vmem:[%s9262_s0 + $0xb08] sm:$0xff]  ;;  %v5671_v40 = vld [vmem:[%s9262_s0 + $0xe98] sm:$0xff] }
 0x297   :  { %v1019_v14 = vmax.f32 %v488_v50, %v962_v59  ;;  %v5560_v59 = vld [vmem:[%s9262_s0 + $0xce8] sm:$0xff] }
 0x298   :  { %v7729_v0 = vmax.f32 %v1549_v16, %v2023_v8  ;;  %5727 = vmatmul.msk.f32.gmra.mxu0 %vm77_vm0, %v5670_v26  ;;  %5616 = vmatmul.msk.f32.gmra.mxu3 %vm77_vm0, %v5559_v48  ;;  %v2024_v16 = vmax.f32 %v1956_v32, 0.0 }
 0x299   :  { %v1424_v57 = vpop.f32.mrf.mxu2 }
 0x29a   :  { %9341 = vst [vmem:[#allocation66_spill] sm:$0xff] %v7729_v0  ;;  %v1425_v58 = vadd.f32 %v7564_v24, %v1424_v57  ;;  %v896_v12 = vpop.f32.mrf.mxu1  ;;  %v9342_v0 = vld [vmem:[#allocation8_spill] sm:$0xff] }
 0x29b   :  { %v897_v30 = vadd.f32 %v7564_v24, %v896_v12  ;;  %v1964_v26 = vpop.f32.mrf.mxu3  ;;  %v423_v62 = vadd.f32 %v7564_v24, %v9342_v0  ;;  %v1959_v0 = vadd.f32 %v7564_v24, %v1958_v46 }
 0x29c   :  { %v1493_v8 = vmax.f32 %v1425_v58, 0.0 }
 0x29d   :  { %5386 = vmatmul.msk.f32.gmra.mxu1 %vm77_vm0, %v5329_v56  ;;  %v7746_v57 = vpop.f32.mrf.mxu0  ;;  %v963_v32 = vmax.f32 %v897_v30, 0.0  ;;  %v489_v12 = vmax.f32 %v423_v62, 0.0 }
 0x29e   :  { %v1550_v48 = vmax.f32 %v1019_v14, %v1493_v8  ;;  %5500 = vmatmul.msk.f32.gmra.mxu2 %vm77_vm0, %v5443_v27  ;;  %9343 = vst [vmem:[#allocation8_spill] sm:$0xff] %v7746_v57  ;;  %v5330_v14 = vld [vmem:[%s9262_s0 + $0x948] sm:$0xff]  ;;  %v5444_v8 = vld [vmem:[%s9262_s0 + $0xb10] sm:$0xff]  ;;  %v5672_v57 = vld [vmem:[%s9262_s0 + $0xea0] sm:$0xff] }
 0x29f   :  { %v1020_v30 = vmax.f32 %v489_v12, %v963_v32  ;;  %v5561_v32 = vld [vmem:[%s9262_s0 + $0xcf0] sm:$0xff] }
 0x2a0   :  { %v7754_v50 = vmax.f32 %v1550_v48, %v2024_v16  ;;  %5728 = vmatmul.msk.f32.gmra.mxu0 %vm77_vm0, %v5671_v40  ;;  %5617 = vmatmul.msk.f32.gmra.mxu3 %vm77_vm0, %v5560_v59  ;;  %v2025_v48 = vmax.f32 %v1959_v0, 0.0 }
 0x2a1   :  { %v1427_v58 = vpop.f32.mrf.mxu2 }
 0x2a2   :  { %9344 = vst [vmem:[#allocation67_spill] sm:$0xff] %v7754_v50  ;;  %v1428_v56 = vadd.f32 %v7564_v24, %v1427_v58  ;;  %v899_v27 = vpop.f32.mrf.mxu1  ;;  %v9345_v50 = vld [vmem:[#allocation9_spill] sm:$0xff] }
 0x2a3   :  { %v900_v46 = vadd.f32 %v7564_v24, %v899_v27  ;;  %v1967_v40 = vpop.f32.mrf.mxu3  ;;  %v426_v62 = vadd.f32 %v7564_v24, %v9345_v50  ;;  %v1962_v50 = vadd.f32 %v7564_v24, %v1961_v6 }
 0x2a4   :  { %v1494_v16 = vmax.f32 %v1428_v56, 0.0 }
 0x2a5   :  { %5387 = vmatmul.msk.f32.gmra.mxu1 %vm77_vm0, %v5330_v14  ;;  %v7771_v58 = vpop.f32.mrf.mxu0  ;;  %v964_v0 = vmax.f32 %v900_v46, 0.0  ;;  %v490_v27 = vmax.f32 %v426_v62, 0.0 }
 0x2a6   :  { %v1551_v59 = vmax.f32 %v1020_v30, %v1494_v16  ;;  %5501 = vmatmul.msk.f32.gmra.mxu2 %vm77_vm0, %v5444_v8  ;;  %9346 = vst [vmem:[#allocation9_spill] sm:$0xff] %v7771_v58  ;;  %v5331_v30 = vld [vmem:[%s9262_s0 + $0x950] sm:$0xff]  ;;  %v5445_v16 = vld [vmem:[%s9262_s0 + $0xb18] sm:$0xff]  ;;  %v5673_v58 = vld [vmem:[%s9262_s0 + $0xea8] sm:$0xff] }
 0x2a7   :  { %v1021_v46 = vmax.f32 %v490_v27, %v964_v0  ;;  %v5562_v0 = vld [vmem:[%s9262_s0 + $0xcf8] sm:$0xff] }
 0x2a8   :  { %v7779_v12 = vmax.f32 %v1551_v59, %v2025_v48  ;;  %5729 = vmatmul.msk.f32.gmra.mxu0 %vm77_vm0, %v5672_v57  ;;  %5618 = vmatmul.msk.f32.gmra.mxu3 %vm77_vm0, %v5561_v32  ;;  %v2026_v59 = vmax.f32 %v1962_v50, 0.0 }
 0x2a9   :  { %v1430_v56 = vpop.f32.mrf.mxu2 }
 0x2aa   :  { %9347 = vst [vmem:[#allocation68_spill] sm:$0xff] %v7779_v12  ;;  %v1431_v14 = vadd.f32 %v7564_v24, %v1430_v56  ;;  %v902_v8 = vpop.f32.mrf.mxu1  ;;  %v9348_v12 = vld [vmem:[#allocation10_spill] sm:$0xff] }
 0x2ab   :  { %v903_v6 = vadd.f32 %v7564_v24, %v902_v8  ;;  %v1970_v57 = vpop.f32.mrf.mxu3  ;;  %v429_v62 = vadd.f32 %v7564_v24, %v9348_v12  ;;  %v1965_v12 = vadd.f32 %v7564_v24, %v1964_v26 }
 0x2ac   :  { %v1495_v48 = vmax.f32 %v1431_v14, 0.0 }
 0x2ad   :  { %5388 = vmatmul.msk.f32.gmra.mxu1 %vm77_vm0, %v5331_v30  ;;  %v7796_v56 = vpop.f32.mrf.mxu0  ;;  %v965_v50 = vmax.f32 %v903_v6, 0.0  ;;  %v491_v8 = vmax.f32 %v429_v62, 0.0 }
 0x2ae   :  { %v1552_v32 = vmax.f32 %v1021_v46, %v1495_v48  ;;  %5502 = vmatmul.msk.f32.gmra.mxu2 %vm77_vm0, %v5445_v16  ;;  %9349 = vst [vmem:[#allocation10_spill] sm:$0xff] %v7796_v56  ;;  %v5332_v46 = vld [vmem:[%s9262_s0 + $0x958] sm:$0xff]  ;;  %v5446_v48 = vld [vmem:[%s9262_s0 + $0xb20] sm:$0xff]  ;;  %v5674_v56 = vld [vmem:[%s9262_s0 + $0xeb0] sm:$0xff] }
 0x2af   :  { %v1022_v6 = vmax.f32 %v491_v8, %v965_v50  ;;  %v5563_v50 = vld [vmem:[%s9262_s0 + $0xd00] sm:$0xff] }
 0x2b0   :  { %v7804_v27 = vmax.f32 %v1552_v32, %v2026_v59  ;;  %5730 = vmatmul.msk.f32.gmra.mxu0 %vm77_vm0, %v5673_v58  ;;  %5619 = vmatmul.msk.f32.gmra.mxu3 %vm77_vm0, %v5562_v0  ;;  %v2027_v32 = vmax.f32 %v1965_v12, 0.0 }
 0x2b1   :  { %v1433_v14 = vpop.f32.mrf.mxu2 }
 0x2b2   :  { %9350 = vst [vmem:[#allocation69_spill] sm:$0xff] %v7804_v27  ;;  %v1434_v30 = vadd.f32 %v7564_v24, %v1433_v14  ;;  %v905_v16 = vpop.f32.mrf.mxu1  ;;  %v9351_v27 = vld [vmem:[#allocation11_spill] sm:$0xff] }
 0x2b3   :  { %v906_v26 = vadd.f32 %v7564_v24, %v905_v16  ;;  %v3926_v58 = vpop.f32.mrf.mxu3  ;;  %v432_v62 = vadd.f32 %v7564_v24, %v9351_v27  ;;  %v1968_v27 = vadd.f32 %v7564_v24, %v1967_v40 }
 0x2b4   :  { %v1496_v59 = vmax.f32 %v1434_v30, 0.0 }
 0x2b5   :  { %5389 = vmatmul.msk.f32.gmra.mxu1 %vm77_vm0, %v5332_v46  ;;  %v7821_v14 = vpop.f32.mrf.mxu0  ;;  %v966_v12 = vmax.f32 %v906_v26, 0.0  ;;  %v492_v16 = vmax.f32 %v432_v62, 0.0 }
 0x2b6   :  { %v1553_v0 = vmax.f32 %v1022_v6, %v1496_v59  ;;  %5503 = vmatmul.msk.f32.gmra.mxu2 %vm77_vm0, %v5446_v48  ;;  %9352 = vst [vmem:[#allocation11_spill] sm:$0xff] %v7821_v14  ;;  %v5333_v6 = vld [vmem:[%s9262_s0 + $0x960] sm:$0xff]  ;;  %v5447_v59 = vld [vmem:[%s9262_s0 + $0xb28] sm:$0xff]  ;;  %v5675_v14 = vld [vmem:[%s9262_s0 + $0xeb8] sm:$0xff] }
 0x2b7   :  { %v1023_v26 = vmax.f32 %v492_v16, %v966_v12  ;;  %v5564_v12 = vld [vmem:[%s9262_s0 + $0xd08] sm:$0xff] }
 0x2b8   :  { %v7829_v8 = vmax.f32 %v1553_v0, %v2027_v32  ;;  %5731 = vmatmul.msk.f32.gmra.mxu0 %vm77_vm0, %v5674_v56  ;;  %5620 = vmatmul.msk.f32.gmra.mxu3 %vm77_vm0, %v5563_v50  ;;  %v2028_v0 = vmax.f32 %v1968_v27, 0.0 }
 0x2b9   :  { %v1436_v30 = vpop.f32.mrf.mxu2 }
 0x2ba   :  { %9353 = vst [vmem:[#allocation70_spill] sm:$0xff] %v7829_v8  ;;  %v1437_v46 = vadd.f32 %v7564_v24, %v1436_v30  ;;  %v908_v48 = vpop.f32.mrf.mxu1  ;;  %v9354_v8 = vld [vmem:[#allocation12_spill] sm:$0xff] }
 0x2bb   :  { %v909_v40 = vadd.f32 %v7564_v24, %v908_v48  ;;  %v3929_v56 = vpop.f32.mrf.mxu3  ;;  %v435_v62 = vadd.f32 %v7564_v24, %v9354_v8  ;;  %v1971_v8 = vadd.f32 %v7564_v24, %v1970_v57  ;;  %v5448_v57 = vld [vmem:[%s9262_s0 + $0xb30] sm:$0xff] }
 0x2bc   :  { %v1497_v32 = vmax.f32 %v1437_v46, 0.0 }
 0x2bd   :  { %5390 = vmatmul.msk.f32.gmra.mxu1 %vm77_vm0, %v5333_v6  ;;  %v7846_v30 = vpop.f32.mrf.mxu0  ;;  %v967_v27 = vmax.f32 %v909_v40, 0.0  ;;  %v493_v48 = vmax.f32 %v435_v62, 0.0  ;;  %v9357_v6 = vld [vmem:[#allocation13_spill] sm:$0xff]  ;;  %v5334_v40 = vld [vmem:[%s9262_s0 + $0x968] sm:$0xff] }
 0x2be   :  { %v1554_v50 = vmax.f32 %v1023_v26, %v1497_v32  ;;  %5504 = vmatmul.msk.f32.gmra.mxu2 %vm77_vm0, %v5447_v59  ;;  %9355 = vst [vmem:[#allocation12_spill] sm:$0xff] %v7846_v30  ;;  %v2334_v59 = vadd.f32 %v7564_v24, %v9357_v6  ;;  %v5676_v30 = vld [vmem:[%s9262_s0 + $0xec0] sm:$0xff] }
 0x2c0   :  { %v7854_v16 = vmax.f32 %v1554_v50, %v2028_v0  ;;  %5732 = vmatmul.msk.f32.gmra.mxu0 %vm77_vm0, %v5675_v14  ;;  %5621 = vmatmul.msk.f32.gmra.mxu3 %vm77_vm0, %v5564_v12  ;;  %v1024_v0 = vmax.f32 %v493_v48, %v967_v27  ;;  %v2029_v14 = vmax.f32 %v1971_v8, 0.0  ;;  %v5565_v27 = vld [vmem:[%s9262_s0 + $0xd10] sm:$0xff] }
 0x2c1   :  { %v1439_v46 = vpop.f32.mrf.mxu2 }
 0x2c2   :  { %9356 = vst [vmem:[#allocation71_spill] sm:$0xff] %v7854_v16  ;;  %v1440_v26 = vadd.f32 %v7564_v24, %v1439_v46  ;;  %v2864_v32 = vpop.f32.mrf.mxu1  ;;  %v2504_v16 = vmax.f32 %v2334_v59, 0.0 }
 0x2c3   :  { %v2865_v12 = vadd.f32 %v7564_v24, %v2864_v32  ;;  %v7869_v62 = vpop.f32.mrf.mxu3 }
 0x2c4   :  { %v1498_v50 = vmax.f32 %v1440_v26, 0.0  ;;  %v3927_v26 = vadd.f32 %v7564_v24, %v3926_v58  ;;  %v2561_v32 = vmax.f32 %v6469_v5, %v2504_v16  ;;  %v5449_v58 = vld [vmem:[%s9262_s0 + $0xb38] sm:$0xff] }
 0x2c5   :  { %5391 = vmatmul.msk.f32.gmra.mxu1 %vm77_vm0, %v5334_v40  ;;  %v4457_v46 = vpop.f32.mrf.mxu0  ;;  %v3035_v48 = vmax.f32 %v2865_v12, 0.0  ;;  %v9359_v40 = vld [vmem:[#allocation14_spill] sm:$0xff] }
 0x2c6   :  { %v1555_v6 = vmax.f32 %v1024_v0, %v1498_v50  ;;  %5505 = vmatmul.msk.f32.gmra.mxu2 %vm77_vm0, %v5448_v57  ;;  %v2337_v57 = vadd.f32 %v7564_v24, %v9359_v40  ;;  %v4458_v50 = vadd.f32 %v7564_v24, %v4457_v46  ;;  %v4097_v16 = vmax.f32 %v3927_v26, 0.0 }
 0x2c8   :  { %v7879_v8 = vmax.f32 %v1555_v6, %v2029_v14  ;;  %5733 = vmatmul.msk.f32.gmra.mxu0 %vm77_vm0, %v5676_v30  ;;  %5622 = vmatmul.msk.f32.gmra.mxu3 %vm77_vm0, %v5565_v27  ;;  %v5335_v14 = vld [vmem:[%s9262_s0 + $0x970] sm:$0xff]  ;;  %v3092_v30 = vmax.f32 %v2561_v32, %v3035_v48  ;;  %v2505_v27 = vmax.f32 %v2337_v57, 0.0  ;;  %v4628_v40 = vmax.f32 %v4458_v50, 0.0  ;;  %v5566_v48 = vld [vmem:[%s9262_s0 + $0xd18] sm:$0xff]  ;;  %v9360_v50 = vld [vmem:[#allocation15_spill] sm:$0xff] }
 0x2c9   :  { %v3395_v59 = vpop.f32.mrf.mxu2  ;;  %v3930_v32 = vadd.f32 %v7564_v24, %v3929_v56  ;;  %v2340_v57 = vadd.f32 %v7564_v24, %v6486_v36  ;;  %v5336_v56 = vld [vmem:[%s9262_s0 + $0x978] sm:$0xff]  ;;  %v5450_v36 = vld [vmem:[%s9262_s0 + $0xb40] sm:$0xff] }
 0x2ca   :  { %9358 = vst [vmem:[#allocation13_spill] sm:$0xff] %v7879_v8  ;;  %v3396_v0 = vadd.f32 %v7564_v24, %v3395_v59  ;;  %v2867_v63 = vpop.f32.mrf.mxu1  ;;  %v5677_v8 = vld [vmem:[%s9262_s0 + $0xec8] sm:$0xff] }
 0x2cb   :  { %v2868_v5 = vadd.f32 %v7564_v24, %v2867_v63  ;;  %v7896_v6 = vpop.f32.mrf.mxu3 }
 0x2cc   :  { %v3566_v12 = vmax.f32 %v3396_v0, 0.0 }
 0x2cd   :  { %5392 = vmatmul.msk.f32.gmra.mxu1 %vm77_vm0, %v5335_v14  ;;  %v4460_v46 = vpop.f32.mrf.mxu0  ;;  %v3036_v63 = vmax.f32 %v2868_v5, 0.0  ;;  %v2562_v14 = vmax.f32 %v9360_v50, %v2505_v27  ;;  %v5567_v50 = vld [vmem:[%s9262_s0 + $0xd20] sm:$0xff] }
 0x2ce   :  { %v3623_v59 = vmax.f32 %v3092_v30, %v3566_v12  ;;  %5506 = vmatmul.msk.f32.gmra.mxu2 %vm77_vm0, %v5449_v58  ;;  %v4461_v12 = vadd.f32 %v7564_v24, %v4460_v46  ;;  %v2506_v46 = vmax.f32 %v2340_v57, 0.0  ;;  %v3933_v57 = vadd.f32 %v7564_v24, %v7869_v62  ;;  %v5337_v62 = vld [vmem:[%s9262_s0 + $0x980] sm:$0xff] }
 0x2d0   :  { %v4154_v26 = vmax.f32 %v3623_v59, %v4097_v16  ;;  %5734 = vmatmul.msk.f32.gmra.mxu0 %vm77_vm0, %v5677_v8  ;;  %5623 = vmatmul.msk.f32.gmra.mxu3 %vm77_vm0, %v5566_v48  ;;  %v3093_v16 = vmax.f32 %v2562_v14, %v3036_v63  ;;  %v4098_v59 = vmax.f32 %v3930_v32, 0.0  ;;  %v5678_v63 = vld [vmem:[%s9262_s0 + $0xed0] sm:$0xff] }
 0x2d1   :  { %v3398_v0 = vpop.f32.mrf.mxu2 }
 0x2d2   :  { %v4685_v58 = vmax.f32 %v4154_v26, %v4628_v40  ;;  %v3399_v30 = vadd.f32 %v7564_v24, %v3398_v0  ;;  %v2870_v5 = vpop.f32.mrf.mxu1  ;;  %v4629_v26 = vmax.f32 %v4461_v12, 0.0  ;;  %v9361_v12 = vld [vmem:[#allocation16_spill] sm:$0xff] }
 0x2d3   :  { %v2871_v27 = vadd.f32 %v7564_v24, %v2870_v5  ;;  %v7925_v40 = vpop.f32.mrf.mxu3  ;;  %v2563_v5 = vmax.f32 %v9361_v12, %v2506_v46 }
 0x2d4   :  { %4743 = vst.msk [vmem:[%s9264_s3] sm:$0xff] %vm4742_vm1, %v4685_v58  ;;  %v3567_v8 = vmax.f32 %v3399_v30, 0.0  ;;  %v2343_v58 = vadd.f32 %v7564_v24, %v6511_v35  ;;  %v5451_v35 = vld [vmem:[%s9262_s0 + $0xb48] sm:$0xff] }
 0x2d5   :  { %5393 = vmatmul.msk.f32.gmra.mxu1 %vm77_vm0, %v5336_v56  ;;  %v4463_v0 = vpop.f32.mrf.mxu0  ;;  %v3037_v14 = vmax.f32 %v2871_v27, 0.0 }
 0x2d6   :  { %v3624_v48 = vmax.f32 %v3093_v16, %v3567_v8  ;;  %5507 = vmatmul.msk.f32.gmra.mxu2 %vm77_vm0, %v5450_v36  ;;  %v4464_v16 = vadd.f32 %v7564_v24, %v4463_v0  ;;  %v2507_v0 = vmax.f32 %v2343_v58, 0.0  ;;  %v3936_v58 = vadd.f32 %v7564_v24, %v7896_v6  ;;  %v5338_v6 = vld [vmem:[%s9262_s0 + $0x988] sm:$0xff] }
 0x2d7   :  { %v3094_v27 = vmax.f32 %v2563_v5, %v3037_v14  ;;  %v5679_v14 = vld [vmem:[%s9262_s0 + $0xed8] sm:$0xff]  ;;  %v2346_v5 = vadd.f32 %v7564_v24, %v6536_v4  ;;  %v5452_v4 = vld [vmem:[%s9262_s0 + $0xb50] sm:$0xff] }
 0x2d8   :  { %v4155_v32 = vmax.f32 %v3624_v48, %v4098_v59  ;;  %5735 = vmatmul.msk.f32.gmra.mxu0 %vm77_vm0, %v5678_v63  ;;  %5624 = vmatmul.msk.f32.gmra.mxu3 %vm77_vm0, %v5567_v50  ;;  %v4099_v48 = vmax.f32 %v3933_v57, 0.0  ;;  %v4630_v50 = vmax.f32 %v4464_v16, 0.0 }
 0x2d9   :  { %v3401_v30 = vpop.f32.mrf.mxu2 }
 0x2da   :  { %v4686_v56 = vmax.f32 %v4155_v32, %v4629_v26  ;;  %v3402_v36 = vadd.f32 %v7564_v24, %v3401_v30  ;;  %v2873_v8 = vpop.f32.mrf.mxu1  ;;  %v5568_v30 = vld [vmem:[%s9262_s0 + $0xd28] sm:$0xff] }
 0x2db   :  { %v2874_v46 = vadd.f32 %v7564_v24, %v2873_v8  ;;  %v7955_v26 = vpop.f32.mrf.mxu3 }
 0x2dc   :  { %4744 = vst.msk [vmem:[%s9264_s3 + $0x8] sm:$0xff] %vm4742_vm1, %v4686_v56  ;;  %v3568_v59 = vmax.f32 %v3402_v36, 0.0  ;;  %v9362_v36 = vld [vmem:[#allocation17_spill] sm:$0xff] }
 0x2dd   :  { %5394 = vmatmul.msk.f32.gmra.mxu1 %vm77_vm0, %v5337_v62  ;;  %v4466_v32 = vpop.f32.mrf.mxu0  ;;  %v3038_v12 = vmax.f32 %v2874_v46, 0.0  ;;  %v2564_v16 = vmax.f32 %v9362_v36, %v2507_v0  ;;  %v4100_v0 = vmax.f32 %v3936_v58, 0.0  ;;  %v2349_v36 = vadd.f32 %v7564_v24, %v6561_v54  ;;  %v5453_v54 = vld [vmem:[%s9262_s0 + $0xb58] sm:$0xff] }
 0x2de   :  { %v3625_v63 = vmax.f32 %v3094_v27, %v3568_v59  ;;  %5508 = vmatmul.msk.f32.gmra.mxu2 %vm77_vm0, %v5451_v35  ;;  %v4467_v35 = vadd.f32 %v7564_v24, %v4466_v32 }
 0x2df   :  { %v3095_v59 = vmax.f32 %v2564_v16, %v3038_v12  ;;  %v5680_v12 = vld [vmem:[%s9262_s0 + $0xee0] sm:$0xff] }
 0x2e0   :  { %v4156_v57 = vmax.f32 %v3625_v63, %v4099_v48  ;;  %5736 = vmatmul.msk.f32.gmra.mxu0 %vm77_vm0, %v5679_v14  ;;  %5625 = vmatmul.msk.f32.gmra.mxu3 %vm77_vm0, %v5568_v30  ;;  %v4631_v14 = vmax.f32 %v4467_v35, 0.0 }
 0x2e1   :  { %v3404_v56 = vpop.f32.mrf.mxu2 }
 0x2e2   :  { %v4687_v8 = vmax.f32 %v4156_v57, %v4630_v50  ;;  %v3405_v62 = vadd.f32 %v7564_v24, %v3404_v56  ;;  %v2876_v27 = vpop.f32.mrf.mxu1  ;;  %v2508_v50 = vmax.f32 %v2346_v5, 0.0  ;;  %v5569_v57 = vld [vmem:[%s9262_s0 + $0xd30] sm:$0xff]  ;;  %v3939_v5 = vadd.f32 %v7564_v24, %v7925_v40 }
 0x2e3   :  { %v2877_v48 = vadd.f32 %v7564_v24, %v2876_v27  ;;  %v7985_v63 = vpop.f32.mrf.mxu3  ;;  %v5339_v40 = vld [vmem:[%s9262_s0 + $0x990] sm:$0xff] }
 0x2e4   :  { %4745 = vst.msk [vmem:[%s9264_s3 + $0x10] sm:$0xff] %vm4742_vm1, %v4687_v8  ;;  %v3569_v46 = vmax.f32 %v3405_v62, 0.0  ;;  %v9363_v8 = vld [vmem:[#allocation18_spill] sm:$0xff] }
 0x2e5   :  { %5395 = vmatmul.msk.f32.gmra.mxu1 %vm77_vm0, %v5338_v6  ;;  %v4469_v30 = vpop.f32.mrf.mxu0  ;;  %v3039_v56 = vmax.f32 %v2877_v48, 0.0  ;;  %v2565_v62 = vmax.f32 %v9363_v8, %v2508_v50 }
 0x2e6   :  { %v3626_v32 = vmax.f32 %v3095_v59, %v3569_v46  ;;  %5509 = vmatmul.msk.f32.gmra.mxu2 %vm77_vm0, %v5452_v4  ;;  %v4470_v6 = vadd.f32 %v7564_v24, %v4469_v30 }
 0x2e7   :  { %v3096_v59 = vmax.f32 %v2565_v62, %v3039_v56  ;;  %v5570_v56 = vld [vmem:[%s9262_s0 + $0xd38] sm:$0xff]  ;;  %v9364_v62 = vld [vmem:[#allocation19_spill] sm:$0xff] }
 0x2e8   :  { %v4157_v58 = vmax.f32 %v3626_v32, %v4100_v0  ;;  %5737 = vmatmul.msk.f32.gmra.mxu0 %vm77_vm0, %v5680_v12  ;;  %5626 = vmatmul.msk.f32.gmra.mxu3 %vm77_vm0, %v5569_v57  ;;  %v4101_v0 = vmax.f32 %v3939_v5, 0.0  ;;  %v2509_v32 = vmax.f32 %v2349_v36, 0.0  ;;  %v4632_v30 = vmax.f32 %v4470_v6, 0.0  ;;  %v5681_v57 = vld [vmem:[%s9262_s0 + $0xee8] sm:$0xff] }
 0x2e9   :  { %v3407_v16 = vpop.f32.mrf.mxu2  ;;  %v3942_v36 = vadd.f32 %v7564_v24, %v7955_v26  ;;  %v5340_v26 = vld [vmem:[%s9262_s0 + $0x998] sm:$0xff] }
 0x2ea   :  { %v4688_v35 = vmax.f32 %v4157_v58, %v4631_v14  ;;  %v3408_v27 = vadd.f32 %v7564_v24, %v3407_v16  ;;  %v2879_v4 = vpop.f32.mrf.mxu1  ;;  %v2352_v16 = vadd.f32 %v7564_v24, %v6586_v18  ;;  %v5454_v18 = vld [vmem:[%s9262_s0 + $0xb60] sm:$0xff] }
 0x2eb   :  { %v2880_v48 = vadd.f32 %v7564_v24, %v2879_v4  ;;  %v8015_v50 = vpop.f32.mrf.mxu3 }
 0x2ec   :  { %4746 = vst.msk [vmem:[%s9264_s3 + $0x18] sm:$0xff] %vm4742_vm1, %v4688_v35  ;;  %v3570_v46 = vmax.f32 %v3408_v27, 0.0  ;;  %v2566_v35 = vmax.f32 %v9364_v62, %v2509_v32  ;;  %v2510_v32 = vmax.f32 %v2352_v16, 0.0  ;;  %v2355_v16 = vadd.f32 %v7564_v24, %v6611_v38  ;;  %v9365_v62 = vld [vmem:[#allocation20_spill] sm:$0xff]  ;;  %v5455_v38 = vld [vmem:[%s9262_s0 + $0xb68] sm:$0xff] }
 0x2ed   :  { %5396 = vmatmul.msk.f32.gmra.mxu1 %vm77_vm0, %v5339_v40  ;;  %v4472_v12 = vpop.f32.mrf.mxu0  ;;  %v3040_v58 = vmax.f32 %v2880_v48, 0.0  ;;  %v4102_v48 = vmax.f32 %v3942_v36, 0.0  ;;  %v3945_v36 = vadd.f32 %v7564_v24, %v7985_v63  ;;  %v5341_v63 = vld [vmem:[%s9262_s0 + $0x9a0] sm:$0xff] }
 0x2ee   :  { %v3627_v14 = vmax.f32 %v3096_v59, %v3570_v46  ;;  %5510 = vmatmul.msk.f32.gmra.mxu2 %vm77_vm0, %v5453_v54  ;;  %v4473_v4 = vadd.f32 %v7564_v24, %v4472_v12 }
 0x2ef   :  { %v3097_v54 = vmax.f32 %v2566_v35, %v3040_v58  ;;  %v2567_v35 = vmax.f32 %v9365_v62, %v2510_v32 }
 0x2f0   :  { %v4158_v5 = vmax.f32 %v3627_v14, %v4101_v0  ;;  %5738 = vmatmul.msk.f32.gmra.mxu0 %vm77_vm0, %v5681_v57  ;;  %5627 = vmatmul.msk.f32.gmra.mxu3 %vm77_vm0, %v5570_v56  ;;  %v5682_v57 = vld [vmem:[%s9262_s0 + $0xef0] sm:$0xff]  ;;  %v5571_v56 = vld [vmem:[%s9262_s0 + $0xd40] sm:$0xff] }
 0x2f1   :  { %v3410_v8 = vpop.f32.mrf.mxu2 }
 0x2f2   :  { %v4689_v27 = vmax.f32 %v4158_v5, %v4632_v30  ;;  %v3411_v6 = vadd.f32 %v7564_v24, %v3410_v8  ;;  %v2882_v40 = vpop.f32.mrf.mxu1  ;;  %v4633_v30 = vmax.f32 %v4473_v4, 0.0 }
 0x2f3   :  { %v2883_v46 = vadd.f32 %v7564_v24, %v2882_v40  ;;  %v8045_v0 = vpop.f32.mrf.mxu3 }
 0x2f4   :  { %4747 = vst.msk [vmem:[%s9264_s3 + $0x20] sm:$0xff] %vm4742_vm1, %v4689_v27  ;;  %v3571_v59 = vmax.f32 %v3411_v6, 0.0 }
 0x2f5   :  { %5397 = vmatmul.msk.f32.gmra.mxu1 %vm77_vm0, %v5340_v26  ;;  %v4475_v12 = vpop.f32.mrf.mxu0  ;;  %v3041_v58 = vmax.f32 %v2883_v46, 0.0 }
 0x2f6   :  { %v3628_v14 = vmax.f32 %v3097_v54, %v3571_v59  ;;  %5511 = vmatmul.msk.f32.gmra.mxu2 %vm77_vm0, %v5454_v18  ;;  %v4476_v4 = vadd.f32 %v7564_v24, %v4475_v12  ;;  %v4103_v59 = vmax.f32 %v3945_v36, 0.0  ;;  %v5683_v12 = vld [vmem:[%s9262_s0 + $0xef8] sm:$0xff]  ;;  %v2358_v36 = vadd.f32 %v7564_v24, %v6636_v22  ;;  %v5456_v22 = vld [vmem:[%s9262_s0 + $0xb70] sm:$0xff] }
 0x2f7   :  { %v3098_v26 = vmax.f32 %v2567_v35, %v3041_v58 }
 0x2f8   :  { %v4159_v5 = vmax.f32 %v3628_v14, %v4102_v48  ;;  %5739 = vmatmul.msk.f32.gmra.mxu0 %vm77_vm0, %v5682_v57  ;;  %5628 = vmatmul.msk.f32.gmra.mxu3 %vm77_vm0, %v5571_v56  ;;  %v2511_v48 = vmax.f32 %v2355_v16, 0.0  ;;  %v4634_v14 = vmax.f32 %v4476_v4, 0.0  ;;  %v5572_v57 = vld [vmem:[%s9262_s0 + $0xd48] sm:$0xff] }
 0x2f9   :  { %v3413_v8 = vpop.f32.mrf.mxu2 }
 0x2fa   :  { %v4690_v27 = vmax.f32 %v4159_v5, %v4633_v30  ;;  %v3414_v6 = vadd.f32 %v7564_v24, %v3413_v8  ;;  %v2885_v40 = vpop.f32.mrf.mxu1  ;;  %v3948_v5 = vadd.f32 %v7564_v24, %v8015_v50  ;;  %v9366_v8 = vld [vmem:[#allocation21_spill] sm:$0xff]  ;;  %v5342_v50 = vld [vmem:[%s9262_s0 + $0x9a8] sm:$0xff] }
 0x2fb   :  { %v2886_v54 = vadd.f32 %v7564_v24, %v2885_v40  ;;  %v8075_v46 = vpop.f32.mrf.mxu3  ;;  %v2568_v62 = vmax.f32 %v9366_v8, %v2511_v48 }
 0x2fc   :  { %4748 = vst.msk [vmem:[%s9264_s3 + $0x28] sm:$0xff] %vm4742_vm1, %v4690_v27  ;;  %v3572_v18 = vmax.f32 %v3414_v6, 0.0 }
 0x2fd   :  { %5398 = vmatmul.msk.f32.gmra.mxu1 %vm77_vm0, %v5341_v63  ;;  %v4478_v30 = vpop.f32.mrf.mxu0  ;;  %v3042_v56 = vmax.f32 %v2886_v54, 0.0  ;;  %v2512_v54 = vmax.f32 %v2358_v36, 0.0  ;;  %v9367_v36 = vld [vmem:[#allocation22_spill] sm:$0xff] }
 0x2fe   :  { %v3629_v32 = vmax.f32 %v3098_v26, %v3572_v18  ;;  %5512 = vmatmul.msk.f32.gmra.mxu2 %vm77_vm0, %v5455_v38  ;;  %v4479_v6 = vadd.f32 %v7564_v24, %v4478_v30  ;;  %v4104_v26 = vmax.f32 %v3948_v5, 0.0  ;;  %v5573_v30 = vld [vmem:[%s9262_s0 + $0xd50] sm:$0xff] }
 0x2ff   :  { %v3099_v40 = vmax.f32 %v2568_v62, %v3042_v56 }
 0x300   :  { %v4160_v58 = vmax.f32 %v3629_v32, %v4103_v59  ;;  %5740 = vmatmul.msk.f32.gmra.mxu0 %vm77_vm0, %v5683_v12  ;;  %5629 = vmatmul.msk.f32.gmra.mxu3 %vm77_vm0, %v5572_v57  ;;  %v4635_v48 = vmax.f32 %v4479_v6, 0.0  ;;  %v8118_v57 = vld [vmem:[%s9263_s2] ss:$0 sm:$0xff] }
 0x301   :  { %v3416_v16 = vpop.f32.mrf.mxu2  ;;  %v3951_v56 = vadd.f32 %v8118_v57, %v8045_v0  ;;  %v5343_v0 = vld [vmem:[%s9262_s0 + $0x9b0] sm:$0xff] }
 0x302   :  { %v4691_v35 = vmax.f32 %v4160_v58, %v4634_v14  ;;  %v3417_v27 = vadd.f32 %v7564_v24, %v3416_v16  ;;  %v2888_v4 = vpop.f32.mrf.mxu1  ;;  %v5684_v14 = vld [vmem:[%s9262_s0 + $0xf00] sm:$0xff]  ;;  %v2361_v58 = vadd.f32 %v8118_v57, %v6661_v20  ;;  %v2569_v16 = vmax.f32 %v9367_v36, %v2512_v54  ;;  %v5457_v20 = vld [vmem:[%s9262_s0 + $0xb78] sm:$0xff] }
 0x303   :  { %v2889_v38 = vadd.f32 %v7564_v24, %v2888_v4  ;;  %v8105_v18 = vpop.f32.mrf.mxu3 }
 0x304   :  { %4749 = vst.msk [vmem:[%s9264_s3 + $0x30] sm:$0xff] %vm4742_vm1, %v4691_v35  ;;  %v3573_v63 = vmax.f32 %v3417_v27, 0.0 }
 0x305   :  { %5399 = vmatmul.msk.f32.gmra.mxu1 %vm77_vm0, %v5342_v50  ;;  %v4481_v32 = vpop.f32.mrf.mxu0  ;;  %v3043_v24 = vmax.f32 %v2889_v38, 0.0 }
 0x306   :  { %v3630_v59 = vmax.f32 %v3099_v40, %v3573_v63  ;;  %5513 = vmatmul.msk.f32.gmra.mxu2 %vm77_vm0, %v5456_v22  ;;  %v4482_v35 = vadd.f32 %v8118_v57, %v4481_v32  ;;  %v4105_v22 = vmax.f32 %v3951_v56, 0.0  ;;  %v2513_v63 = vmax.f32 %v2361_v58, 0.0  ;;  %v9368_v56 = vld [vmem:[#allocation23_spill] sm:$0xff] }
 0x307   :  { %v3100_v6 = vmax.f32 %v2569_v16, %v3043_v24  ;;  %v2364_v24 = vadd.f32 %v8118_v57, %v6686_v52  ;;  %v5458_v52 = vld [vmem:[%s9262_s0 + $0xb80] sm:$0xff] }
 0x308   :  { %v4161_v12 = vmax.f32 %v3630_v59, %v4104_v26  ;;  %5741 = vmatmul.msk.f32.gmra.mxu0 %vm77_vm0, %v5684_v14  ;;  %5630 = vmatmul.msk.f32.gmra.mxu3 %vm77_vm0, %v5573_v30  ;;  %v4636_v26 = vmax.f32 %v4482_v35, 0.0  ;;  %v5685_v59 = vld [vmem:[%s9262_s0 + $0xf08] sm:$0xff]  ;;  %v3954_v30 = vadd.f32 %v8118_v57, %v8075_v46  ;;  %v2570_v58 = vmax.f32 %v9368_v56, %v2513_v63  ;;  %v5344_v46 = vld [vmem:[%s9262_s0 + $0x9b8] sm:$0xff]  ;;  %v5686_v63 = vld [vmem:[%s9262_s0 + $0xf10] sm:$0xff] }
 0x309   :  { %v3419_v5 = vpop.f32.mrf.mxu2 }
 0x30a   :  { %v4692_v8 = vmax.f32 %v4161_v12, %v4635_v48  ;;  %v3420_v62 = vadd.f32 %v8118_v57, %v3419_v5  ;;  %v2891_v27 = vpop.f32.mrf.mxu1  ;;  %v5574_v48 = vld [vmem:[%s9262_s0 + $0xd58] sm:$0xff] }
 0x30b   :  { %v2892_v50 = vadd.f32 %v8118_v57, %v2891_v27  ;;  %v8140_v40 = vpop.f32.mrf.mxu3 }
 0x30c   :  { %4750 = vst.msk [vmem:[%s9264_s3 + $0x38] sm:$0xff] %vm4742_vm1, %v4692_v8  ;;  %v3574_v4 = vmax.f32 %v3420_v62, 0.0 }
 0x30d   :  { %5400 = vmatmul.msk.f32.gmra.mxu1 %vm77_vm0, %v5343_v0  ;;  %v4484_v54 = vpop.f32.mrf.mxu0  ;;  %v3044_v32 = vmax.f32 %v2892_v50, 0.0  ;;  %v4106_v0 = vmax.f32 %v3954_v30, 0.0 }
 0x30e   :  { %v3631_v38 = vmax.f32 %v3100_v6, %v3574_v4  ;;  %5514 = vmatmul.msk.f32.gmra.mxu2 %vm77_vm0, %v5457_v20  ;;  %v4485_v16 = vadd.f32 %v8118_v57, %v4484_v54  ;;  %v2514_v6 = vmax.f32 %v2364_v24, 0.0 }
 0x30f   :  { %v3101_v62 = vmax.f32 %v2570_v58, %v3044_v32 }
 0x310   :  { %v4162_v14 = vmax.f32 %v3631_v38, %v4105_v22  ;;  %5742 = vmatmul.msk.f32.gmra.mxu0 %vm77_vm0, %v5685_v59  ;;  %5631 = vmatmul.msk.f32.gmra.mxu3 %vm77_vm0, %v5574_v48  ;;  %v4637_v50 = vmax.f32 %v4485_v16, 0.0  ;;  %v5575_v38 = vld [vmem:[%s9262_s0 + $0xd60] sm:$0xff]  ;;  %v3957_v59 = vadd.f32 %v8118_v57, %v8105_v18  ;;  %v2367_v48 = vadd.f32 %v8118_v57, %v6711_v44  ;;  %v5459_v44 = vld [vmem:[%s9262_s0 + $0xb88] sm:$0xff] }
 0x311   :  { %v3422_v12 = vpop.f32.mrf.mxu2  ;;  %v5345_v18 = vld [vmem:[%s9262_s0 + $0x9c0] sm:$0xff] }
 0x312   :  { %v4693_v5 = vmax.f32 %v4162_v14, %v4636_v26  ;;  %v3423_v36 = vadd.f32 %v8118_v57, %v3422_v12  ;;  %v2894_v8 = vpop.f32.mrf.mxu1  ;;  %v9369_v14 = vld [vmem:[#allocation24_spill] sm:$0xff] }
 0x313   :  { %v2895_v27 = vadd.f32 %v8118_v57, %v2894_v8  ;;  %v8170_v20 = vpop.f32.mrf.mxu3  ;;  %v2571_v30 = vmax.f32 %v9369_v14, %v2514_v6  ;;  %v4107_v8 = vmax.f32 %v3957_v59, 0.0  ;;  %v5576_v6 = vld [vmem:[%s9262_s0 + $0xd68] sm:$0xff] }
 0x314   :  { %4751 = vst.msk [vmem:[%s9264_s3 + $0x40] sm:$0xff] %vm4742_vm1, %v4693_v5  ;;  %v3575_v35 = vmax.f32 %v3423_v36, 0.0 }
 0x315   :  { %5401 = vmatmul.msk.f32.gmra.mxu1 %vm77_vm0, %v5344_v46  ;;  %v4487_v22 = vpop.f32.mrf.mxu0  ;;  %v3045_v26 = vmax.f32 %v2895_v27, 0.0 }
 0x316   :  { %v3632_v4 = vmax.f32 %v3101_v62, %v3575_v35  ;;  %5515 = vmatmul.msk.f32.gmra.mxu2 %vm77_vm0, %v5458_v52  ;;  %v4488_v56 = vadd.f32 %v8118_v57, %v4487_v22  ;;  %v2515_v52 = vmax.f32 %v2367_v48, 0.0  ;;  %v3960_v22 = vadd.f32 %v8118_v57, %v8140_v40  ;;  %v5346_v40 = vld [vmem:[%s9262_s0 + $0x9c8] sm:$0xff] }
 0x317   :  { %v3102_v5 = vmax.f32 %v2571_v30, %v3045_v26  ;;  %v9370_v26 = vld [vmem:[#allocation25_spill] sm:$0xff] }
 0x318   :  { %v4163_v54 = vmax.f32 %v3632_v4, %v4106_v0  ;;  %5743 = vmatmul.msk.f32.gmra.mxu0 %vm77_vm0, %v5686_v63  ;;  %5632 = vmatmul.msk.f32.gmra.mxu3 %vm77_vm0, %v5575_v38  ;;  %v4638_v35 = vmax.f32 %v4488_v56, 0.0  ;;  %v5687_v0 = vld [vmem:[%s9262_s0 + $0xf18] sm:$0xff]  ;;  %v2370_v63 = vadd.f32 %v8118_v57, %v6736_v10  ;;  %v5460_v10 = vld [vmem:[%s9262_s0 + $0xb90] sm:$0xff]  ;;  %v4108_v56 = vmax.f32 %v3960_v22, 0.0 }
 0x319   :  { %v3425_v32 = vpop.f32.mrf.mxu2 }
 0x31a   :  { %v4694_v24 = vmax.f32 %v4163_v54, %v4637_v50  ;;  %v3426_v12 = vadd.f32 %v8118_v57, %v3425_v32  ;;  %v2897_v58 = vpop.f32.mrf.mxu1  ;;  %v2572_v54 = vmax.f32 %v9370_v26, %v2515_v52 }
 0x31b   :  { %v2898_v16 = vadd.f32 %v8118_v57, %v2897_v58  ;;  %v8200_v46 = vpop.f32.mrf.mxu3 }
 0x31c   :  { %4752 = vst.msk [vmem:[%s9264_s3 + $0x48] sm:$0xff] %vm4742_vm1, %v4694_v24  ;;  %v3576_v36 = vmax.f32 %v3426_v12, 0.0 }
 0x31d   :  { %5402 = vmatmul.msk.f32.gmra.mxu1 %vm77_vm0, %v5345_v18  ;;  %v4490_v27 = vpop.f32.mrf.mxu0  ;;  %v3046_v4 = vmax.f32 %v2898_v16, 0.0  ;;  %v2516_v18 = vmax.f32 %v2370_v63, 0.0  ;;  %v5688_v16 = vld [vmem:[%s9262_s0 + $0xf20] sm:$0xff] }
 0x31e   :  { %v3633_v62 = vmax.f32 %v3102_v5, %v3576_v36  ;;  %5516 = vmatmul.msk.f32.gmra.mxu2 %vm77_vm0, %v5459_v44  ;;  %v4491_v32 = vadd.f32 %v8118_v57, %v4490_v27  ;;  %v2373_v27 = vadd.f32 %v8118_v57, %v6761_v28  ;;  %v5461_v28 = vld [vmem:[%s9262_s0 + $0xb98] sm:$0xff] }
 0x31f   :  { %v3103_v30 = vmax.f32 %v2572_v54, %v3046_v4 }
 0x320   :  { %v4164_v50 = vmax.f32 %v3633_v62, %v4107_v8  ;;  %5744 = vmatmul.msk.f32.gmra.mxu0 %vm77_vm0, %v5687_v0  ;;  %5633 = vmatmul.msk.f32.gmra.mxu3 %vm77_vm0, %v5576_v6  ;;  %v4639_v5 = vmax.f32 %v4491_v32, 0.0  ;;  %v5577_v8 = vld [vmem:[%s9262_s0 + $0xd70] sm:$0xff]  ;;  %v9371_v6 = vld [vmem:[#allocation26_spill] sm:$0xff] }
 0x321   :  { %v3428_v38 = vpop.f32.mrf.mxu2  ;;  %v2573_v4 = vmax.f32 %v9371_v6, %v2516_v18 }
 0x322   :  { %v4695_v59 = vmax.f32 %v4164_v50, %v4638_v35  ;;  %v3429_v48 = vadd.f32 %v8118_v57, %v3428_v38  ;;  %v2900_v14 = vpop.f32.mrf.mxu1  ;;  %v3963_v35 = vadd.f32 %v8118_v57, %v8170_v20  ;;  %v5347_v20 = vld [vmem:[%s9262_s0 + $0x9d0] sm:$0xff] }
 0x323   :  { %v2901_v12 = vadd.f32 %v8118_v57, %v2900_v14  ;;  %v8230_v58 = vpop.f32.mrf.mxu3  ;;  %v2517_v14 = vmax.f32 %v2373_v27, 0.0 }
 0x324   :  { %4753 = vst.msk [vmem:[%s9264_s3 + $0x50] sm:$0xff] %vm4742_vm1, %v4695_v59  ;;  %v3577_v24 = vmax.f32 %v3429_v48, 0.0  ;;  %v4109_v48 = vmax.f32 %v3963_v35, 0.0 }
 0x325   :  { %5403 = vmatmul.msk.f32.gmra.mxu1 %vm77_vm0, %v5346_v40  ;;  %v4493_v36 = vpop.f32.mrf.mxu0  ;;  %v3047_v52 = vmax.f32 %v2901_v12, 0.0  ;;  %v5578_v12 = vld [vmem:[%s9262_s0 + $0xd78] sm:$0xff] }
 0x326   :  { %v3634_v44 = vmax.f32 %v3103_v30, %v3577_v24  ;;  %5517 = vmatmul.msk.f32.gmra.mxu2 %vm77_vm0, %v5460_v10  ;;  %v4494_v63 = vadd.f32 %v8118_v57, %v4493_v36  ;;  %v5689_v24 = vld [vmem:[%s9262_s0 + $0xf28] sm:$0xff] }
 0x327   :  { %v3104_v26 = vmax.f32 %v2573_v4, %v3047_v52 }
 0x328   :  { %v4165_v62 = vmax.f32 %v3634_v44, %v4108_v56  ;;  %5745 = vmatmul.msk.f32.gmra.mxu0 %vm77_vm0, %v5688_v16  ;;  %5634 = vmatmul.msk.f32.gmra.mxu3 %vm77_vm0, %v5577_v8  ;;  %v4640_v10 = vmax.f32 %v4494_v63, 0.0  ;;  %v3966_v44 = vadd.f32 %v8118_v57, %v8200_v46  ;;  %v9372_v16 = vld [vmem:[#allocation27_spill] sm:$0xff]  ;;  %v5348_v46 = vld [vmem:[%s9262_s0 + $0x9d8] sm:$0xff] }
 0x329   :  { %v3431_v0 = vpop.f32.mrf.mxu2  ;;  %v2574_v8 = vmax.f32 %v9372_v16, %v2517_v14  ;;  %v3969_v14 = vadd.f32 %v8118_v57, %v8230_v58  ;;  %v5349_v58 = vld [vmem:[%s9262_s0 + $0x9e0] sm:$0xff] }
 0x32a   :  { %v4696_v50 = vmax.f32 %v4165_v62, %v4639_v5  ;;  %v3432_v22 = vadd.f32 %v8118_v57, %v3431_v0  ;;  %v2903_v38 = vpop.f32.mrf.mxu1  ;;  %v2376_v5 = vadd.f32 %v8118_v57, %v6786_v42  ;;  %v5462_v42 = vld [vmem:[%s9262_s0 + $0xba0] sm:$0xff] }
 0x32b   :  { %v2904_v59 = vadd.f32 %v8118_v57, %v2903_v38  ;;  %v8260_v32 = vpop.f32.mrf.mxu3 }
 0x32c   :  { %4754 = vst.msk [vmem:[%s9264_s3 + $0x58] sm:$0xff] %vm4742_vm1, %v4696_v50  ;;  %v3578_v54 = vmax.f32 %v3432_v22, 0.0  ;;  %v4110_v50 = vmax.f32 %v3966_v44, 0.0  ;;  %v2518_v63 = vmax.f32 %v2376_v5, 0.0 }
 0x32d   :  { %5404 = vmatmul.msk.f32.gmra.mxu1 %vm77_vm0, %v5347_v20  ;;  %v4496_v30 = vpop.f32.mrf.mxu0  ;;  %v3048_v56 = vmax.f32 %v2904_v59, 0.0 }
 0x32e   :  { %v3635_v40 = vmax.f32 %v3104_v26, %v3578_v54  ;;  %5518 = vmatmul.msk.f32.gmra.mxu2 %vm77_vm0, %v5461_v28  ;;  %v4497_v35 = vadd.f32 %v8118_v57, %v4496_v30  ;;  %v5690_v26 = vld [vmem:[%s9262_s0 + $0xf30] sm:$0xff]  ;;  %v5579_v54 = vld [vmem:[%s9262_s0 + $0xd80] sm:$0xff] }
 0x32f   :  { %v3105_v0 = vmax.f32 %v2574_v8, %v3048_v56  ;;  %v9373_v30 = vld [vmem:[#allocation28_spill] sm:$0xff]  ;;  %v4111_v8 = vmax.f32 %v3969_v14, 0.0 }
 0x330   :  { %v4166_v18 = vmax.f32 %v3635_v40, %v4109_v48  ;;  %5746 = vmatmul.msk.f32.gmra.mxu0 %vm77_vm0, %v5689_v24  ;;  %5635 = vmatmul.msk.f32.gmra.mxu3 %vm77_vm0, %v5578_v12  ;;  %v4641_v20 = vmax.f32 %v4497_v35, 0.0  ;;  %v2379_v40 = vadd.f32 %v8118_v57, %v6811_v34  ;;  %v2575_v24 = vmax.f32 %v9373_v30, %v2518_v63  ;;  %v5463_v34 = vld [vmem:[%s9262_s0 + $0xba8] sm:$0xff] }
 0x331   :  { %v3434_v36 = vpop.f32.mrf.mxu2  ;;  %v2382_v63 = vadd.f32 %v8118_v57, %v6836_v60  ;;  %v5464_v60 = vld [vmem:[%s9262_s0 + $0xbb0] sm:$0xff] }
 0x332   :  { %v4697_v52 = vmax.f32 %v4166_v18, %v4640_v10  ;;  %v3435_v62 = vadd.f32 %v8118_v57, %v3434_v36  ;;  %v2906_v27 = vpop.f32.mrf.mxu1 }
 0x333   :  { %v2907_v4 = vadd.f32 %v8118_v57, %v2906_v27  ;;  %v8290_v22 = vpop.f32.mrf.mxu3 }
 0x334   :  { %4755 = vst.msk [vmem:[%s9264_s3 + $0x60] sm:$0xff] %vm4742_vm1, %v4697_v52  ;;  %v3579_v6 = vmax.f32 %v3435_v62, 0.0  ;;  %v2519_v62 = vmax.f32 %v2379_v40, 0.0 }
 0x335   :  { %5405 = vmatmul.msk.f32.gmra.mxu1 %vm77_vm0, %v5348_v46  ;;  %v4499_v28 = vpop.f32.mrf.mxu0  ;;  %v3049_v59 = vmax.f32 %v2907_v4, 0.0 }
 0x336   :  { %v3636_v38 = vmax.f32 %v3105_v0, %v3579_v6  ;;  %5519 = vmatmul.msk.f32.gmra.mxu2 %vm77_vm0, %v5462_v42  ;;  %v4500_v18 = vadd.f32 %v8118_v57, %v4499_v28  ;;  %v5691_v42 = vld [vmem:[%s9262_s0 + $0xf38] sm:$0xff]  ;;  %v5580_v0 = vld [vmem:[%s9262_s0 + $0xd88] sm:$0xff] }
 0x337   :  { %v3106_v5 = vmax.f32 %v2575_v24, %v3049_v59 }
 0x338   :  { %v4167_v48 = vmax.f32 %v3636_v38, %v4110_v50  ;;  %5747 = vmatmul.msk.f32.gmra.mxu0 %vm77_vm0, %v5690_v26  ;;  %5636 = vmatmul.msk.f32.gmra.mxu3 %vm77_vm0, %v5579_v54  ;;  %v4642_v27 = vmax.f32 %v4500_v18, 0.0  ;;  %v3972_v50 = vadd.f32 %v8118_v57, %v8260_v32  ;;  %v5350_v32 = vld [vmem:[%s9262_s0 + $0x9e8] sm:$0xff] }
 0x339   :  { %v3437_v10 = vpop.f32.mrf.mxu2 }
 0x33a   :  { %v4698_v12 = vmax.f32 %v4167_v48, %v4641_v20  ;;  %v3438_v56 = vadd.f32 %v8118_v57, %v3437_v10  ;;  %v2909_v44 = vpop.f32.mrf.mxu1  ;;  %v9374_v20 = vld [vmem:[#allocation29_spill] sm:$0xff]  ;;  %v4112_v30 = vmax.f32 %v3972_v50, 0.0 }
 0x33b   :  { %v2910_v16 = vadd.f32 %v8118_v57, %v2909_v44  ;;  %v8320_v52 = vpop.f32.mrf.mxu3  ;;  %v2576_v28 = vmax.f32 %v9374_v20, %v2519_v62 }
 0x33c   :  { %4756 = vst.msk [vmem:[%s9264_s3 + $0x68] sm:$0xff] %vm4742_vm1, %v4698_v12  ;;  %v3580_v36 = vmax.f32 %v3438_v56, 0.0  ;;  %v2520_v12 = vmax.f32 %v2382_v63, 0.0 }
 0x33d   :  { %5406 = vmatmul.msk.f32.gmra.mxu1 %vm77_vm0, %v5349_v58  ;;  %v4502_v46 = vpop.f32.mrf.mxu0  ;;  %v3050_v6 = vmax.f32 %v2910_v16, 0.0  ;;  %v5692_v58 = vld [vmem:[%s9262_s0 + $0xf40] sm:$0xff]  ;;  %v3975_v16 = vadd.f32 %v8118_v57, %v8290_v22  ;;  %v5351_v22 = vld [vmem:[%s9262_s0 + $0x9f0] sm:$0xff] }
 0x33e   :  { %v3637_v35 = vmax.f32 %v3106_v5, %v3580_v36  ;;  %5520 = vmatmul.msk.f32.gmra.mxu2 %vm77_vm0, %v5463_v34  ;;  %v4503_v59 = vadd.f32 %v8118_v57, %v4502_v46  ;;  %v5581_v34 = vld [vmem:[%s9262_s0 + $0xd90] sm:$0xff] }
 0x33f   :  { %v3107_v14 = vmax.f32 %v2576_v28, %v3050_v6 }
 0x340   :  { %v4168_v4 = vmax.f32 %v3637_v35, %v4111_v8  ;;  %5748 = vmatmul.msk.f32.gmra.mxu0 %vm77_vm0, %v5691_v42  ;;  %5637 = vmatmul.msk.f32.gmra.mxu3 %vm77_vm0, %v5580_v0  ;;  %v4643_v18 = vmax.f32 %v4503_v59, 0.0  ;;  %v2385_v8 = vadd.f32 %v8118_v57, %v6861_v3  ;;  %v9375_v35 = vld [vmem:[#allocation30_spill] sm:$0xff]  ;;  %v5465_v3 = vld [vmem:[%s9262_s0 + $0xbb8] sm:$0xff] }
 0x341   :  { %v3440_v38 = vpop.f32.mrf.mxu2 }
 0x342   :  { %v4699_v26 = vmax.f32 %v4168_v4, %v4642_v27  ;;  %v3441_v54 = vadd.f32 %v8118_v57, %v3440_v38  ;;  %v2912_v48 = vpop.f32.mrf.mxu1  ;;  %v2577_v27 = vmax.f32 %v9375_v35, %v2520_v12  ;;  %v4113_v38 = vmax.f32 %v3975_v16, 0.0  ;;  %v9376_v12 = vld [vmem:[#allocation31_spill] sm:$0xff] }
 0x343   :  { %v2913_v10 = vadd.f32 %v8118_v57, %v2912_v48  ;;  %v8350_v24 = vpop.f32.mrf.mxu3  ;;  %v2521_v28 = vmax.f32 %v2385_v8, 0.0  ;;  %v5693_v48 = vld [vmem:[%s9262_s0 + $0xf48] sm:$0xff] }
 0x344   :  { %4757 = vst.msk [vmem:[%s9264_s3 + $0x70] sm:$0xff] %vm4742_vm1, %v4699_v26  ;;  %v3581_v40 = vmax.f32 %v3441_v54, 0.0 }
 0x345   :  { %5407 = vmatmul.msk.f32.gmra.mxu1 %vm77_vm0, %v5350_v32  ;;  %v4505_v44 = vpop.f32.mrf.mxu0  ;;  %v3051_v5 = vmax.f32 %v2913_v10, 0.0  ;;  %v5582_v32 = vld [vmem:[%s9262_s0 + $0xd98] sm:$0xff]  ;;  %v2388_v10 = vadd.f32 %v8118_v57, %v6886_v13  ;;  %v5466_v13 = vld [vmem:[%s9262_s0 + $0xbc0] sm:$0xff] }
 0x346   :  { %v3638_v56 = vmax.f32 %v3107_v14, %v3581_v40  ;;  %5521 = vmatmul.msk.f32.gmra.mxu2 %vm77_vm0, %v5464_v60  ;;  %v4506_v0 = vadd.f32 %v8118_v57, %v4505_v44  ;;  %v3978_v40 = vadd.f32 %v8118_v57, %v8320_v52  ;;  %v5352_v52 = vld [vmem:[%s9262_s0 + $0x9f8] sm:$0xff] }
 0x347   :  { %v3108_v4 = vmax.f32 %v2577_v27, %v3051_v5  ;;  %v2522_v35 = vmax.f32 %v2388_v10, 0.0 }
 0x348   :  { %v4169_v36 = vmax.f32 %v3638_v56, %v4112_v30  ;;  %5749 = vmatmul.msk.f32.gmra.mxu0 %vm77_vm0, %v5692_v58  ;;  %5638 = vmatmul.msk.f32.gmra.mxu3 %vm77_vm0, %v5581_v34  ;;  %v4644_v54 = vmax.f32 %v4506_v0, 0.0  ;;  %v2578_v56 = vmax.f32 %v9376_v12, %v2521_v28  ;;  %v4114_v8 = vmax.f32 %v3978_v40, 0.0  ;;  %v5694_v0 = vld [vmem:[%s9262_s0 + $0xf50] sm:$0xff] }
 0x349   :  { %v3443_v62 = vpop.f32.mrf.mxu2 }
 0x34a   :  { %v4700_v46 = vmax.f32 %v4169_v36, %v4643_v18  ;;  %v3444_v42 = vadd.f32 %v8118_v57, %v3443_v62  ;;  %v2915_v6 = vpop.f32.mrf.mxu1 }
 0x34b   :  { %v2916_v63 = vadd.f32 %v8118_v57, %v2915_v6  ;;  %v8380_v20 = vpop.f32.mrf.mxu3  ;;  %v5583_v6 = vld [vmem:[%s9262_s0 + $0xda0] sm:$0xff] }
 0x34c   :  { %4758 = vst.msk [vmem:[%s9264_s3 + $0x78] sm:$0xff] %vm4742_vm1, %v4700_v46  ;;  %v3582_v50 = vmax.f32 %v3444_v42, 0.0 }
 0x34d   :  { %5408 = vmatmul.msk.f32.gmra.mxu1 %vm77_vm0, %v5351_v22  ;;  %v4508_v59 = vpop.f32.mrf.mxu0  ;;  %v3052_v60 = vmax.f32 %v2916_v63, 0.0 }
 0x34e   :  { %v3639_v26 = vmax.f32 %v3108_v4, %v3582_v50  ;;  %5522 = vmatmul.msk.f32.gmra.mxu2 %vm77_vm0, %v5465_v3  ;;  %v4509_v58 = vadd.f32 %v8118_v57, %v4508_v59  ;;  %v3981_v4 = vadd.f32 %v8118_v57, %v8350_v24  ;;  %v2391_v50 = vadd.f32 %v8118_v57, %v6911_v21  ;;  %v5353_v24 = vld [vmem:[%s9262_s0 + $0xa00] sm:$0xff]  ;;  %v5467_v21 = vld [vmem:[%s9262_s0 + $0xbc8] sm:$0xff] }
 0x34f   :  { %v3109_v5 = vmax.f32 %v2578_v56, %v3052_v60 }
 0x350   :  { %v4170_v14 = vmax.f32 %v3639_v26, %v4113_v38  ;;  %5750 = vmatmul.msk.f32.gmra.mxu0 %vm77_vm0, %v5693_v48  ;;  %5639 = vmatmul.msk.f32.gmra.mxu3 %vm77_vm0, %v5582_v32  ;;  %v4645_v46 = vmax.f32 %v4509_v58, 0.0  ;;  %v9377_v38 = vld [vmem:[#allocation32_spill] sm:$0xff]  ;;  %v4115_v40 = vmax.f32 %v3981_v4, 0.0  ;;  %v5584_v58 = vld [vmem:[%s9262_s0 + $0xda8] sm:$0xff] }
 0x351   :  { %v3446_v30 = vpop.f32.mrf.mxu2  ;;  %v2579_v28 = vmax.f32 %v9377_v38, %v2522_v35 }
 0x352   :  { %v4701_v18 = vmax.f32 %v4170_v14, %v4644_v54  ;;  %v3447_v44 = vadd.f32 %v8118_v57, %v3446_v30  ;;  %v2918_v34 = vpop.f32.mrf.mxu1  ;;  %v2523_v30 = vmax.f32 %v2391_v50, 0.0 }
 0x353   :  { %v2919_v16 = vadd.f32 %v8118_v57, %v2918_v34  ;;  %v8410_v62 = vpop.f32.mrf.mxu3 }
 0x354   :  { %4759 = vst.msk [vmem:[%s9264_s3 + $0x80] sm:$0xff] %vm4742_vm1, %v4701_v18  ;;  %v3583_v36 = vmax.f32 %v3447_v44, 0.0  ;;  %v5695_v44 = vld [vmem:[%s9262_s0 + $0xf58] sm:$0xff] }
 0x355   :  { %5409 = vmatmul.msk.f32.gmra.mxu1 %vm77_vm0, %v5352_v52  ;;  %v4511_v42 = vpop.f32.mrf.mxu0  ;;  %v3053_v22 = vmax.f32 %v2919_v16, 0.0  ;;  %v9378_v16 = vld [vmem:[#allocation33_spill] sm:$0xff] }
 0x356   :  { %v3640_v27 = vmax.f32 %v3109_v5, %v3583_v36  ;;  %5523 = vmatmul.msk.f32.gmra.mxu2 %vm77_vm0, %v5466_v13  ;;  %v4512_v59 = vadd.f32 %v8118_v57, %v4511_v42  ;;  %v3984_v13 = vadd.f32 %v8118_v57, %v8380_v20  ;;  %v2394_v5 = vadd.f32 %v8118_v57, %v6936_v29  ;;  %v5354_v20 = vld [vmem:[%s9262_s0 + $0xa08] sm:$0xff]  ;;  %v5468_v29 = vld [vmem:[%s9262_s0 + $0xbd0] sm:$0xff] }
 0x357   :  { %v3110_v32 = vmax.f32 %v2579_v28, %v3053_v22 }
 0x358   :  { %v4171_v3 = vmax.f32 %v3640_v27, %v4114_v8  ;;  %5751 = vmatmul.msk.f32.gmra.mxu0 %vm77_vm0, %v5694_v0  ;;  %5640 = vmatmul.msk.f32.gmra.mxu3 %vm77_vm0, %v5583_v6  ;;  %v4646_v56 = vmax.f32 %v4512_v59, 0.0  ;;  %v2580_v8 = vmax.f32 %v9378_v16, %v2523_v30  ;;  %v2524_v50 = vmax.f32 %v2394_v5, 0.0 }
 0x359   :  { %v3449_v63 = vpop.f32.mrf.mxu2 }
 0x35a   :  { %v4702_v26 = vmax.f32 %v4171_v3, %v4645_v46  ;;  %v3450_v54 = vadd.f32 %v8118_v57, %v3449_v63  ;;  %v2921_v48 = vpop.f32.mrf.mxu1  ;;  %v4116_v3 = vmax.f32 %v3984_v13, 0.0 }
 0x35b   :  { %v2922_v14 = vadd.f32 %v8118_v57, %v2921_v48  ;;  %v8440_v10 = vpop.f32.mrf.mxu3 }
 0x35c   :  { %4760 = vst.msk [vmem:[%s9264_s3 + $0x88] sm:$0xff] %vm4742_vm1, %v4702_v26  ;;  %v3584_v60 = vmax.f32 %v3450_v54, 0.0  ;;  %v5696_v26 = vld [vmem:[%s9262_s0 + $0xf60] sm:$0xff]  ;;  %v5585_v54 = vld [vmem:[%s9262_s0 + $0xdb0] sm:$0xff] }
 0x35d   :  { %5410 = vmatmul.msk.f32.gmra.mxu1 %vm77_vm0, %v5353_v24  ;;  %v4514_v18 = vpop.f32.mrf.mxu0  ;;  %v3054_v34 = vmax.f32 %v2922_v14, 0.0  ;;  %v3987_v24 = vadd.f32 %v8118_v57, %v8410_v62  ;;  %v5355_v62 = vld [vmem:[%s9262_s0 + $0xa10] sm:$0xff] }
 0x35e   :  { %v3641_v12 = vmax.f32 %v3110_v32, %v3584_v60  ;;  %5524 = vmatmul.msk.f32.gmra.mxu2 %vm77_vm0, %v5467_v21  ;;  %v4515_v46 = vadd.f32 %v8118_v57, %v4514_v18  ;;  %v2397_v21 = vadd.f32 %v8118_v57, %v6961_v37  ;;  %v9379_v60 = vld [vmem:[#allocation34_spill] sm:$0xff]  ;;  %v5469_v37 = vld [vmem:[%s9262_s0 + $0xbd8] sm:$0xff] }
 0x35f   :  { %v3111_v0 = vmax.f32 %v2580_v8, %v3054_v34  ;;  %v2581_v14 = vmax.f32 %v9379_v60, %v2524_v50  ;;  %v4117_v34 = vmax.f32 %v3987_v24, 0.0  ;;  %v5697_v8 = vld [vmem:[%s9262_s0 + $0xf68] sm:$0xff]  ;;  %v5698_v60 = vld [vmem:[%s9262_s0 + $0xf70] sm:$0xff] }
 0x360   :  { %v4172_v52 = vmax.f32 %v3641_v12, %v4115_v40  ;;  %5752 = vmatmul.msk.f32.gmra.mxu0 %vm77_vm0, %v5695_v44  ;;  %5641 = vmatmul.msk.f32.gmra.mxu3 %vm77_vm0, %v5584_v58  ;;  %v4647_v38 = vmax.f32 %v4515_v46, 0.0  ;;  %v2525_v13 = vmax.f32 %v2397_v21, 0.0 }
 0x361   :  { %v3452_v36 = vpop.f32.mrf.mxu2 }
 0x362   :  { %v4703_v35 = vmax.f32 %v4172_v52, %v4646_v56  ;;  %v3453_v27 = vadd.f32 %v8118_v57, %v3452_v36  ;;  %v2924_v42 = vpop.f32.mrf.mxu1 }
 0x363   :  { %v2925_v22 = vadd.f32 %v8118_v57, %v2924_v42  ;;  %v8470_v4 = vpop.f32.mrf.mxu3  ;;  %v3990_v42 = vadd.f32 %v8118_v57, %v8440_v10  ;;  %v5356_v10 = vld [vmem:[%s9262_s0 + $0xa18] sm:$0xff] }
 0x364   :  { %4761 = vst.msk [vmem:[%s9264_s3 + $0x90] sm:$0xff] %vm4742_vm1, %v4703_v35  ;;  %v3585_v6 = vmax.f32 %v3453_v27, 0.0  ;;  %v5586_v35 = vld [vmem:[%s9262_s0 + $0xdb8] sm:$0xff] }
 0x365   :  { %5411 = vmatmul.msk.f32.gmra.mxu1 %vm77_vm0, %v5354_v20  ;;  %v4517_v28 = vpop.f32.mrf.mxu0  ;;  %v3055_v59 = vmax.f32 %v2925_v22, 0.0  ;;  %v2400_v20 = vadd.f32 %v8118_v57, %v6986_v45  ;;  %v5470_v45 = vld [vmem:[%s9262_s0 + $0xbe0] sm:$0xff] }
 0x366   :  { %v3642_v63 = vmax.f32 %v3111_v0, %v3585_v6  ;;  %5525 = vmatmul.msk.f32.gmra.mxu2 %vm77_vm0, %v5468_v29  ;;  %v4518_v12 = vadd.f32 %v8118_v57, %v4517_v28  ;;  %v9380_v0 = vld [vmem:[#allocation35_spill] sm:$0xff] }
 0x367   :  { %v3112_v18 = vmax.f32 %v2581_v14, %v3055_v59  ;;  %v2582_v6 = vmax.f32 %v9380_v0, %v2525_v13  ;;  %v5587_v14 = vld [vmem:[%s9262_s0 + $0xdc0] sm:$0xff]  ;;  %v5588_v0 = vld [vmem:[%s9262_s0 + $0xdc8] sm:$0xff] }
 0x368   :  { %v4173_v48 = vmax.f32 %v3642_v63, %v4116_v3  ;;  %5753 = vmatmul.msk.f32.gmra.mxu0 %vm77_vm0, %v5696_v26  ;;  %5642 = vmatmul.msk.f32.gmra.mxu3 %vm77_vm0, %v5585_v54  ;;  %v4648_v36 = vmax.f32 %v4518_v12, 0.0  ;;  %v4118_v54 = vmax.f32 %v3990_v42, 0.0  ;;  %v3993_v12 = vadd.f32 %v8118_v57, %v8470_v4  ;;  %v5357_v4 = vld [vmem:[%s9262_s0 + $0xa20] sm:$0xff] }
 0x369   :  { %v3455_v32 = vpop.f32.mrf.mxu2 }
 0x36a   :  { %v4704_v40 = vmax.f32 %v4173_v48, %v4647_v38  ;;  %v3456_v30 = vadd.f32 %v8118_v57, %v3455_v32  ;;  %v2927_v56 = vpop.f32.mrf.mxu1  ;;  %v2526_v48 = vmax.f32 %v2400_v20, 0.0 }
 0x36b   :  { %v2928_v58 = vadd.f32 %v8118_v57, %v2927_v56  ;;  %v8500_v52 = vpop.f32.mrf.mxu3  ;;  %v2403_v56 = vadd.f32 %v8118_v57, %v7016_v53  ;;  %v5471_v53 = vld [vmem:[%s9262_s0 + $0xbe8] sm:$0xff] }
 0x36c   :  { %4762 = vst.msk [vmem:[%s9264_s3 + $0x98] sm:$0xff] %vm4742_vm1, %v4704_v40  ;;  %v3586_v44 = vmax.f32 %v3456_v30, 0.0 }
 0x36d   :  { %5412 = vmatmul.msk.f32.gmra.mxu1 %vm77_vm0, %v5355_v62  ;;  %v4520_v16 = vpop.f32.mrf.mxu0  ;;  %v3056_v27 = vmax.f32 %v2928_v58, 0.0 }
 0x36e   :  { %v3643_v5 = vmax.f32 %v3112_v18, %v3586_v44  ;;  %5526 = vmatmul.msk.f32.gmra.mxu2 %vm77_vm0, %v5469_v37  ;;  %v4521_v50 = vadd.f32 %v8118_v57, %v4520_v16  ;;  %v9381_v37 = vld [vmem:[#allocation36_spill] sm:$0xff] }
 0x36f   :  { %v3113_v38 = vmax.f32 %v2582_v6, %v3056_v27  ;;  %v2583_v18 = vmax.f32 %v9381_v37, %v2526_v48  ;;  %v2527_v27 = vmax.f32 %v2403_v56, 0.0  ;;  %v5700_v56 = vld [vmem:[%s9262_s0 + $0xf80] sm:$0xff] }
 0x370   :  { %v4174_v46 = vmax.f32 %v3643_v5, %v4117_v34  ;;  %5754 = vmatmul.msk.f32.gmra.mxu0 %vm77_vm0, %v5697_v8  ;;  %5643 = vmatmul.msk.f32.gmra.mxu3 %vm77_vm0, %v5586_v35  ;;  %v4649_v21 = vmax.f32 %v4521_v50, 0.0  ;;  %v4119_v8 = vmax.f32 %v3993_v12, 0.0  ;;  %v2406_v50 = vadd.f32 %v8118_v57, %v7041_v61  ;;  %v5472_v61 = vld [vmem:[%s9262_s0 + $0xbf0] sm:$0xff] }
 0x371   :  { %v3458_v29 = vpop.f32.mrf.mxu2 }
 0x372   :  { %v4705_v22 = vmax.f32 %v4174_v46, %v4648_v36  ;;  %v3459_v3 = vadd.f32 %v8118_v57, %v3458_v29  ;;  %v2930_v63 = vpop.f32.mrf.mxu1  ;;  %v5699_v29 = vld [vmem:[%s9262_s0 + $0xf78] sm:$0xff] }
 0x373   :  { %v2931_v26 = vadd.f32 %v8118_v57, %v2930_v63  ;;  %v8530_v59 = vpop.f32.mrf.mxu3 }
 0x374   :  { %4763 = vst.msk [vmem:[%s9264_s3 + $0xa0] sm:$0xff] %vm4742_vm1, %v4705_v22  ;;  %v3587_v28 = vmax.f32 %v3459_v3, 0.0  ;;  %v3996_v3 = vadd.f32 %v8118_v57, %v8500_v52  ;;  %v5358_v52 = vld [vmem:[%s9262_s0 + $0xa28] sm:$0xff] }
 0x375   :  { %5413 = vmatmul.msk.f32.gmra.mxu1 %vm77_vm0, %v5356_v10  ;;  %v4523_v32 = vpop.f32.mrf.mxu0  ;;  %v3057_v40 = vmax.f32 %v2931_v26, 0.0  ;;  %v9382_v10 = vld [vmem:[#allocation37_spill] sm:$0xff] }
 0x376   :  { %v3644_v24 = vmax.f32 %v3113_v38, %v3587_v28  ;;  %5527 = vmatmul.msk.f32.gmra.mxu2 %vm77_vm0, %v5470_v45  ;;  %v4524_v34 = vadd.f32 %v8118_v57, %v4523_v32  ;;  %v2584_v45 = vmax.f32 %v9382_v10, %v2527_v27  ;;  %v4120_v32 = vmax.f32 %v3996_v3, 0.0  ;;  %v5701_v3 = vld [vmem:[%s9262_s0 + $0xf88] sm:$0xff] }
 0x377   :  { %v3114_v5 = vmax.f32 %v2583_v18, %v3057_v40 }
 0x378   :  { %v4175_v30 = vmax.f32 %v3644_v24, %v4118_v54  ;;  %5755 = vmatmul.msk.f32.gmra.mxu0 %vm77_vm0, %v5698_v60  ;;  %5644 = vmatmul.msk.f32.gmra.mxu3 %vm77_vm0, %v5587_v14  ;;  %v4650_v42 = vmax.f32 %v4524_v34, 0.0  ;;  %v2528_v14 = vmax.f32 %v2406_v50, 0.0  ;;  %v5590_v50 = vld [vmem:[%s9262_s0 + $0xdd8] sm:$0xff] }
 0x379   :  { %v3461_v62 = vpop.f32.mrf.mxu2 }
 0x37a   :  { %v4706_v44 = vmax.f32 %v4175_v30, %v4649_v21  ;;  %v3462_v58 = vadd.f32 %v8118_v57, %v3461_v62  ;;  %v2933_v13 = vpop.f32.mrf.mxu1  ;;  %v5589_v62 = vld [vmem:[%s9262_s0 + $0xdd0] sm:$0xff] }
 0x37b   :  { %v2934_v16 = vadd.f32 %v8118_v57, %v2933_v13  ;;  %v8560_v35 = vpop.f32.mrf.mxu3  ;;  %v9383_v13 = vld [vmem:[#allocation38_spill] sm:$0xff] }
 0x37c   :  { %4764 = vst.msk [vmem:[%s9264_s3 + $0xa8] sm:$0xff] %vm4742_vm1, %v4706_v44  ;;  %v3588_v36 = vmax.f32 %v3462_v58, 0.0  ;;  %v3999_v44 = vadd.f32 %v8118_v57, %v8530_v59  ;;  %v2409_v58 = vadd.f32 %v8118_v57, %v7066_v7  ;;  %v5359_v59 = vld [vmem:[%s9262_s0 + $0xa30] sm:$0xff]  ;;  %v5473_v7 = vld [vmem:[%s9262_s0 + $0xbf8] sm:$0xff] }
 0x37d   :  { %5414 = vmatmul.msk.f32.gmra.mxu1 %vm77_vm0, %v5357_v4  ;;  %v4526_v20 = vpop.f32.mrf.mxu0  ;;  %v3058_v6 = vmax.f32 %v2934_v16, 0.0  ;;  %v2585_v4 = vmax.f32 %v9383_v13, %v2528_v14 }
 0x37e   :  { %v3645_v46 = vmax.f32 %v3114_v5, %v3588_v36  ;;  %5528 = vmatmul.msk.f32.gmra.mxu2 %vm77_vm0, %v5471_v53  ;;  %v4527_v26 = vadd.f32 %v8118_v57, %v4526_v20 }
 0x37f   :  { %v3115_v48 = vmax.f32 %v2584_v45, %v3058_v6  ;;  %v4002_v45 = vadd.f32 %v8118_v57, %v8560_v35  ;;  %v5360_v35 = vld [vmem:[%s9262_s0 + $0xa38] sm:$0xff] }
 0x380   :  { %v4176_v22 = vmax.f32 %v3645_v46, %v4119_v8  ;;  %5756 = vmatmul.msk.f32.gmra.mxu0 %vm77_vm0, %v5699_v29  ;;  %5645 = vmatmul.msk.f32.gmra.mxu3 %vm77_vm0, %v5588_v0  ;;  %v4651_v30 = vmax.f32 %v4527_v26, 0.0  ;;  %v2529_v29 = vmax.f32 %v2409_v58, 0.0  ;;  %v9384_v26 = vld [vmem:[#allocation39_spill] sm:$0xff] }
 0x381   :  { %v3464_v63 = vpop.f32.mrf.mxu2 }
 0x382   :  { %v4707_v38 = vmax.f32 %v4176_v22, %v4650_v42  ;;  %v3465_v28 = vadd.f32 %v8118_v57, %v3464_v63  ;;  %v2936_v54 = vpop.f32.mrf.mxu1  ;;  %v4121_v42 = vmax.f32 %v3999_v44, 0.0  ;;  %v5591_v44 = vld [vmem:[%s9262_s0 + $0xde0] sm:$0xff] }
 0x383   :  { %v2937_v21 = vadd.f32 %v8118_v57, %v2936_v54  ;;  %v8590_v60 = vpop.f32.mrf.mxu3  ;;  %v2586_v54 = vmax.f32 %v9384_v26, %v2529_v29 }
 0x384   :  { %4765 = vst.msk [vmem:[%s9264_s3 + $0xb0] sm:$0xff] %vm4742_vm1, %v4707_v38  ;;  %v3589_v24 = vmax.f32 %v3465_v28, 0.0  ;;  %v2412_v38 = vadd.f32 %v8118_v57, %v7091_v23  ;;  %v5474_v23 = vld [vmem:[%s9262_s0 + $0xc00] sm:$0xff]  ;;  %v4005_v13 = vadd.f32 %v8118_v57, %v8590_v60 }
 0x385   :  { %5415 = vmatmul.msk.f32.gmra.mxu1 %vm77_vm0, %v5358_v52  ;;  %v4529_v12 = vpop.f32.mrf.mxu0  ;;  %v3059_v37 = vmax.f32 %v2937_v21, 0.0 }
 0x386   :  { %v3646_v40 = vmax.f32 %v3115_v48, %v3589_v24  ;;  %5529 = vmatmul.msk.f32.gmra.mxu2 %vm77_vm0, %v5472_v61  ;;  %v4530_v36 = vadd.f32 %v8118_v57, %v4529_v12  ;;  %v2530_v12 = vmax.f32 %v2412_v38, 0.0  ;;  %v4123_v29 = vmax.f32 %v4005_v13, 0.0 }
 0x387   :  { %v3116_v8 = vmax.f32 %v2585_v4, %v3059_v37  ;;  %v2415_v4 = vadd.f32 %v8118_v57, %v7116_v39  ;;  %v5361_v39 = vld [vmem:[%s9262_s0 + $0xa40] sm:$0xff] }
 0x388   :  { %v4177_v18 = vmax.f32 %v3646_v40, %v4120_v32  ;;  %5757 = vmatmul.msk.f32.gmra.mxu0 %vm77_vm0, %v5700_v56  ;;  %5646 = vmatmul.msk.f32.gmra.mxu3 %vm77_vm0, %v5589_v62  ;;  %v4652_v6 = vmax.f32 %v4530_v36, 0.0  ;;  %v4122_v40 = vmax.f32 %v4002_v45, 0.0 }
 0x389   :  { %v3467_v34 = vpop.f32.mrf.mxu2 }
 0x38a   :  { %v4708_v53 = vmax.f32 %v4177_v18, %v4651_v30  ;;  %v3468_v5 = vadd.f32 %v8118_v57, %v3467_v34  ;;  %v2939_v16 = vpop.f32.mrf.mxu1  ;;  %v5702_v18 = vld [vmem:[%s9262_s0 + $0xf90] sm:$0xff] }
 0x38b   :  { %v2940_v46 = vadd.f32 %v8118_v57, %v2939_v16  ;;  %v8620_v20 = vpop.f32.mrf.mxu3 }
 0x38c   :  { %4766 = vst.msk [vmem:[%s9264_s3 + $0xb8] sm:$0xff] %vm4742_vm1, %v4708_v53  ;;  %v3590_v27 = vmax.f32 %v3468_v5, 0.0  ;;  %v9385_v5 = vld [vmem:[#allocation40_spill] sm:$0xff] }
 0x38d   :  { %5416 = vmatmul.msk.f32.gmra.mxu1 %vm77_vm0, %v5359_v59  ;;  %v4532_v22 = vpop.f32.mrf.mxu0  ;;  %v3060_v63 = vmax.f32 %v2940_v46, 0.0  ;;  %v2587_v36 = vmax.f32 %v9385_v5, %v2530_v12 }
 0x38e   :  { %v3647_v0 = vmax.f32 %v3116_v8, %v3590_v27  ;;  %5530 = vmatmul.msk.f32.gmra.mxu2 %vm77_vm0, %v5473_v7  ;;  %v4533_v48 = vadd.f32 %v8118_v57, %v4532_v22  ;;  %v8671_v7 = vld [vmem:[%s9263_s2] ss:$0 sm:$0xff]  ;;  %v5475_v27 = vld [vmem:[%s9262_s0 + $0xc08] sm:$0xff] }
 0x38f   :  { %v3117_v21 = vmax.f32 %v2586_v54, %v3060_v63  ;;  %v5703_v63 = vld [vmem:[%s9262_s0 + $0xf98] sm:$0xff]  ;;  %v2418_v26 = vadd.f32 %v8671_v7, %v7141_v55  ;;  %v5476_v55 = vld [vmem:[%s9262_s0 + $0xc10] sm:$0xff] }
 0x390   :  { %v4178_v10 = vmax.f32 %v3647_v0, %v4121_v42  ;;  %5758 = vmatmul.msk.f32.gmra.mxu0 %vm77_vm0, %v5701_v3  ;;  %5647 = vmatmul.msk.f32.gmra.mxu3 %vm77_vm0, %v5590_v50  ;;  %v4653_v62 = vmax.f32 %v4533_v48, 0.0 }
 0x391   :  { %v3470_v28 = vpop.f32.mrf.mxu2 }
 0x392   :  { %v4709_v52 = vmax.f32 %v4178_v10, %v4652_v6  ;;  %v3471_v61 = vadd.f32 %v8118_v57, %v3470_v28  ;;  %v2942_v24 = vpop.f32.mrf.mxu1  ;;  %v2531_v6 = vmax.f32 %v2415_v4, 0.0  ;;  %v5592_v10 = vld [vmem:[%s9262_s0 + $0xde8] sm:$0xff]  ;;  %v4008_v28 = vadd.f32 %v8671_v7, %v8620_v20 }
 0x393   :  { %v2943_v14 = vadd.f32 %v8118_v57, %v2942_v24  ;;  %v8650_v30 = vpop.f32.mrf.mxu3  ;;  %v5362_v20 = vld [vmem:[%s9262_s0 + $0xa48] sm:$0xff] }
 0x394   :  { %4767 = vst.msk [vmem:[%s9264_s3 + $0xc0] sm:$0xff] %vm4742_vm1, %v4709_v52  ;;  %v3591_v32 = vmax.f32 %v3471_v61, 0.0  ;;  %v9386_v52 = vld [vmem:[#allocation41_spill] sm:$0xff]  ;;  %v4011_v4 = vadd.f32 %v8671_v7, %v8650_v30  ;;  %v5363_v30 = vld [vmem:[%s9262_s0 + $0xa50] sm:$0xff] }
 0x395   :  { %5417 = vmatmul.msk.f32.gmra.mxu1 %vm77_vm0, %v5360_v35  ;;  %v4535_v37 = vpop.f32.mrf.mxu0  ;;  %v3061_v58 = vmax.f32 %v2943_v14, 0.0  ;;  %v2588_v61 = vmax.f32 %v9386_v52, %v2531_v6  ;;  %v9388_v52 = vld [vmem:[#allocation43_spill] sm:$0xff] }
 0x396   :  { %v3648_v56 = vmax.f32 %v3117_v21, %v3591_v32  ;;  %5531 = vmatmul.msk.f32.gmra.mxu2 %vm77_vm0, %v5474_v23  ;;  %v4536_v60 = vadd.f32 %v8671_v7, %v4535_v37 }
 0x397   :  { %v3118_v46 = vmax.f32 %v2587_v36, %v3061_v58  ;;  %v5593_v58 = vld [vmem:[%s9262_s0 + $0xdf0] sm:$0xff]  ;;  %v9387_v36 = vld [vmem:[#allocation42_spill] sm:$0xff] }
 0x398   :  { %v4179_v34 = vmax.f32 %v3648_v56, %v4122_v40  ;;  %5759 = vmatmul.msk.f32.gmra.mxu0 %vm77_vm0, %v5702_v18  ;;  %5648 = vmatmul.msk.f32.gmra.mxu3 %vm77_vm0, %v5591_v44  ;;  %v4654_v3 = vmax.f32 %v4536_v60, 0.0  ;;  %v4124_v40 = vmax.f32 %v4008_v28, 0.0  ;;  %v2532_v56 = vmax.f32 %v2418_v26, 0.0  ;;  %v5704_v44 = vld [vmem:[%s9262_s0 + $0xfa0] sm:$0xff] }
 0x399   :  { %v3473_v53 = vpop.f32.mrf.mxu2  ;;  %v2424_v26 = vadd.f32 %v8671_v7, %v7191_v43  ;;  %v5478_v43 = vld [vmem:[%s9262_s0 + $0xc20] sm:$0xff] }
 0x39a   :  { %v4710_v16 = vmax.f32 %v4179_v34, %v4653_v62  ;;  %v3474_v59 = vadd.f32 %v8118_v57, %v3473_v53  ;;  %v2945_v8 = vpop.f32.mrf.mxu1  ;;  %v2421_v53 = vadd.f32 %v8671_v7, %v7166_v11  ;;  %v5477_v11 = vld [vmem:[%s9262_s0 + $0xc18] sm:$0xff] }
 0x39b   :  { %v2946_v42 = vadd.f32 %v8671_v7, %v2945_v8  ;;  %v8685_v0 = vpop.f32.mrf.mxu3 }
 0x39c   :  { %4768 = vst.msk [vmem:[%s9264_s3 + $0xc8] sm:$0xff] %vm4742_vm1, %v4710_v16  ;;  %v3592_v57 = vmax.f32 %v3474_v59, 0.0  ;;  %v2589_v16 = vmax.f32 %v9387_v36, %v2532_v56  ;;  %v2533_v6 = vmax.f32 %v2421_v53, 0.0  ;;  %v4014_v28 = vadd.f32 %v8671_v7, %v8685_v0  ;;  %v5364_v0 = vld [vmem:[%s9262_s0 + $0xa58] sm:$0xff] }
 0x39d   :  { %5418 = vmatmul.msk.f32.gmra.mxu1 %vm77_vm0, %v5361_v39  ;;  %v4538_v50 = vpop.f32.mrf.mxu0  ;;  %v3062_v45 = vmax.f32 %v2946_v42, 0.0  ;;  %v4125_v42 = vmax.f32 %v4011_v4, 0.0  ;;  %v2427_v4 = vadd.f32 %v8671_v7, %v7216_v19  ;;  %v5479_v19 = vld [vmem:[%s9262_s0 + $0xc28] sm:$0xff] }
 0x39e   :  { %v3649_v22 = vmax.f32 %v3118_v46, %v3592_v57  ;;  %5532 = vmatmul.msk.f32.gmra.mxu2 %vm77_vm0, %v5475_v27  ;;  %v4539_v35 = vadd.f32 %v8671_v7, %v4538_v50 }
 0x39f   :  { %v3119_v21 = vmax.f32 %v2588_v61, %v3062_v45  ;;  %v2590_v61 = vmax.f32 %v9388_v52, %v2533_v6 }
 0x3a0   :  { %v4180_v38 = vmax.f32 %v3649_v22, %v4123_v29  ;;  %5760 = vmatmul.msk.f32.gmra.mxu0 %vm77_vm0, %v5703_v63  ;;  %5649 = vmatmul.msk.f32.gmra.mxu3 %vm77_vm0, %v5592_v10  ;;  %v4655_v37 = vmax.f32 %v4539_v35, 0.0  ;;  %v5705_v63 = vld [vmem:[%s9262_s0 + $0xfa8] sm:$0xff]  ;;  %v5594_v10 = vld [vmem:[%s9262_s0 + $0xdf8] sm:$0xff] }
 0x3a1   :  { %v3476_v54 = vpop.f32.mrf.mxu2 }
 0x3a2   :  { %v4711_v48 = vmax.f32 %v4180_v38, %v4654_v3  ;;  %v3477_v24 = vadd.f32 %v8671_v7, %v3476_v54  ;;  %v2948_v23 = vpop.f32.mrf.mxu1 }
 0x3a3   :  { %v2949_v14 = vadd.f32 %v8671_v7, %v2948_v23  ;;  %v8715_v12 = vpop.f32.mrf.mxu3 }
 0x3a4   :  { %4769 = vst.msk [vmem:[%s9264_s3 + $0xd0] sm:$0xff] %vm4742_vm1, %v4711_v48  ;;  %v3593_v32 = vmax.f32 %v3477_v24, 0.0 }
 0x3a5   :  { %5419 = vmatmul.msk.f32.gmra.mxu1 %vm77_vm0, %v5362_v20  ;;  %v4541_v18 = vpop.f32.mrf.mxu0  ;;  %v3063_v34 = vmax.f32 %v2949_v14, 0.0 }
 0x3a6   :  { %v3650_v62 = vmax.f32 %v3119_v21, %v3593_v32  ;;  %5533 = vmatmul.msk.f32.gmra.mxu2 %vm77_vm0, %v5476_v55  ;;  %v4542_v8 = vadd.f32 %v8671_v7, %v4541_v18  ;;  %v4126_v32 = vmax.f32 %v4014_v28, 0.0  ;;  %v5706_v18 = vld [vmem:[%s9262_s0 + $0xfb0] sm:$0xff] }
 0x3a7   :  { %v3120_v27 = vmax.f32 %v2589_v16, %v3063_v34 }
 0x3a8   :  { %v4181_v13 = vmax.f32 %v3650_v62, %v4124_v40  ;;  %5761 = vmatmul.msk.f32.gmra.mxu0 %vm77_vm0, %v5704_v44  ;;  %5650 = vmatmul.msk.f32.gmra.mxu3 %vm77_vm0, %v5593_v58  ;;  %v4656_v3 = vmax.f32 %v4542_v8, 0.0  ;;  %v2534_v40 = vmax.f32 %v2424_v26, 0.0  ;;  %v5595_v44 = vld [vmem:[%s9262_s0 + $0xe00] sm:$0xff]  ;;  %v9390_v26 = vld [vmem:[#allocation45_spill] sm:$0xff] }
 0x3a9   :  { %v3479_v5 = vpop.f32.mrf.mxu2 }
 0x3aa   :  { %v4712_v59 = vmax.f32 %v4181_v13, %v4655_v37  ;;  %v3480_v60 = vadd.f32 %v8671_v7, %v3479_v5  ;;  %v2951_v39 = vpop.f32.mrf.mxu1  ;;  %v4017_v13 = vadd.f32 %v8671_v7, %v8715_v12  ;;  %v9389_v5 = vld [vmem:[#allocation44_spill] sm:$0xff]  ;;  %v5365_v12 = vld [vmem:[%s9262_s0 + $0xa60] sm:$0xff] }
 0x3ab   :  { %v2952_v57 = vadd.f32 %v8671_v7, %v2951_v39  ;;  %v8745_v29 = vpop.f32.mrf.mxu3  ;;  %v2591_v36 = vmax.f32 %v9389_v5, %v2534_v40 }
 0x3ac   :  { %4770 = vst.msk [vmem:[%s9264_s3 + $0xd8] sm:$0xff] %vm4742_vm1, %v4712_v59  ;;  %v3594_v46 = vmax.f32 %v3480_v60, 0.0 }
 0x3ad   :  { %5420 = vmatmul.msk.f32.gmra.mxu1 %vm77_vm0, %v5363_v30  ;;  %v4544_v50 = vpop.f32.mrf.mxu0  ;;  %v3064_v45 = vmax.f32 %v2952_v57, 0.0  ;;  %v2535_v57 = vmax.f32 %v2427_v4, 0.0 }
 0x3ae   :  { %v3651_v22 = vmax.f32 %v3120_v27, %v3594_v46  ;;  %5534 = vmatmul.msk.f32.gmra.mxu2 %vm77_vm0, %v5477_v11  ;;  %v4545_v35 = vadd.f32 %v8671_v7, %v4544_v50  ;;  %v4127_v27 = vmax.f32 %v4017_v13, 0.0  ;;  %v5596_v50 = vld [vmem:[%s9262_s0 + $0xe08] sm:$0xff]  ;;  %v9391_v13 = vld [vmem:[#allocation46_spill] sm:$0xff] }
 0x3af   :  { %v3121_v20 = vmax.f32 %v2590_v61, %v3064_v45  ;;  %v4020_v45 = vadd.f32 %v8671_v7, %v8745_v29  ;;  %v5366_v29 = vld [vmem:[%s9262_s0 + $0xa68] sm:$0xff] }
 0x3b0   :  { %v4182_v38 = vmax.f32 %v3651_v22, %v4125_v42  ;;  %5762 = vmatmul.msk.f32.gmra.mxu0 %vm77_vm0, %v5705_v63  ;;  %5651 = vmatmul.msk.f32.gmra.mxu3 %vm77_vm0, %v5594_v10  ;;  %v4657_v62 = vmax.f32 %v4545_v35, 0.0 }
 0x3b1   :  { %v3482_v54 = vpop.f32.mrf.mxu2 }
 0x3b2   :  { %v4713_v48 = vmax.f32 %v4182_v38, %v4656_v3  ;;  %v3483_v24 = vadd.f32 %v8671_v7, %v3482_v54  ;;  %v2954_v23 = vpop.f32.mrf.mxu1  ;;  %v5707_v3 = vld [vmem:[%s9262_s0 + $0xfb8] sm:$0xff]  ;;  %v2430_v38 = vadd.f32 %v8671_v7, %v7241_v2  ;;  %v2592_v54 = vmax.f32 %v9390_v26, %v2535_v57  ;;  %v5480_v2 = vld [vmem:[%s9262_s0 + $0xc30] sm:$0xff]  ;;  %v5709_v57 = vld [vmem:[%s9262_s0 + $0xfc8] sm:$0xff] }
 0x3b3   :  { %v2955_v21 = vadd.f32 %v8671_v7, %v2954_v23  ;;  %v8775_v14 = vpop.f32.mrf.mxu3 }
 0x3b4   :  { %4771 = vst.msk [vmem:[%s9264_s3 + $0xe0] sm:$0xff] %vm4742_vm1, %v4713_v48  ;;  %v3595_v55 = vmax.f32 %v3483_v24, 0.0 }
 0x3b5   :  { %5421 = vmatmul.msk.f32.gmra.mxu1 %vm77_vm0, %v5364_v0  ;;  %v4547_v37 = vpop.f32.mrf.mxu0  ;;  %v3065_v58 = vmax.f32 %v2955_v21, 0.0 }
 0x3b6   :  { %v3652_v56 = vmax.f32 %v3121_v20, %v3595_v55  ;;  %5535 = vmatmul.msk.f32.gmra.mxu2 %vm77_vm0, %v5478_v43  ;;  %v4548_v60 = vadd.f32 %v8671_v7, %v4547_v37  ;;  %v4128_v43 = vmax.f32 %v4020_v45, 0.0  ;;  %v2536_v55 = vmax.f32 %v2430_v38, 0.0 }
 0x3b7   :  { %v3122_v39 = vmax.f32 %v2591_v36, %v3065_v58  ;;  %v2433_v58 = vadd.f32 %v8671_v7, %v7266_v9  ;;  %v5481_v9 = vld [vmem:[%s9262_s0 + $0xc38] sm:$0xff] }
 0x3b8   :  { %v4183_v34 = vmax.f32 %v3652_v56, %v4126_v32  ;;  %5763 = vmatmul.msk.f32.gmra.mxu0 %vm77_vm0, %v5706_v18  ;;  %5652 = vmatmul.msk.f32.gmra.mxu3 %vm77_vm0, %v5595_v44  ;;  %v4658_v6 = vmax.f32 %v4548_v60, 0.0  ;;  %v5708_v56 = vld [vmem:[%s9262_s0 + $0xfc0] sm:$0xff]  ;;  %v4023_v44 = vadd.f32 %v8671_v7, %v8775_v14  ;;  %v2593_v4 = vmax.f32 %v9391_v13, %v2536_v55  ;;  %v5367_v14 = vld [vmem:[%s9262_s0 + $0xa70] sm:$0xff] }
 0x3b9   :  { %v3485_v53 = vpop.f32.mrf.mxu2  ;;  %v5599_v55 = vld [vmem:[%s9262_s0 + $0xe20] sm:$0xff] }
 0x3ba   :  { %v4714_v16 = vmax.f32 %v4183_v34, %v4657_v62  ;;  %v3486_v59 = vadd.f32 %v8671_v7, %v3485_v53  ;;  %v2957_v8 = vpop.f32.mrf.mxu1  ;;  %v5597_v62 = vld [vmem:[%s9262_s0 + $0xe10] sm:$0xff] }
 0x3bb   :  { %v2958_v11 = vadd.f32 %v8671_v7, %v2957_v8  ;;  %v8805_v46 = vpop.f32.mrf.mxu3 }
 0x3bc   :  { %4772 = vst.msk [vmem:[%s9264_s3 + $0xe8] sm:$0xff] %vm4742_vm1, %v4714_v16  ;;  %v3596_v30 = vmax.f32 %v3486_v59, 0.0 }
 0x3bd   :  { %5422 = vmatmul.msk.f32.gmra.mxu1 %vm77_vm0, %v5365_v12  ;;  %v4550_v22 = vpop.f32.mrf.mxu0  ;;  %v3066_v63 = vmax.f32 %v2958_v11, 0.0  ;;  %v4129_v12 = vmax.f32 %v4023_v44, 0.0 }
 0x3be   :  { %v3653_v42 = vmax.f32 %v3122_v39, %v3596_v30  ;;  %5536 = vmatmul.msk.f32.gmra.mxu2 %vm77_vm0, %v5479_v19  ;;  %v4551_v48 = vadd.f32 %v8671_v7, %v4550_v22  ;;  %v2537_v39 = vmax.f32 %v2433_v58, 0.0 }
 0x3bf   :  { %v3123_v35 = vmax.f32 %v2592_v54, %v3066_v63 }
 0x3c0   :  { %v4184_v10 = vmax.f32 %v3653_v42, %v4127_v27  ;;  %5764 = vmatmul.msk.f32.gmra.mxu0 %vm77_vm0, %v5707_v3  ;;  %5653 = vmatmul.msk.f32.gmra.mxu3 %vm77_vm0, %v5596_v50  ;;  %v4659_v32 = vmax.f32 %v4551_v48, 0.0  ;;  %v5598_v42 = vld [vmem:[%s9262_s0 + $0xe18] sm:$0xff]  ;;  %v4026_v3 = vadd.f32 %v8671_v7, %v8805_v46  ;;  %v2436_v50 = vadd.f32 %v8671_v7, %v7291_v17  ;;  %v5482_v17 = vld [vmem:[%s9262_s0 + $0xc40] sm:$0xff] }
 0x3c1   :  { %v3488_v28 = vpop.f32.mrf.mxu2  ;;  %v5368_v46 = vld [vmem:[%s9262_s0 + $0xa78] sm:$0xff] }
 0x3c2   :  { %v4715_v52 = vmax.f32 %v4184_v10, %v4658_v6  ;;  %v3489_v61 = vadd.f32 %v8671_v7, %v3488_v28  ;;  %v2960_v24 = vpop.f32.mrf.mxu1  ;;  %v9392_v10 = vld [vmem:[#allocation47_spill] sm:$0xff] }
 0x3c3   :  { %v2961_v0 = vadd.f32 %v8671_v7, %v2960_v24  ;;  %v8835_v20 = vpop.f32.mrf.mxu3  ;;  %v2594_v45 = vmax.f32 %v9392_v10, %v2537_v39  ;;  %v4130_v24 = vmax.f32 %v4026_v3, 0.0 }
 0x3c4   :  { %4773 = vst.msk [vmem:[%s9264_s3 + $0xf0] sm:$0xff] %vm4742_vm1, %v4715_v52  ;;  %v3597_v23 = vmax.f32 %v3489_v61, 0.0 }
 0x3c5   :  { %5423 = vmatmul.msk.f32.gmra.mxu1 %vm77_vm0, %v5366_v29  ;;  %v4553_v40 = vpop.f32.mrf.mxu0  ;;  %v3067_v37 = vmax.f32 %v2961_v0, 0.0 }
 0x3c6   :  { %v3654_v21 = vmax.f32 %v3123_v35, %v3597_v23  ;;  %5537 = vmatmul.msk.f32.gmra.mxu2 %vm77_vm0, %v5480_v2  ;;  %v4554_v36 = vadd.f32 %v8671_v7, %v4553_v40  ;;  %v2538_v2 = vmax.f32 %v2436_v50, 0.0  ;;  %v4029_v40 = vadd.f32 %v8671_v7, %v8835_v20  ;;  %v5369_v20 = vld [vmem:[%s9262_s0 + $0xa80] sm:$0xff] }
 0x3c7   :  { %v3124_v59 = vmax.f32 %v2593_v4, %v3067_v37  ;;  %v9393_v37 = vld [vmem:[#allocation48_spill] sm:$0xff] }
 0x3c8   :  { %v4185_v18 = vmax.f32 %v3654_v21, %v4128_v43  ;;  %5765 = vmatmul.msk.f32.gmra.mxu0 %vm77_vm0, %v5708_v56  ;;  %5654 = vmatmul.msk.f32.gmra.mxu3 %vm77_vm0, %v5597_v62  ;;  %v4660_v11 = vmax.f32 %v4554_v36, 0.0  ;;  %v5710_v43 = vld [vmem:[%s9262_s0 + $0xfd0] sm:$0xff]  ;;  %v2439_v56 = vadd.f32 %v8671_v7, %v7316_v25  ;;  %v5483_v25 = vld [vmem:[%s9262_s0 + $0xc48] sm:$0xff]  ;;  %v4131_v36 = vmax.f32 %v4029_v40, 0.0 }
 0x3c9   :  { %v3491_v34 = vpop.f32.mrf.mxu2 }
 0x3ca   :  { %v4716_v53 = vmax.f32 %v4185_v18, %v4659_v32  ;;  %v3492_v5 = vadd.f32 %v8671_v7, %v3491_v34  ;;  %v2963_v16 = vpop.f32.mrf.mxu1  ;;  %v2595_v18 = vmax.f32 %v9393_v37, %v2538_v2 }
 0x3cb   :  { %v2964_v8 = vadd.f32 %v8671_v7, %v2963_v16  ;;  %v8865_v19 = vpop.f32.mrf.mxu3 }
 0x3cc   :  { %4774 = vst.msk [vmem:[%s9264_s3 + $0xf8] sm:$0xff] %vm4742_vm1, %v4716_v53  ;;  %v3598_v60 = vmax.f32 %v3492_v5, 0.0 }
 0x3cd   :  { %5424 = vmatmul.msk.f32.gmra.mxu1 %vm77_vm0, %v5367_v14  ;;  %v4556_v27 = vpop.f32.mrf.mxu0  ;;  %v3068_v6 = vmax.f32 %v2964_v8, 0.0  ;;  %v2539_v14 = vmax.f32 %v2439_v56, 0.0  ;;  %v5711_v8 = vld [vmem:[%s9262_s0 + $0xfd8] sm:$0xff] }
 0x3ce   :  { %v3655_v30 = vmax.f32 %v3124_v59, %v3598_v60  ;;  %5538 = vmatmul.msk.f32.gmra.mxu2 %vm77_vm0, %v5481_v9  ;;  %v4557_v26 = vadd.f32 %v8671_v7, %v4556_v27  ;;  %v2442_v27 = vadd.f32 %v8671_v7, %v7341_v33  ;;  %v5484_v33 = vld [vmem:[%s9262_s0 + $0xc50] sm:$0xff] }
 0x3cf   :  { %v3125_v52 = vmax.f32 %v2594_v45, %v3068_v6 }
 0x3d0   :  { %v4186_v22 = vmax.f32 %v3655_v30, %v4129_v12  ;;  %5766 = vmatmul.msk.f32.gmra.mxu0 %vm77_vm0, %v5709_v57  ;;  %5655 = vmatmul.msk.f32.gmra.mxu3 %vm77_vm0, %v5598_v42  ;;  %v4661_v23 = vmax.f32 %v4557_v26, 0.0  ;;  %v5600_v12 = vld [vmem:[%s9262_s0 + $0xe28] sm:$0xff]  ;;  %v9394_v42 = vld [vmem:[#allocation49_spill] sm:$0xff] }
 0x3d1   :  { %v3494_v63 = vpop.f32.mrf.mxu2  ;;  %v2596_v6 = vmax.f32 %v9394_v42, %v2539_v14 }
 0x3d2   :  { %v4717_v38 = vmax.f32 %v4186_v22, %v4660_v11  ;;  %v3495_v28 = vadd.f32 %v8671_v7, %v3494_v63  ;;  %v2966_v54 = vpop.f32.mrf.mxu1  ;;  %v4032_v11 = vadd.f32 %v8671_v7, %v8865_v19  ;;  %v5370_v19 = vld [vmem:[%s9262_s0 + $0xa88] sm:$0xff] }
 0x3d3   :  { %v2967_v48 = vadd.f32 %v8671_v7, %v2966_v54  ;;  %v8895_v29 = vpop.f32.mrf.mxu3  ;;  %v2540_v54 = vmax.f32 %v2442_v27, 0.0 }
 0x3d4   :  { %4775 = vst.msk [vmem:[%s9264_s3 + $0x100] sm:$0xff] %vm4742_vm1, %v4717_v38  ;;  %v3599_v61 = vmax.f32 %v3495_v28, 0.0  ;;  %v4132_v28 = vmax.f32 %v4032_v11, 0.0 }
 0x3d5   :  { %5425 = vmatmul.msk.f32.gmra.mxu1 %vm77_vm0, %v5368_v46  ;;  %v4559_v0 = vpop.f32.mrf.mxu0  ;;  %v3069_v21 = vmax.f32 %v2967_v48, 0.0  ;;  %v5601_v48 = vld [vmem:[%s9262_s0 + $0xe30] sm:$0xff] }
 0x3d6   :  { %v3656_v35 = vmax.f32 %v3125_v52, %v3599_v61  ;;  %5539 = vmatmul.msk.f32.gmra.mxu2 %vm77_vm0, %v5482_v17  ;;  %v4560_v34 = vadd.f32 %v8671_v7, %v4559_v0  ;;  %v5712_v61 = vld [vmem:[%s9262_s0 + $0xfe0] sm:$0xff] }
 0x3d7   :  { %v3126_v4 = vmax.f32 %v2595_v18, %v3069_v21 }
 0x3d8   :  { %v4187_v32 = vmax.f32 %v3656_v35, %v4130_v24  ;;  %5767 = vmatmul.msk.f32.gmra.mxu0 %vm77_vm0, %v5710_v43  ;;  %5656 = vmatmul.msk.f32.gmra.mxu3 %vm77_vm0, %v5599_v55  ;;  %v4662_v59 = vmax.f32 %v4560_v34, 0.0  ;;  %v4035_v35 = vadd.f32 %v8671_v7, %v8895_v29  ;;  %v9395_v43 = vld [vmem:[#allocation50_spill] sm:$0xff]  ;;  %v5371_v29 = vld [vmem:[%s9262_s0 + $0xa90] sm:$0xff] }
 0x3d9   :  { %v3497_v62 = vpop.f32.mrf.mxu2  ;;  %v2597_v55 = vmax.f32 %v9395_v43, %v2540_v54 }
 0x3da   :  { %v4718_v44 = vmax.f32 %v4187_v32, %v4661_v23  ;;  %v3498_v58 = vadd.f32 %v8671_v7, %v3497_v62  ;;  %v2969_v13 = vpop.f32.mrf.mxu1  ;;  %v2445_v23 = vadd.f32 %v8671_v7, %v7366_v41  ;;  %v5485_v41 = vld [vmem:[%s9262_s0 + $0xc58] sm:$0xff] }
 0x3db   :  { %v2970_v5 = vadd.f32 %v8671_v7, %v2969_v13  ;;  %v8925_v16 = vpop.f32.mrf.mxu3 }
 0x3dc   :  { %4776 = vst.msk [vmem:[%s9264_s3 + $0x108] sm:$0xff] %vm4742_vm1, %v4718_v44  ;;  %v3600_v53 = vmax.f32 %v3498_v58, 0.0  ;;  %v4133_v44 = vmax.f32 %v4035_v35, 0.0  ;;  %v2541_v34 = vmax.f32 %v2445_v23, 0.0  ;;  %v4038_v14 = vadd.f32 %v8671_v7, %v8925_v16  ;;  %v5372_v16 = vld [vmem:[%s9262_s0 + $0xa98] sm:$0xff] }
 0x3dd   :  { %5426 = vmatmul.msk.f32.gmra.mxu1 %vm77_vm0, %v5369_v20  ;;  %v4562_v60 = vpop.f32.mrf.mxu0  ;;  %v3070_v39 = vmax.f32 %v2970_v5, 0.0 }
 0x3de   :  { %v3657_v9 = vmax.f32 %v3126_v4, %v3600_v53  ;;  %5540 = vmatmul.msk.f32.gmra.mxu2 %vm77_vm0, %v5483_v25  ;;  %v4563_v50 = vadd.f32 %v8671_v7, %v4562_v60  ;;  %v5713_v4 = vld [vmem:[%s9262_s0 + $0xfe8] sm:$0xff]  ;;  %v5602_v53 = vld [vmem:[%s9262_s0 + $0xe38] sm:$0x3] }
 0x3df   :  { %v3127_v10 = vmax.f32 %v2596_v6, %v3070_v39  ;;  %v9396_v60 = vld [vmem:[#allocation51_spill] sm:$0xff]  ;;  %v4134_v6 = vmax.f32 %v4038_v14, 0.0 }
 0x3e0   :  { %v4188_v30 = vmax.f32 %v3657_v9, %v4131_v36  ;;  %5768 = vmatmul.msk.f32.gmra.mxu0 %vm77_vm0, %v5711_v8  ;;  %5657 = vmatmul.msk.f32.gmra.mxu3 %vm77_vm0, %v5600_v12  ;;  %v4663_v17 = vmax.f32 %v4563_v50, 0.0  ;;  %v2448_v9 = vadd.f32 %v8671_v7, %v7391_v49  ;;  %v2598_v8 = vmax.f32 %v9396_v60, %v2541_v34  ;;  %v5486_v49 = vld [vmem:[%s9262_s0 + $0xc60] sm:$0xff] }
 0x3e1   :  { %v3500_v57 = vpop.f32.mrf.mxu2 }
 0x3e2   :  { %v4719_v22 = vmax.f32 %v4188_v30, %v4662_v59  ;;  %v3501_v3 = vadd.f32 %v8671_v7, %v3500_v57  ;;  %v2972_v63 = vpop.f32.mrf.mxu1 }
 0x3e3   :  { %v2973_v38 = vadd.f32 %v8671_v7, %v2972_v63  ;;  %v8955_v26 = vpop.f32.mrf.mxu3 }
 0x3e4   :  { %4777 = vst.msk [vmem:[%s9264_s3 + $0x110] sm:$0xff] %vm4742_vm1, %v4719_v22  ;;  %v3601_v45 = vmax.f32 %v3501_v3, 0.0  ;;  %v2542_v3 = vmax.f32 %v2448_v9, 0.0 }
 0x3e5   :  { %5427 = vmatmul.msk.f32.gmra.mxu1 %vm77_vm0, %v5370_v19  ;;  %v4565_v52 = vpop.f32.mrf.mxu0  ;;  %v3071_v24 = vmax.f32 %v2973_v38, 0.0  ;;  %v4041_v38 = vadd.f32 %v8671_v7, %v8955_v26  ;;  %v5487_v26 = vld [vmem:[%s9262_s0 + $0xc68] sm:$0xff] }
 0x3e6   :  { %v3658_v46 = vmax.f32 %v3127_v10, %v3601_v45  ;;  %5541 = vmatmul.msk.f32.gmra.mxu2 %vm77_vm0, %v5484_v33  ;;  %v4566_v40 = vadd.f32 %v8671_v7, %v4565_v52  ;;  %v5714_v33 = vld [vmem:[%s9262_s0 + $0xff0] sm:$0xff] }
 0x3e7   :  { %v3128_v62 = vmax.f32 %v2597_v55, %v3071_v24 }
 0x3e8   :  { %v4189_v2 = vmax.f32 %v3658_v46, %v4132_v28  ;;  %5769 = vmatmul.msk.f32.gmra.mxu0 %vm77_vm0, %v5712_v61  ;;  %5658 = vmatmul.msk.f32.gmra.mxu3 %vm77_vm0, %v5601_v48  ;;  %v4664_v20 = vmax.f32 %v4566_v40, 0.0  ;;  %v2451_v28 = vadd.f32 %v8671_v7, %v7416_v51  ;;  %v9397_v46 = vld [vmem:[#allocation52_spill] sm:$0xff] }
 0x3e9   :  { %v3503_v0 = vpop.f32.mrf.mxu2 }
 0x3ea   :  { %v4720_v21 = vmax.f32 %v4189_v2, %v4663_v17  ;;  %v3504_v32 = vadd.f32 %v8671_v7, %v3503_v0  ;;  %v2975_v56 = vpop.f32.mrf.mxu1  ;;  %v2599_v17 = vmax.f32 %v9397_v46, %v2542_v3  ;;  %v5373_v2 = vld [vmem:[%s9262_s0 + $0xaa0] sm:$0xff]  ;;  %v4135_v0 = vmax.f32 %v4041_v38, 0.0 }
 0x3eb   :  { %v2976_v18 = vadd.f32 %v8671_v7, %v2975_v56  ;;  %v8985_v58 = vpop.f32.mrf.mxu3  ;;  %v2543_v55 = vmax.f32 %v2451_v28, 0.0  ;;  %v5715_v56 = vld [vmem:[%s9262_s0 + $0xff8] sm:$0xff] }
 0x3ec   :  { %4778 = vst.msk [vmem:[%s9264_s3 + $0x118] sm:$0xff] %vm4742_vm1, %v4720_v21  ;;  %v3602_v37 = vmax.f32 %v3504_v32, 0.0 }
 0x3ed   :  { %5428 = vmatmul.msk.f32.gmra.mxu1 %vm77_vm0, %v5371_v29  ;;  %v4568_v25 = vpop.f32.mrf.mxu0  ;;  %v3072_v5 = vmax.f32 %v2976_v18, 0.0 }
 0x3ee   :  { %v3659_v13 = vmax.f32 %v3128_v62, %v3602_v37  ;;  %5542 = vmatmul.msk.f32.gmra.mxu2 %vm77_vm0, %v5485_v41  ;;  %v4569_v30 = vadd.f32 %v8671_v7, %v4568_v25  ;;  %v4044_v62 = vadd.f32 %v8671_v7, %v8985_v58  ;;  %v2454_v37 = vadd.f32 %v8671_v7, %v7441_v1  ;;  %v5488_v58 = vld [vmem:[%s9262_s0 + $0xc70] sm:$0x3] }
 0x3ef   :  { %v3129_v27 = vmax.f32 %v2598_v8, %v3072_v5 }
 0x3f0   :  { %v4190_v36 = vmax.f32 %v3659_v13, %v4133_v44  ;;  %5770 = vmatmul.msk.f32.gmra.mxu0 %vm77_vm0, %v5713_v4  ;;  %5659 = vmatmul.msk.f32.gmra.mxu3 %vm77_vm0, %v5602_v53  ;;  %v4665_v63 = vmax.f32 %v4569_v30, 0.0  ;;  %v9398_v44 = vld [vmem:[#allocation53_spill] sm:$0xff]  ;;  %v5374_v53 = vld [vmem:[%s9262_s0 + $0xaa8] sm:$0x3]  ;;  %v4136_v14 = vmax.f32 %v4044_v62, 0.0 }
 0x3f1   :  { %v3506_v59 = vpop.f32.mrf.mxu2  ;;  %v2600_v34 = vmax.f32 %v9398_v44, %v2543_v55 }
 0x3f2   :  { %v4721_v12 = vmax.f32 %v4190_v36, %v4664_v20  ;;  %v3507_v39 = vadd.f32 %v8671_v7, %v3506_v59  ;;  %v2978_v11 = vpop.f32.mrf.mxu1  ;;  %v2544_v59 = vmax.f32 %v2454_v37, 0.0 }
 0x3f3   :  { %v2979_v42 = vadd.f32 %v8671_v7, %v2978_v11  ;;  %v4046_v22 = vpop.f32.mrf.mxu3 }
 0x3f4   :  { %4779 = vst.msk [vmem:[%s9264_s3 + $0x120] sm:$0xff] %vm4742_vm1, %v4721_v12  ;;  %v3603_v57 = vmax.f32 %v3507_v39, 0.0  ;;  %v5716_v39 = vld [vmem:[%s9262_s0 + $0x1000] sm:$0x3] }
 0x3f5   :  { %5429 = vmatmul.msk.f32.gmra.mxu1 %vm77_vm0, %v5372_v16  ;;  %v4571_v19 = vpop.f32.mrf.mxu0  ;;  %v3073_v10 = vmax.f32 %v2979_v42, 0.0  ;;  %v4047_v16 = vadd.f32 %v8671_v7, %v4046_v22 }
 0x3f6   :  { %v3660_v50 = vmax.f32 %v3129_v27, %v3603_v57  ;;  %5543 = vmatmul.msk.f32.gmra.mxu2 %vm77_vm0, %v5486_v49  ;;  %v4572_v48 = vadd.f32 %v8671_v7, %v4571_v19  ;;  %v2457_v49 = vadd.f32 %v8671_v7, %v7466_v15  ;;  %v9399_v57 = vld [vmem:[#allocation54_spill] sm:$0xff] }
 0x3f7   :  { %v3130_v51 = vmax.f32 %v2599_v17, %v3073_v10  ;;  %v2601_v42 = vmax.f32 %v9399_v57, %v2544_v59 }
 0x3f8   :  { %v4191_v45 = vmax.f32 %v3660_v50, %v4134_v6  ;;  %5771 = vmatmul.msk.f32.gmra.mxu0 %vm77_vm0, %v5714_v33  ;;  %v4666_v32 = vmax.f32 %v4572_v48, 0.0  ;;  %v4137_v33 = vmax.f32 %v4047_v16, 0.0 }
 0x3f9   :  { %v3509_v54 = vpop.f32.mrf.mxu2 }
 0x3fa   :  { %v4722_v52 = vmax.f32 %v4191_v45, %v4665_v63  ;;  %v3510_v61 = vadd.f32 %v8671_v7, %v3509_v54  ;;  %v2981_v24 = vpop.f32.mrf.mxu1  ;;  %v2545_v45 = vmax.f32 %v2457_v49, 0.0  ;;  %v9403_v49 = vld [vmem:[#allocation58_spill] sm:$0xff] }
 0x3fb   :  { %v2982_v23 = vadd.f32 %v8671_v7, %v2981_v24  ;;  %v4049_v43 = vpop.f32.mrf.mxu3  ;;  %v9400_v24 = vld [vmem:[#allocation55_spill] sm:$0xff] }
 0x3fc   :  { %4780 = vst.msk [vmem:[%s9264_s3 + $0x128] sm:$0xff] %vm4742_vm1, %v4722_v52  ;;  %v3604_v35 = vmax.f32 %v3510_v61, 0.0  ;;  %v4050_v52 = vadd.f32 %v8671_v7, %v4049_v43  ;;  %v2460_v61 = vadd.f32 %v8671_v7, %v7491_v31 }
 0x3fd   :  { %5430 = vmatmul.msk.f32.gmra.mxu1 %vm77_vm0, %v5373_v2  ;;  %v4574_v40 = vpop.f32.mrf.mxu0  ;;  %v3074_v29 = vmax.f32 %v2982_v23, 0.0  ;;  %v2602_v2 = vmax.f32 %v9400_v24, %v2545_v45 }
 0x3fe   :  { %v3661_v21 = vmax.f32 %v3130_v51, %v3604_v35  ;;  %5544 = vmatmul.msk.f32.gmra.mxu2 %vm77_vm0, %v5487_v26  ;;  %v4575_v25 = vadd.f32 %v8671_v7, %v4574_v40 }
 0x3ff   :  { %v3131_v1 = vmax.f32 %v2600_v34, %v3074_v29  ;;  %v9401_v34 = vld [vmem:[#allocation56_spill] sm:$0xff] }
 0x400   :  { %v4192_v41 = vmax.f32 %v3661_v21, %v4135_v0  ;;  %5772 = vmatmul.msk.f32.gmra.mxu0 %vm77_vm0, %v5715_v56  ;;  %v4667_v8 = vmax.f32 %v4575_v25, 0.0  ;;  %v4138_v21 = vmax.f32 %v4050_v52, 0.0 }
 0x401   :  { %v3512_v18 = vpop.f32.mrf.mxu2 }
 0x402   :  { %v4723_v13 = vmax.f32 %v4192_v41, %v4666_v32  ;;  %v3513_v20 = vadd.f32 %v8671_v7, %v3512_v18  ;;  %v2984_v4 = vpop.f32.mrf.mxu1  ;;  %v2546_v32 = vmax.f32 %v2460_v61, 0.0  ;;  %v2463_v18 = vadd.f32 %v8671_v7, %v7516_v47 }
 0x403   :  { %v2985_v36 = vadd.f32 %v8671_v7, %v2984_v4  ;;  %v4052_v9 = vpop.f32.mrf.mxu3 }
 0x404   :  { %4781 = vst.msk [vmem:[%s9264_s3 + $0x130] sm:$0xff] %vm4742_vm1, %v4723_v13  ;;  %v3605_v5 = vmax.f32 %v3513_v20, 0.0  ;;  %v4053_v37 = vadd.f32 %v8671_v7, %v4052_v9  ;;  %v2603_v13 = vmax.f32 %v9401_v34, %v2546_v32  ;;  %v9407_v34 = vld [vmem:[#allocation61_spill] sm:$0xff] }
 0x405   :  { %5431 = vmatmul.msk.f32.gmra.mxu1 %vm77_vm0, %v5374_v53  ;;  %v4577_v12 = vpop.f32.mrf.mxu0  ;;  %v3075_v30 = vmax.f32 %v2985_v36, 0.0 }
 0x406   :  { %v3662_v60 = vmax.f32 %v3131_v1, %v3605_v5  ;;  %5545 = vmatmul.msk.f32.gmra.mxu2 %vm77_vm0, %v5488_v58  ;;  %v4578_v50 = vadd.f32 %v8671_v7, %v4577_v12  ;;  %v4139_v36 = vmax.f32 %v4053_v37, 0.0  ;;  %v9406_v37 = vld [vmem:[#allocation2_spill] sm:$0xff] }
 0x407   :  { %v3132_v19 = vmax.f32 %v2601_v42, %v3075_v30  ;;  %v9402_v30 = vld [vmem:[#allocation57_spill] sm:$0xff] }
 0x408   :  { %v4193_v11 = vmax.f32 %v3662_v60, %v4136_v14  ;;  %5773 = vmatmul.msk.f32.gmra.mxu0 %vm77_vm0, %v5716_v39  ;;  %v4668_v28 = vmax.f32 %v4578_v50, 0.0  ;;  %v2547_v14 = vmax.f32 %v2463_v18, 0.0  ;;  %v2472_v18 = vadd.f32 %v8671_v7, %v9406_v37 }
 0x409   :  { %v3515_v27 = vpop.f32.mrf.mxu2 }
 0x40a   :  { %v4724_v6 = vmax.f32 %v4193_v11, %v4667_v8  ;;  %v3516_v3 = vadd.f32 %v8671_v7, %v3515_v27  ;;  %v2987_v63 = vpop.f32.mrf.mxu1  ;;  %v2466_v11 = vadd.f32 %v8671_v7, %v9402_v30  ;;  %v2604_v27 = vmax.f32 %v9403_v49, %v2547_v14  ;;  %v9408_v30 = vld [vmem:[#allocation3_spill] sm:$0xff]  ;;  %v9409_v49 = vld [vmem:[#allocation62_spill] sm:$0xff] }
 0x40b   :  { %v2988_v15 = vadd.f32 %v8671_v7, %v2987_v63  ;;  %v4055_v10 = vpop.f32.mrf.mxu3  ;;  %v2550_v14 = vmax.f32 %v2472_v18, 0.0 }
 0x40c   :  { %4782 = vst.msk [vmem:[%s9264_s3 + $0x138] sm:$0xff] %vm4742_vm1, %v4724_v6  ;;  %v3606_v22 = vmax.f32 %v3516_v3, 0.0  ;;  %v4056_v39 = vadd.f32 %v8671_v7, %v4055_v10 }
 0x40d   :  { %v4580_v54 = vpop.f32.mrf.mxu0  ;;  %v3076_v46 = vmax.f32 %v2988_v15, 0.0 }
 0x40e   :  { %v3663_v38 = vmax.f32 %v3132_v19, %v3606_v22  ;;  %v4581_v35 = vadd.f32 %v8671_v7, %v4580_v54  ;;  %v4140_v22 = vmax.f32 %v4056_v39, 0.0 }
 0x40f   :  { %v3133_v0 = vmax.f32 %v2602_v2, %v3076_v46 }
 0x410   :  { %v4194_v17 = vmax.f32 %v3663_v38, %v4137_v33  ;;  %v4669_v56 = vmax.f32 %v4581_v35, 0.0  ;;  %v2548_v33 = vmax.f32 %v2466_v11, 0.0  ;;  %v2475_v11 = vadd.f32 %v8671_v7, %v9408_v30 }
 0x411   :  { %v3518_v48 = vpop.f32.mrf.mxu2 }
 0x412   :  { %v4725_v26 = vmax.f32 %v4194_v17, %v4668_v28  ;;  %v3519_v51 = vadd.f32 %v8671_v7, %v3518_v48  ;;  %v2990_v23 = vpop.f32.mrf.mxu1  ;;  %v9404_v17 = vld [vmem:[#allocation59_spill] sm:$0xff]  ;;  %v9405_v48 = vld [vmem:[#allocation60_spill] sm:$0xff] }
 0x413   :  { %v2991_v43 = vadd.f32 %v8671_v7, %v2990_v23  ;;  %v4058_v31 = vpop.f32.mrf.mxu3  ;;  %v2469_v52 = vadd.f32 %v8671_v7, %v9404_v17  ;;  %v2605_v24 = vmax.f32 %v9405_v48, %v2548_v33 }
 0x414   :  { %4783 = vst.msk [vmem:[%s9264_s3 + $0x140] sm:$0xff] %vm4742_vm1, %v4725_v26  ;;  %v3607_v55 = vmax.f32 %v3519_v51, 0.0  ;;  %v4059_v46 = vadd.f32 %v8671_v7, %v4058_v31 }
 0x415   :  { %v4583_v29 = vpop.f32.mrf.mxu0  ;;  %v3077_v41 = vmax.f32 %v2991_v43, 0.0  ;;  %v2549_v31 = vmax.f32 %v2469_v52, 0.0  ;;  %v9410_v52 = vld [vmem:[#allocation4_spill] sm:$0xff] }
 0x416   :  { %v3664_v40 = vmax.f32 %v3133_v0, %v3607_v55  ;;  %v4584_v4 = vadd.f32 %v8671_v7, %v4583_v29  ;;  %v4141_v43 = vmax.f32 %v4059_v46, 0.0  ;;  %v9149_v46 = vld [vmem:[%s9263_s2] ss:$0 sm:$0xff] }
 0x417   :  { %v3134_v58 = vmax.f32 %v2603_v13, %v3077_v41  ;;  %v2606_v13 = vmax.f32 %v9407_v34, %v2549_v31  ;;  %v9413_v34 = vld [vmem:[#allocation64_spill] sm:$0xff] }
 0x418   :  { %v4195_v62 = vmax.f32 %v3664_v40, %v4138_v21  ;;  %v4670_v59 = vmax.f32 %v4584_v4, 0.0 }
 0x419   :  { %v3521_v44 = vpop.f32.mrf.mxu2 }
 0x41a   :  { %v4726_v20 = vmax.f32 %v4195_v62, %v4669_v56  ;;  %v3522_v25 = vadd.f32 %v8671_v7, %v3521_v44  ;;  %v2993_v53 = vpop.f32.mrf.mxu1 }
 0x41b   :  { %v2994_v5 = vadd.f32 %v8671_v7, %v2993_v53  ;;  %v4061_v47 = vpop.f32.mrf.mxu3 }
 0x41c   :  { %4784 = vst.msk [vmem:[%s9264_s3 + $0x148] sm:$0xff] %vm4742_vm1, %v4726_v20  ;;  %v3608_v1 = vmax.f32 %v3522_v25, 0.0  ;;  %v4062_v62 = vadd.f32 %v8671_v7, %v4061_v47 }
 0x41d   :  { %v4586_v60 = vpop.f32.mrf.mxu0  ;;  %v3078_v8 = vmax.f32 %v2994_v5, 0.0 }
 0x41e   :  { %v3665_v9 = vmax.f32 %v3134_v58, %v3608_v1  ;;  %v4587_v6 = vadd.f32 %v8671_v7, %v4586_v60 }
 0x41f   :  { %v3135_v50 = vmax.f32 %v2604_v27, %v3078_v8  ;;  %v2607_v27 = vmax.f32 %v9409_v49, %v2550_v14 }
 0x420   :  { %v4196_v12 = vmax.f32 %v3665_v9, %v4139_v36  ;;  %v4671_v45 = vmax.f32 %v4587_v6, 0.0  ;;  %v4142_v36 = vmax.f32 %v4062_v62, 0.0  ;;  %v9412_v62 = vld [vmem:[#allocation5_spill] sm:$0xff] }
 0x421   :  { %v3524_v16 = vpop.f32.mrf.mxu2  ;;  %v2481_v37 = vadd.f32 %v9149_v46, %v9412_v62  ;;  %v9418_v62 = vld [vmem:[#allocation8_spill] sm:$0xff] }
 0x422   :  { %v4727_v57 = vmax.f32 %v4196_v12, %v4670_v59  ;;  %v3525_v42 = vadd.f32 %v8671_v7, %v3524_v16  ;;  %v2996_v3 = vpop.f32.mrf.mxu1 }
 0x423   :  { %v2997_v19 = vadd.f32 %v8671_v7, %v2996_v3  ;;  %v4064_v15 = vpop.f32.mrf.mxu3 }
 0x424   :  { %4785 = vst.msk [vmem:[%s9264_s3 + $0x150] sm:$0xff] %vm4742_vm1, %v4727_v57  ;;  %v3609_v63 = vmax.f32 %v3525_v42, 0.0  ;;  %v4065_v39 = vadd.f32 %v8671_v7, %v4064_v15  ;;  %v2551_v15 = vmax.f32 %v2475_v11, 0.0 }
 0x425   :  { %v4589_v38 = vpop.f32.mrf.mxu0  ;;  %v3079_v28 = vmax.f32 %v2997_v19, 0.0 }
 0x426   :  { %v3666_v10 = vmax.f32 %v3135_v50, %v3609_v63  ;;  %v4590_v51 = vadd.f32 %v8671_v7, %v4589_v38 }
 0x427   :  { %v3136_v23 = vmax.f32 %v2605_v24, %v3079_v28 }
 0x428   :  { %v4197_v54 = vmax.f32 %v3666_v10, %v4140_v22  ;;  %v4672_v40 = vmax.f32 %v4590_v51, 0.0  ;;  %v4143_v22 = vmax.f32 %v4065_v39, 0.0  ;;  %v9414_v39 = vld [vmem:[#allocation6_spill] sm:$0xff] }
 0x429   :  { %v3527_v61 = vpop.f32.mrf.mxu2  ;;  %v2484_v30 = vadd.f32 %v9149_v46, %v9414_v39  ;;  %v9420_v39 = vld [vmem:[#allocation9_spill] sm:$0xff] }
 0x42a   :  { %v4728_v2 = vmax.f32 %v4197_v54, %v4671_v45  ;;  %v3528_v26 = vadd.f32 %v8671_v7, %v3527_v61  ;;  %v2999_v35 = vpop.f32.mrf.mxu1  ;;  %v2478_v61 = vadd.f32 %v9149_v46, %v9410_v52 }
 0x42b   :  { %v3000_v55 = vadd.f32 %v8671_v7, %v2999_v35  ;;  %v4067_v21 = vpop.f32.mrf.mxu3 }
 0x42c   :  { %4786 = vst.msk [vmem:[%s9264_s3 + $0x158] sm:$0xff] %vm4742_vm1, %v4728_v2  ;;  %v3610_v0 = vmax.f32 %v3528_v26, 0.0  ;;  %v4068_v17 = vadd.f32 %v9149_v46, %v4067_v21  ;;  %v2552_v21 = vmax.f32 %v2478_v61, 0.0 }
 0x42d   :  { %v4592_v56 = vpop.f32.mrf.mxu0  ;;  %v3080_v29 = vmax.f32 %v3000_v55, 0.0 }
 0x42e   :  { %v3667_v32 = vmax.f32 %v3136_v23, %v3610_v0  ;;  %v4593_v4 = vadd.f32 %v8671_v7, %v4592_v56 }
 0x42f   :  { %v3137_v58 = vmax.f32 %v2606_v13, %v3080_v29  ;;  %v2609_v13 = vmax.f32 %v9413_v34, %v2552_v21 }
 0x430   :  { %v4198_v41 = vmax.f32 %v3667_v32, %v4141_v43  ;;  %v4673_v59 = vmax.f32 %v4593_v4, 0.0  ;;  %v4144_v43 = vmax.f32 %v4068_v17, 0.0  ;;  %v9416_v17 = vld [vmem:[#allocation7_spill] sm:$0xff] }
 0x431   :  { %v3530_v44 = vpop.f32.mrf.mxu2  ;;  %v2487_v52 = vadd.f32 %v9149_v46, %v9416_v17 }
 0x432   :  { %v4729_v20 = vmax.f32 %v4198_v41, %v4672_v40  ;;  %v3531_v25 = vadd.f32 %v8671_v7, %v3530_v44  ;;  %v3002_v53 = vpop.f32.mrf.mxu1 }
 0x433   :  { %v3003_v5 = vadd.f32 %v8671_v7, %v3002_v53  ;;  %v4070_v47 = vpop.f32.mrf.mxu3  ;;  %v2555_v21 = vmax.f32 %v2487_v52, 0.0 }
 0x434   :  { %4787 = vst.msk [vmem:[%s9264_s3 + $0x160] sm:$0xff] %vm4742_vm1, %v4729_v20  ;;  %v3611_v1 = vmax.f32 %v3531_v25, 0.0  ;;  %v4071_v41 = vadd.f32 %v9149_v46, %v4070_v47  ;;  %v2553_v47 = vmax.f32 %v2481_v37, 0.0  ;;  %v2490_v37 = vadd.f32 %v9149_v46, %v9418_v62 }
 0x435   :  { %v4595_v60 = vpop.f32.mrf.mxu0  ;;  %v3081_v8 = vmax.f32 %v3003_v5, 0.0 }
 0x436   :  { %v3668_v9 = vmax.f32 %v3137_v58, %v3611_v1  ;;  %v4596_v6 = vadd.f32 %v8671_v7, %v4595_v60 }
 0x437   :  { %v3138_v50 = vmax.f32 %v2607_v27, %v3081_v8 }
 0x438   :  { %v4199_v12 = vmax.f32 %v3668_v9, %v4142_v36  ;;  %v4674_v10 = vmax.f32 %v4596_v6, 0.0  ;;  %v4145_v36 = vmax.f32 %v4071_v41, 0.0 }
 0x439   :  { %v3533_v16 = vpop.f32.mrf.mxu2 }
 0x43a   :  { %v4730_v57 = vmax.f32 %v4199_v12, %v4673_v59  ;;  %v3534_v42 = vadd.f32 %v8671_v7, %v3533_v16  ;;  %v3005_v3 = vpop.f32.mrf.mxu1  ;;  %v9415_v16 = vld [vmem:[#allocation65_spill] sm:$0xff] }
 0x43b   :  { %v3006_v19 = vadd.f32 %v8671_v7, %v3005_v3  ;;  %v4073_v38 = vpop.f32.mrf.mxu3  ;;  %v9411_v7 = vld [vmem:[#allocation63_spill] sm:$0xff]  ;;  %v2610_v49 = vmax.f32 %v9415_v16, %v2553_v47  ;;  %v9421_v16 = vld [vmem:[#allocation68_spill] sm:$0xff] }
 0x43c   :  { %4788 = vst.msk [vmem:[%s9264_s3 + $0x168] sm:$0xff] %vm4742_vm1, %v4730_v57  ;;  %v3612_v63 = vmax.f32 %v3534_v42, 0.0  ;;  %v2608_v24 = vmax.f32 %v9411_v7, %v2551_v15  ;;  %v4074_v12 = vadd.f32 %v9149_v46, %v4073_v38  ;;  %v2554_v15 = vmax.f32 %v2484_v30, 0.0 }
 0x43d   :  { %v4598_v45 = vpop.f32.mrf.mxu0  ;;  %v3082_v28 = vmax.f32 %v3006_v19, 0.0  ;;  %v2493_v30 = vadd.f32 %v9149_v46, %v9420_v39 }
 0x43e   :  { %v3669_v33 = vmax.f32 %v3138_v50, %v3612_v63  ;;  %v4599_v51 = vadd.f32 %v9149_v46, %v4598_v45 }
 0x43f   :  { %v3139_v23 = vmax.f32 %v2608_v24, %v3082_v28 }
 0x440   :  { %v4200_v54 = vmax.f32 %v3669_v33, %v4143_v22  ;;  %v4675_v32 = vmax.f32 %v4599_v51, 0.0  ;;  %v4146_v22 = vmax.f32 %v4074_v12, 0.0 }
 0x441   :  { %v3536_v48 = vpop.f32.mrf.mxu2 }
 0x442   :  { %v4731_v2 = vmax.f32 %v4200_v54, %v4674_v10  ;;  %v3537_v26 = vadd.f32 %v9149_v46, %v3536_v48  ;;  %v3008_v35 = vpop.f32.mrf.mxu1  ;;  %v9417_v48 = vld [vmem:[#allocation66_spill] sm:$0xff] }
 0x443   :  { %v3009_v55 = vadd.f32 %v9149_v46, %v3008_v35  ;;  %v4076_v44 = vpop.f32.mrf.mxu3  ;;  %v2611_v7 = vmax.f32 %v9417_v48, %v2554_v15  ;;  %v9423_v48 = vld [vmem:[#allocation69_spill] sm:$0xff] }
 0x444   :  { %4789 = vst.msk [vmem:[%s9264_s3 + $0x170] sm:$0xff] %vm4742_vm1, %v4731_v2  ;;  %v3613_v0 = vmax.f32 %v3537_v26, 0.0  ;;  %v4077_v54 = vadd.f32 %v9149_v46, %v4076_v44  ;;  %v9419_v44 = vld [vmem:[#allocation67_spill] sm:$0xff] }
 0x445   :  { %v4601_v40 = vpop.f32.mrf.mxu0  ;;  %v3083_v56 = vmax.f32 %v3009_v55, 0.0  ;;  %v2612_v34 = vmax.f32 %v9419_v44, %v2555_v21 }
 0x446   :  { %v3670_v31 = vmax.f32 %v3139_v23, %v3613_v0  ;;  %v4602_v4 = vadd.f32 %v9149_v46, %v4601_v40  ;;  %v4147_v55 = vmax.f32 %v4077_v54, 0.0  ;;  %v9422_v54 = vld [vmem:[#allocation10_spill] sm:$0xff] }
 0x447   :  { %v3140_v58 = vmax.f32 %v2609_v13, %v3083_v56  ;;  %v2496_v17 = vadd.f32 %v9149_v46, %v9422_v54 }
 0x448   :  { %v4201_v29 = vmax.f32 %v3670_v31, %v4144_v43  ;;  %v4676_v9 = vmax.f32 %v4602_v4, 0.0 }
 0x449   :  { %v3539_v18 = vpop.f32.mrf.mxu2 }
 0x44a   :  { %v4732_v20 = vmax.f32 %v4201_v29, %v4675_v32  ;;  %v3540_v25 = vadd.f32 %v9149_v46, %v3539_v18  ;;  %v3011_v53 = vpop.f32.mrf.mxu1 }
 0x44b   :  { %v3012_v5 = vadd.f32 %v9149_v46, %v3011_v53  ;;  %v4079_v3 = vpop.f32.mrf.mxu3 }
 0x44c   :  { %4790 = vst.msk [vmem:[%s9264_s3 + $0x178] sm:$0xff] %vm4742_vm1, %v4732_v20  ;;  %v3614_v1 = vmax.f32 %v3540_v25, 0.0  ;;  %v4080_v41 = vadd.f32 %v9149_v46, %v4079_v3 }
 0x44d   :  { %v4604_v59 = vpop.f32.mrf.mxu0  ;;  %v3084_v60 = vmax.f32 %v3012_v5, 0.0 }
 0x44e   :  { %v3671_v14 = vmax.f32 %v3140_v58, %v3614_v1  ;;  %v4605_v42 = vadd.f32 %v9149_v46, %v4604_v59  ;;  %v4148_v5 = vmax.f32 %v4080_v41, 0.0  ;;  %v9424_v41 = vld [vmem:[#allocation11_spill] sm:$0xff] }
 0x44f   :  { %v3141_v50 = vmax.f32 %v2610_v49, %v3084_v60  ;;  %v2499_v62 = vadd.f32 %v9149_v46, %v9424_v41 }
 0x450   :  { %v4202_v8 = vmax.f32 %v3671_v14, %v4145_v36  ;;  %v4677_v10 = vmax.f32 %v4605_v42, 0.0  ;;  %v2556_v36 = vmax.f32 %v2490_v37, 0.0 }
 0x451   :  { %v3542_v11 = vpop.f32.mrf.mxu2 }
 0x452   :  { %v4733_v27 = vmax.f32 %v4202_v8, %v4676_v9  ;;  %v3543_v57 = vadd.f32 %v9149_v46, %v3542_v11  ;;  %v3014_v6 = vpop.f32.mrf.mxu1  ;;  %v2613_v49 = vmax.f32 %v9421_v16, %v2556_v36  ;;  %v2559_v36 = vmax.f32 %v2499_v62, 0.0 }
 0x453   :  { %v3015_v19 = vadd.f32 %v9149_v46, %v3014_v6  ;;  %v4082_v43 = vpop.f32.mrf.mxu3 }
 0x454   :  { %4791 = vst.msk [vmem:[%s9264_s3 + $0x180] sm:$0xff] %vm4742_vm1, %v4733_v27  ;;  %v3615_v63 = vmax.f32 %v3543_v57, 0.0  ;;  %v4083_v12 = vadd.f32 %v9149_v46, %v4082_v43  ;;  %v2558_v43 = vmax.f32 %v2496_v17, 0.0  ;;  %v9428_v17 = vld [vmem:[#allocation13_spill] sm:$0xff] }
 0x455   :  { %v4607_v45 = vpop.f32.mrf.mxu0  ;;  %v3085_v38 = vmax.f32 %v3015_v19, 0.0 }
 0x456   :  { %v3672_v33 = vmax.f32 %v3141_v50, %v3615_v63  ;;  %v4608_v26 = vadd.f32 %v9149_v46, %v4607_v45  ;;  %v4149_v19 = vmax.f32 %v4083_v12, 0.0  ;;  %v9426_v12 = vld [vmem:[#allocation12_spill] sm:$0xff] }
 0x457   :  { %v3142_v35 = vmax.f32 %v2611_v7, %v3085_v38  ;;  %v2502_v39 = vadd.f32 %v9149_v46, %v9426_v12 }
 0x458   :  { %v4203_v28 = vmax.f32 %v3672_v33, %v4146_v22  ;;  %v4678_v32 = vmax.f32 %v4608_v26, 0.0  ;;  %v2557_v22 = vmax.f32 %v2493_v30, 0.0 }
 0x459   :  { %v3545_v61 = vpop.f32.mrf.mxu2 }
 0x45a   :  { %v4734_v24 = vmax.f32 %v4203_v28, %v4677_v10  ;;  %v3546_v2 = vadd.f32 %v9149_v46, %v3545_v61  ;;  %v3017_v51 = vpop.f32.mrf.mxu1  ;;  %v2614_v7 = vmax.f32 %v9423_v48, %v2557_v22  ;;  %v2560_v22 = vmax.f32 %v2502_v39, 0.0 }
 0x45b   :  { %v3018_v0 = vadd.f32 %v9149_v46, %v3017_v51  ;;  %v4085_v59 = vpop.f32.mrf.mxu3 }
 0x45c   :  { %4792 = vst.msk [vmem:[%s9264_s3 + $0x188] sm:$0xff] %vm4742_vm1, %v4734_v24  ;;  %v3616_v23 = vmax.f32 %v3546_v2, 0.0  ;;  %v4086_v28 = vadd.f32 %v9149_v46, %v4085_v59 }
 0x45d   :  { %v4610_v40 = vpop.f32.mrf.mxu0  ;;  %v3086_v56 = vmax.f32 %v3018_v0, 0.0 }
 0x45e   :  { %v3673_v31 = vmax.f32 %v3142_v35, %v3616_v23  ;;  %v4611_v25 = vadd.f32 %v9149_v46, %v4610_v40 }
 0x45f   :  { %v3143_v53 = vmax.f32 %v2612_v34, %v3086_v56 }
 0x460   :  { %v4204_v29 = vmax.f32 %v3673_v31, %v4147_v55  ;;  %v4679_v14 = vmax.f32 %v4611_v25, 0.0  ;;  %v4150_v55 = vmax.f32 %v4086_v28, 0.0 }
 0x461   :  { %v3548_v18 = vpop.f32.mrf.mxu2 }
 0x462   :  { %v4735_v13 = vmax.f32 %v4204_v29, %v4678_v32  ;;  %v3549_v20 = vadd.f32 %v9149_v46, %v3548_v18  ;;  %v3020_v4 = vpop.f32.mrf.mxu1  ;;  %v9425_v18 = vld [vmem:[#allocation70_spill] sm:$0xff] }
 0x463   :  { %v3021_v1 = vadd.f32 %v9149_v46, %v3020_v4  ;;  %v4088_v61 = vpop.f32.mrf.mxu3  ;;  %v2615_v44 = vmax.f32 %v9425_v18, %v2558_v43 }
 0x464   :  { %4793 = vst.msk [vmem:[%s9264_s3 + $0x190] sm:$0xff] %vm4742_vm1, %v4735_v13  ;;  %v3617_v58 = vmax.f32 %v3549_v20, 0.0  ;;  %v4089_v29 = vadd.f32 %v9149_v46, %v4088_v61 }
 0x465   :  { %v4613_v9 = vpop.f32.mrf.mxu0  ;;  %v3087_v60 = vmax.f32 %v3021_v1, 0.0 }
 0x466   :  { %v3674_v47 = vmax.f32 %v3143_v53, %v3617_v58  ;;  %v4614_v42 = vadd.f32 %v9149_v46, %v4613_v9 }
 0x467   :  { %v3144_v3 = vmax.f32 %v2613_v49, %v3087_v60 }
 0x468   :  { %v4205_v8 = vmax.f32 %v3674_v47, %v4148_v5  ;;  %v4680_v33 = vmax.f32 %v4614_v42, 0.0  ;;  %v4151_v5 = vmax.f32 %v4089_v29, 0.0 }
 0x469   :  { %v3551_v11 = vpop.f32.mrf.mxu2 }
 0x46a   :  { %v4736_v27 = vmax.f32 %v4205_v8, %v4679_v14  ;;  %v3552_v57 = vadd.f32 %v9149_v46, %v3551_v11  ;;  %v3023_v6 = vpop.f32.mrf.mxu1  ;;  %v9427_v11 = vld [vmem:[#allocation71_spill] sm:$0xff] }
 0x46b   :  { %v3024_v63 = vadd.f32 %v9149_v46, %v3023_v6  ;;  %v4091_v4 = vpop.f32.mrf.mxu3  ;;  %v2616_v16 = vmax.f32 %v9427_v11, %v2559_v36 }
 0x46c   :  { %4794 = vst.msk [vmem:[%s9264_s3 + $0x198] sm:$0xff] %vm4742_vm1, %v4736_v27  ;;  %v3618_v50 = vmax.f32 %v3552_v57, 0.0  ;;  %v4092_v8 = vadd.f32 %v9149_v46, %v4091_v4 }
 0x46d   :  { %v4616_v10 = vpop.f32.mrf.mxu0  ;;  %v3088_v45 = vmax.f32 %v3024_v63, 0.0 }
 0x46e   :  { %v3675_v15 = vmax.f32 %v3144_v3, %v3618_v50  ;;  %v4617_v26 = vadd.f32 %v9149_v46, %v4616_v10  ;;  %v4152_v63 = vmax.f32 %v4092_v8, 0.0 }
 0x46f   :  { %v3145_v35 = vmax.f32 %v2614_v7, %v3088_v45 }
 0x470   :  { %v4206_v38 = vmax.f32 %v3675_v15, %v4149_v19  ;;  %v4681_v31 = vmax.f32 %v4617_v26, 0.0 }
 0x471   :  { %v3554_v52 = vpop.f32.mrf.mxu2 }
 0x472   :  { %v4737_v24 = vmax.f32 %v4206_v38, %v4680_v33  ;;  %v3555_v2 = vadd.f32 %v9149_v46, %v3554_v52  ;;  %v3026_v51 = vpop.f32.mrf.mxu1  ;;  %v2617_v52 = vmax.f32 %v9428_v17, %v2560_v22 }
 0x473   :  { %v3027_v0 = vadd.f32 %v9149_v46, %v3026_v51  ;;  %v4094_v19 = vpop.f32.mrf.mxu3 }
 0x474   :  { %4795 = vst.msk [vmem:[%s9264_s3 + $0x1a0] sm:$0xff] %vm4742_vm1, %v4737_v24  ;;  %v3619_v23 = vmax.f32 %v3555_v2, 0.0  ;;  %v4095_v28 = vadd.f32 %v9149_v46, %v4094_v19 }
 0x475   :  { %v4619_v32 = vpop.f32.mrf.mxu0  ;;  %v3089_v40 = vmax.f32 %v3027_v0, 0.0 }
 0x476   :  { %v3676_v21 = vmax.f32 %v3145_v35, %v3619_v23  ;;  %v4620_v20 = vadd.f32 %v9149_v46, %v4619_v32  ;;  %v4153_v26 = vmax.f32 %v4095_v28, 0.0 }
 0x477   :  { %v3146_v53 = vmax.f32 %v2615_v44, %v3089_v40 }
 0x478   :  { %v4207_v56 = vmax.f32 %v3676_v21, %v4150_v55  ;;  %v4682_v14 = vmax.f32 %v4620_v20, 0.0 }
 0x479   :  { %v3557_v37 = vpop.f32.mrf.mxu2 }
 0x47a   :  { %v4738_v34 = vmax.f32 %v4207_v56, %v4681_v31  ;;  %v3558_v13 = vadd.f32 %v9149_v46, %v3557_v37  ;;  %v3029_v25 = vpop.f32.mrf.mxu1 }
 0x47b   :  { %v3030_v1 = vadd.f32 %v9149_v46, %v3029_v25 }
 0x47c   :  { %4796 = vst.msk [vmem:[%s9264_s3 + $0x1a8] sm:$0xff] %vm4742_vm1, %v4738_v34  ;;  %v3620_v58 = vmax.f32 %v3558_v13, 0.0 }
 0x47d   :  { %v4622_v9 = vpop.f32.mrf.mxu0  ;;  %v3090_v59 = vmax.f32 %v3030_v1, 0.0 }
 0x47e   :  { %v3677_v47 = vmax.f32 %v3146_v53, %v3620_v58  ;;  %v4623_v57 = vadd.f32 %v9149_v46, %v4622_v9 }
 0x47f   :  { %v3147_v6 = vmax.f32 %v2616_v16, %v3090_v59 }
 0x480   :  { %v4208_v60 = vmax.f32 %v3677_v47, %v4151_v5  ;;  %v4683_v33 = vmax.f32 %v4623_v57, 0.0 }
 0x481   :  { %v3560_v30 = vpop.f32.mrf.mxu2 }
 0x482   :  { %v4739_v49 = vmax.f32 %v4208_v60, %v4682_v14  ;;  %v3561_v27 = vadd.f32 %v9149_v46, %v3560_v30  ;;  %v3032_v42 = vpop.f32.mrf.mxu1 }
 0x483   :  { %v3033_v50 = vadd.f32 %v9149_v46, %v3032_v42 }
 0x484   :  { %4797 = vst.msk [vmem:[%s9264_s3 + $0x1b0] sm:$0xff] %vm4742_vm1, %v4739_v49  ;;  %v3621_v3 = vmax.f32 %v3561_v27, 0.0 }
 0x485   :  { %v4625_v10 = vpop.f32.mrf.mxu0  ;;  %v3091_v45 = vmax.f32 %v3033_v50, 0.0 }
 0x486   :  { %v3678_v15 = vmax.f32 %v3147_v6, %v3621_v3  ;;  %v4626_v7 = vadd.f32 %v9149_v46, %v4625_v10 }
 0x487   :  { %v3148_v24 = vmax.f32 %v2617_v52, %v3091_v45 }
 0x488   :  { %v4209_v38 = vmax.f32 %v3678_v15, %v4152_v63  ;;  %v4684_v35 = vmax.f32 %v4626_v7, 0.0 }
 0x489   :  { %v3563_v54 = vpop.f32.mrf.mxu2 }
 0x48a   :  { %v4740_v61 = vmax.f32 %v4209_v38, %v4683_v33  ;;  %v3564_v48 = vadd.f32 %v9149_v46, %v3563_v54 }
 0x48c   :  { %4798 = vst.msk [vmem:[%s9264_s3 + $0x1b8] sm:$0xff] %vm4742_vm1, %v4740_v61  ;;  %v3622_v2 = vmax.f32 %v3564_v48, 0.0 }
 0x48e   :  { %v3679_v51 = vmax.f32 %v3148_v24, %v3622_v2 }
 0x490   :  { %v4210_v23 = vmax.f32 %v3679_v51, %v4153_v26 }
 0x492   :  { %v4741_v0 = vmax.f32 %v4210_v23, %v4684_v35 }
 0x494   :  { %4800 = vst.msk [vmem:[%s9264_s3 + $0x1c0] sm:$0x3] %vm4799_vm2, %v4741_v0 }

</bundles_post_ra>
